<compile_context>
chip_gen: v5e
topology: v5e:2x2
jax: 0.10.0
libtpu: 0.0.40
codegen_flags: <defaults>
</compile_context>

<pallas_src>
import functools
import math

import jax
import jax.numpy as jnp
from jax.experimental import pallas as pl
from jax.experimental.pallas import tpu as pltpu


def _upblock_kernel(x_ref, xs_ref, m_ref, w0_ref, w1_ref, w2_ref, b_ref,
                    oe_ref, oo_ref, *, norm, last, eps, inv_n):
    """One batch sample of one UpBlock.

    x_ref  : (T, Cin)   x[t]
    xs_ref : (T, Cin)   x[t+1] (zero padded at the end)
    m_ref  : (T, 1)     0/1 mask (same value covers output 2t and 2t+1)
    w*_ref : (Cin, Cout) kernel taps 0/1/2 of the ConvTranspose1d weight
    b_ref  : (1, Cout)
    oe_ref : (T, Cout)  even time outputs y[2t]
    oo_ref : (T, Cout)  odd  time outputs y[2t+1]
    """
    x = x_ref[...]
    xs = xs_ref[...]
    m = m_ref[...]
    w0 = w0_ref[...]
    w1 = w1_ref[...]
    w2 = w2_ref[...]
    bias = b_ref[...]

    # ConvTranspose1d(k=3, s=2, p=1, op=1) as three matmuls on the MXU.
    ye = jnp.dot(x, w1, preferred_element_type=jnp.float32) + bias
    yo = (jnp.dot(x, w2, preferred_element_type=jnp.float32)
          + jnp.dot(xs, w0, preferred_element_type=jnp.float32) + bias)

    # Masked conv output (nearest-upsampled mask is equal at 2t and 2t+1).
    ye = ye * m
    yo = yo * m

    if norm:
        # InstanceNorm1d over the full interleaved time axis (length 2T),
        # biased variance, eps=1e-5, affine=False.
        mean = (jnp.sum(ye, axis=0, keepdims=True)
                + jnp.sum(yo, axis=0, keepdims=True)) * inv_n
        de = ye - mean
        do = yo - mean
        var = (jnp.sum(de * de, axis=0, keepdims=True)
               + jnp.sum(do * do, axis=0, keepdims=True)) * inv_n
        inv_std = jax.lax.rsqrt(var + eps)
        ye = de * inv_std
        yo = do * inv_std

    if last:
        ye = jnp.tanh(ye)
        yo = jnp.tanh(yo)
    else:
        ye = jnp.where(ye >= 0, ye, 0.2 * ye)
        yo = jnp.where(yo >= 0, yo, 0.2 * yo)

    oe_ref[...] = ye.astype(oe_ref.dtype)
    oo_ref[...] = yo.astype(oo_ref.dtype)


def upblock_pallas(x, mask, w, bias, *, norm=True, last=False, eps=1e-5):
    """One UpBlock.

    x:    (B, T, Cin)  channel-last activations
    mask: (B, T, 1)    float 0/1
    w:    (Cin, Cout, 3)  PyTorch ConvTranspose1d weight layout
    bias: (Cout,)
    Returns (y, new_mask): y (B, 2T, Cout), new_mask (B, 2T, 1).
    """
    B, T, Cin = x.shape
    Cout = w.shape[1]

    w0 = w[:, :, 0]
    w1 = w[:, :, 1]
    w2 = w[:, :, 2]
    bias2 = bias.reshape(1, Cout)
    # x[t+1], zero padded (matches the transposed-conv zero boundary).
    x_shift = jnp.concatenate([x[:, 1:, :], jnp.zeros((B, 1, Cin), x.dtype)],
                              axis=1)

    kernel = functools.partial(_upblock_kernel, norm=norm, last=last, eps=eps,
                               inv_n=1.0 / (2.0 * T))

    y_even, y_odd = pl.pallas_call(
        kernel,
        out_shape=(
            jax.ShapeDtypeStruct((B, T, Cout), x.dtype),
            jax.ShapeDtypeStruct((B, T, Cout), x.dtype),
        ),
        grid=(B,),
        in_specs=[
            pl.BlockSpec((None, T, Cin), lambda b: (b, 0, 0)),
            pl.BlockSpec((None, T, Cin), lambda b: (b, 0, 0)),
            pl.BlockSpec((None, T, 1), lambda b: (b, 0, 0)),
            pl.BlockSpec((Cin, Cout), lambda b: (0, 0)),
            pl.BlockSpec((Cin, Cout), lambda b: (0, 0)),
            pl.BlockSpec((Cin, Cout), lambda b: (0, 0)),
            pl.BlockSpec((1, Cout), lambda b: (0, 0)),
        ],
        out_specs=(
            pl.BlockSpec((None, T, Cout), lambda b: (b, 0, 0)),
            pl.BlockSpec((None, T, Cout), lambda b: (b, 0, 0)),
        ),
        compiler_params=pltpu.CompilerParams(
            dimension_semantics=("parallel",)),
    )(x, x_shift, mask, w0, w1, w2, bias2)

    # Interleave even/odd along time: (B, T, 2, C) -> (B, 2T, C) is contiguous.
    y = jnp.stack([y_even, y_odd], axis=2).reshape(B, 2 * T, Cout)
    # Nearest-neighbour 2x upsample of the mask: out_mask[i] = mask[i // 2].
    new_mask = jnp.repeat(mask, 2, axis=1)
    return y, new_mask


def init_expansion_params(key, in_channels, out_channels, hidden_dims=2048,
                          dtype=jnp.float32):
    chans = [in_channels, hidden_dims, hidden_dims // 2, hidden_dims // 4,
             hidden_dims // 8, out_channels]
    params = []
    for cin, cout in zip(chans[:-1], chans[1:]):
        key, kw, kb = jax.random.split(key, 3)
        bound = 1.0 / math.sqrt(cin * 3)
        w = jax.random.uniform(kw, (cin, cout, 3), dtype, -bound, bound)
        b = jax.random.uniform(kb, (cout,), dtype, -bound, bound)
        params.append((w, b))
    return params


@functools.partial(jax.jit, static_argnames=("tanh",))
def expansion_forward(params, x, mask, tanh=True):
    """Expansion.forward. x: (B, C_in, T), mask: (B, 1, T) bool.

    Returns (y, out_mask): y (B, C_out, 32*T), out_mask (B, 1, 32*T) bool.
    """
    xt = jnp.transpose(x, (0, 2, 1))                      # (B, T, Cin)
    m = mask[:, 0, :].astype(x.dtype)[..., None]          # (B, T, 1)
    n = len(params)
    for i, (w, b) in enumerate(params):
        last = tanh and (i == n - 1)
        xt, m = upblock_pallas(xt, m, w, b, norm=True, last=last)
    out = jnp.transpose(xt, (0, 2, 1))                    # (B, C_out, T_out)
    out_mask = jnp.transpose(m, (0, 2, 1)).astype(bool)   # (B, 1, T_out)
    return out, out_mask


def expansion_reference(params, x, mask, tanh=True, eps=1e-5):
    """Pure-JAX reference matching the PyTorch module (conv via lax.conv)."""
    m = mask.astype(x.dtype)                              # (B, 1, T)
    n = len(params)
    y = x
    for i, (w, b) in enumerate(params):
        # ConvTranspose1d == dilated conv with flipped, transposed kernel.
        w_conv = jnp.transpose(w[:, :, ::-1], (1, 0, 2))  # (Cout, Cin, K)
        y = jax.lax.conv_general_dilated(
            y, w_conv, window_strides=(1,), padding=[(1, 2)],
            lhs_dilation=(2,), rhs_dilation=(1,),
            dimension_numbers=("NCH", "OIH", "NCH"),
            precision=jax.lax.Precision.HIGHEST)
        y = y + b[None, :, None]
        m = jnp.repeat(m, 2, axis=-1)                     # nearest upsample x2
        y = y * m
        mean = jnp.mean(y, axis=-1, keepdims=True)
        var = jnp.mean((y - mean) ** 2, axis=-1, keepdims=True)
        y = (y - mean) * jax.lax.rsqrt(var + eps)
        last = tanh and (i == n - 1)
        y = jnp.tanh(y) if last else jnp.where(y >= 0, y, 0.2 * y)
    return y, m.astype(bool)


if __name__ == "__main__":
    key = jax.random.PRNGKey(0)
    k_params, k_x = jax.random.split(key)

    # Small shapes consistent with the module (hidden_dims is a ctor arg).
    B, C_in, C_out, T, hidden = 2, 16, 8, 8, 32
    params = init_expansion_params(k_params, C_in, C_out, hidden_dims=hidden)

    x = jax.random.normal(k_x, (B, C_in, T), dtype=jnp.float32)
    lengths = jnp.array([T, 5])
    mask = (jnp.arange(T)[None, :] < lengths[:, None])[:, None, :]  # (B,1,T)

    out, out_mask = expansion_forward(params, x, mask, tanh=True)
    out = jax.block_until_ready(out)

    ref, ref_mask = expansion_reference(params, x, mask, tanh=True)

    assert out.shape == (B, C_out, 32 * T), out.shape
    assert out_mask.shape == (B, 1, 32 * T), out_mask.shape
    assert out.dtype == x.dtype
    assert bool(jnp.array_equal(out_mask, ref_mask))
    max_err = float(jnp.max(jnp.abs(out - ref)))
    assert bool(jnp.allclose(out, ref, atol=5e-2, rtol=5e-2)), max_err

    print("KERNEL_OK")
</pallas_src>

<mosaic_0001>
module attributes {stable_mosaic.version = 11 : i64} {
  func.func @_upblock_kernel(%arg0: i32, %arg1: memref<1x8x16xf32, #tpu.memory_space<vmem>>, %arg2: memref<1x8x16xf32, #tpu.memory_space<vmem>>, %arg3: memref<1x8x1xf32, #tpu.memory_space<vmem>>, %arg4: memref<16x32xf32, #tpu.memory_space<vmem>>, %arg5: memref<16x32xf32, #tpu.memory_space<vmem>>, %arg6: memref<16x32xf32, #tpu.memory_space<vmem>>, %arg7: memref<1x32xf32, #tpu.memory_space<vmem>>, %arg8: memref<1x8x32xf32, #tpu.memory_space<vmem>>, %arg9: memref<1x8x32xf32, #tpu.memory_space<vmem>>) attributes {dimension_semantics = [#tpu.dimension_semantics<parallel>], iteration_bounds = array<i64: 2>, scalar_prefetch = 0 : i64, scratch_operands = 0 : i64, tpu.core_type = #tpu.core_type<tc>, window_params = [{transform_indices = @transform_0, window_bounds = array<i64: 1, 8, 16>}, {transform_indices = @transform_1, window_bounds = array<i64: 1, 8, 16>}, {transform_indices = @transform_2, window_bounds = array<i64: 1, 8, 1>}, {pipeline_mode = #tpu.pipeline_mode<synchronous>, transform_indices = @transform_3, window_bounds = array<i64: 16, 32>}, {pipeline_mode = #tpu.pipeline_mode<synchronous>, transform_indices = @transform_4, window_bounds = array<i64: 16, 32>}, {pipeline_mode = #tpu.pipeline_mode<synchronous>, transform_indices = @transform_5, window_bounds = array<i64: 16, 32>}, {pipeline_mode = #tpu.pipeline_mode<synchronous>, transform_indices = @transform_6, window_bounds = array<i64: 1, 32>}, {transform_indices = @transform_7, window_bounds = array<i64: 1, 8, 32>}, {transform_indices = @transform_8, window_bounds = array<i64: 1, 8, 32>}]} {
    %c0 = arith.constant 0 : index
    %c0_0 = arith.constant 0 : index
    %c0_1 = arith.constant 0 : index
    %0 = vector.load %arg1[%c0, %c0_0, %c0_1] : memref<1x8x16xf32, #tpu.memory_space<vmem>>, vector<1x8x16xf32>
    %1 = vector.shape_cast %0 : vector<1x8x16xf32> to vector<8x16xf32>
    %c0_2 = arith.constant 0 : index
    %c0_3 = arith.constant 0 : index
    %c0_4 = arith.constant 0 : index
    %2 = vector.load %arg2[%c0_2, %c0_3, %c0_4] : memref<1x8x16xf32, #tpu.memory_space<vmem>>, vector<1x8x16xf32>
    %3 = vector.shape_cast %2 : vector<1x8x16xf32> to vector<8x16xf32>
    %c0_5 = arith.constant 0 : index
    %c0_6 = arith.constant 0 : index
    %c0_7 = arith.constant 0 : index
    %4 = vector.load %arg3[%c0_5, %c0_6, %c0_7] : memref<1x8x1xf32, #tpu.memory_space<vmem>>, vector<1x8x1xf32>
    %5 = vector.shape_cast %4 : vector<1x8x1xf32> to vector<8x1xf32>
    %c0_8 = arith.constant 0 : index
    %c0_9 = arith.constant 0 : index
    %6 = vector.load %arg4[%c0_8, %c0_9] : memref<16x32xf32, #tpu.memory_space<vmem>>, vector<16x32xf32>
    %c0_10 = arith.constant 0 : index
    %c0_11 = arith.constant 0 : index
    %7 = vector.load %arg5[%c0_10, %c0_11] : memref<16x32xf32, #tpu.memory_space<vmem>>, vector<16x32xf32>
    %c0_12 = arith.constant 0 : index
    %c0_13 = arith.constant 0 : index
    %8 = vector.load %arg6[%c0_12, %c0_13] : memref<16x32xf32, #tpu.memory_space<vmem>>, vector<16x32xf32>
    %c0_14 = arith.constant 0 : index
    %c0_15 = arith.constant 0 : index
    %9 = vector.load %arg7[%c0_14, %c0_15] : memref<1x32xf32, #tpu.memory_space<vmem>>, vector<1x32xf32>
    %cst = arith.constant dense<0.000000e+00> : vector<8x32xf32>
    %10 = tpu.matmul %1, %7, %cst {dimension_numbers = #tpu.dot_dimension_numbers<[1], [0], [0], [1], [0, 0, 1, 1], [], []>} : vector<8x16xf32>, vector<16x32xf32>, vector<8x32xf32> -> vector<8x32xf32>
    %11 = vector.broadcast %9 : vector<1x32xf32> to vector<8x32xf32>
    %12 = arith.addf %10, %11 : vector<8x32xf32>
    %cst_16 = arith.constant dense<0.000000e+00> : vector<8x32xf32>
    %13 = tpu.matmul %1, %8, %cst_16 {dimension_numbers = #tpu.dot_dimension_numbers<[1], [0], [0], [1], [0, 0, 1, 1], [], []>} : vector<8x16xf32>, vector<16x32xf32>, vector<8x32xf32> -> vector<8x32xf32>
    %cst_17 = arith.constant dense<0.000000e+00> : vector<8x32xf32>
    %14 = tpu.matmul %3, %6, %cst_17 {dimension_numbers = #tpu.dot_dimension_numbers<[1], [0], [0], [1], [0, 0, 1, 1], [], []>} : vector<8x16xf32>, vector<16x32xf32>, vector<8x32xf32> -> vector<8x32xf32>
    %15 = arith.addf %13, %14 : vector<8x32xf32>
    %16 = vector.broadcast %9 : vector<1x32xf32> to vector<8x32xf32>
    %17 = arith.addf %15, %16 : vector<8x32xf32>
    %18 = vector.broadcast %5 : vector<8x1xf32> to vector<8x32xf32>
    %19 = arith.mulf %12, %18 : vector<8x32xf32>
    %20 = vector.broadcast %5 : vector<8x1xf32> to vector<8x32xf32>
    %21 = arith.mulf %17, %20 : vector<8x32xf32>
    %cst_18 = arith.constant dense<0.000000e+00> : vector<32xf32>
    %22 = vector.multi_reduction <add>, %19, %cst_18 [0] : vector<8x32xf32> to vector<32xf32>
    %23 = vector.shape_cast %22 : vector<32xf32> to vector<1x32xf32>
    %cst_19 = arith.constant dense<0.000000e+00> : vector<32xf32>
    %24 = vector.multi_reduction <add>, %21, %cst_19 [0] : vector<8x32xf32> to vector<32xf32>
    %25 = vector.shape_cast %24 : vector<32xf32> to vector<1x32xf32>
    %26 = arith.addf %23, %25 : vector<1x32xf32>
    %cst_20 = arith.constant 6.250000e-02 : f32
    %27 = vector.broadcast %cst_20 : f32 to vector<1x32xf32>
    %28 = arith.mulf %26, %27 : vector<1x32xf32>
    %29 = vector.broadcast %28 : vector<1x32xf32> to vector<8x32xf32>
    %30 = arith.subf %19, %29 : vector<8x32xf32>
    %31 = vector.broadcast %28 : vector<1x32xf32> to vector<8x32xf32>
    %32 = arith.subf %21, %31 : vector<8x32xf32>
    %33 = arith.mulf %30, %30 : vector<8x32xf32>
    %cst_21 = arith.constant dense<0.000000e+00> : vector<32xf32>
    %34 = vector.multi_reduction <add>, %33, %cst_21 [0] : vector<8x32xf32> to vector<32xf32>
    %35 = vector.shape_cast %34 : vector<32xf32> to vector<1x32xf32>
    %36 = arith.mulf %32, %32 : vector<8x32xf32>
    %cst_22 = arith.constant dense<0.000000e+00> : vector<32xf32>
    %37 = vector.multi_reduction <add>, %36, %cst_22 [0] : vector<8x32xf32> to vector<32xf32>
    %38 = vector.shape_cast %37 : vector<32xf32> to vector<1x32xf32>
    %39 = arith.addf %35, %38 : vector<1x32xf32>
    %cst_23 = arith.constant 6.250000e-02 : f32
    %40 = vector.broadcast %cst_23 : f32 to vector<1x32xf32>
    %41 = arith.mulf %39, %40 : vector<1x32xf32>
    %cst_24 = arith.constant 9.99999974E-6 : f32
    %42 = vector.broadcast %cst_24 : f32 to vector<1x32xf32>
    %43 = arith.addf %41, %42 : vector<1x32xf32>
    %44 = math.rsqrt %43 : vector<1x32xf32>
    %45 = vector.broadcast %44 : vector<1x32xf32> to vector<8x32xf32>
    %46 = arith.mulf %30, %45 : vector<8x32xf32>
    %47 = vector.broadcast %44 : vector<1x32xf32> to vector<8x32xf32>
    %48 = arith.mulf %32, %47 : vector<8x32xf32>
    %cst_25 = arith.constant 0.000000e+00 : f32
    %49 = vector.broadcast %cst_25 : f32 to vector<8x32xf32>
    %50 = arith.cmpf oge, %46, %49 : vector<8x32xf32>
    %cst_26 = arith.constant 2.000000e-01 : f32
    %51 = vector.broadcast %cst_26 : f32 to vector<8x32xf32>
    %52 = arith.mulf %51, %46 : vector<8x32xf32>
    %53 = arith.select %50, %46, %52 : vector<8x32xi1>, vector<8x32xf32>
    %cst_27 = arith.constant 0.000000e+00 : f32
    %54 = vector.broadcast %cst_27 : f32 to vector<8x32xf32>
    %55 = arith.cmpf oge, %48, %54 : vector<8x32xf32>
    %cst_28 = arith.constant 2.000000e-01 : f32
    %56 = vector.broadcast %cst_28 : f32 to vector<8x32xf32>
    %57 = arith.mulf %56, %48 : vector<8x32xf32>
    %58 = arith.select %55, %48, %57 : vector<8x32xi1>, vector<8x32xf32>
    %c0_29 = arith.constant 0 : index
    %c0_30 = arith.constant 0 : index
    %c0_31 = arith.constant 0 : index
    %59 = vector.load %arg8[%c0_29, %c0_30, %c0_31] : memref<1x8x32xf32, #tpu.memory_space<vmem>>, vector<1x8x32xf32>
    %60 = vector.shape_cast %59 : vector<1x8x32xf32> to vector<8x32xf32>
    %61 = vector.shape_cast %53 : vector<8x32xf32> to vector<1x8x32xf32>
    tpu.vector_store %arg8[%c0_29, %c0_30, %c0_31], %61 {strides = array<i32>} : memref<1x8x32xf32, #tpu.memory_space<vmem>>, vector<1x8x32xf32>,
    %c0_32 = arith.constant 0 : index
    %c0_33 = arith.constant 0 : index
    %c0_34 = arith.constant 0 : index
    %62 = vector.load %arg9[%c0_32, %c0_33, %c0_34] : memref<1x8x32xf32, #tpu.memory_space<vmem>>, vector<1x8x32xf32>
    %63 = vector.shape_cast %62 : vector<1x8x32xf32> to vector<8x32xf32>
    %64 = vector.shape_cast %58 : vector<8x32xf32> to vector<1x8x32xf32>
    tpu.vector_store %arg9[%c0_32, %c0_33, %c0_34], %64 {strides = array<i32>} : memref<1x8x32xf32, #tpu.memory_space<vmem>>, vector<1x8x32xf32>,
    return
  }
  func.func @transform_0(%arg0: i32) -> (i32, i32, i32) {
    %c0_i32 = arith.constant 0 : i32
    %c0_i32_0 = arith.constant 0 : i32
    %c0_i32_1 = arith.constant 0 : i32
    return %arg0, %c0_i32, %c0_i32_0 : i32, i32, i32
  }
  func.func @transform_1(%arg0: i32) -> (i32, i32, i32) {
    %c0_i32 = arith.constant 0 : i32
    %c0_i32_0 = arith.constant 0 : i32
    %c0_i32_1 = arith.constant 0 : i32
    return %arg0, %c0_i32, %c0_i32_0 : i32, i32, i32
  }
  func.func @transform_2(%arg0: i32) -> (i32, i32, i32) {
    %c0_i32 = arith.constant 0 : i32
    %c0_i32_0 = arith.constant 0 : i32
    %c0_i32_1 = arith.constant 0 : i32
    return %arg0, %c0_i32, %c0_i32_0 : i32, i32, i32
  }
  func.func @transform_3(%arg0: i32) -> (i32, i32) {
    %c0_i32 = arith.constant 0 : i32
    %c0_i32_0 = arith.constant 0 : i32
    %c0_i32_1 = arith.constant 0 : i32
    return %c0_i32, %c0_i32_0 : i32, i32
  }
  func.func @transform_4(%arg0: i32) -> (i32, i32) {
    %c0_i32 = arith.constant 0 : i32
    %c0_i32_0 = arith.constant 0 : i32
    %c0_i32_1 = arith.constant 0 : i32
    return %c0_i32, %c0_i32_0 : i32, i32
  }
  func.func @transform_5(%arg0: i32) -> (i32, i32) {
    %c0_i32 = arith.constant 0 : i32
    %c0_i32_0 = arith.constant 0 : i32
    %c0_i32_1 = arith.constant 0 : i32
    return %c0_i32, %c0_i32_0 : i32, i32
  }
  func.func @transform_6(%arg0: i32) -> (i32, i32) {
    %c0_i32 = arith.constant 0 : i32
    %c0_i32_0 = arith.constant 0 : i32
    %c0_i32_1 = arith.constant 0 : i32
    return %c0_i32, %c0_i32_0 : i32, i32
  }
  func.func @transform_7(%arg0: i32) -> (i32, i32, i32) {
    %c0_i32 = arith.constant 0 : i32
    %c0_i32_0 = arith.constant 0 : i32
    %c0_i32_1 = arith.constant 0 : i32
    return %arg0, %c0_i32, %c0_i32_0 : i32, i32, i32
  }
  func.func @transform_8(%arg0: i32) -> (i32, i32, i32) {
    %c0_i32 = arith.constant 0 : i32
    %c0_i32_0 = arith.constant 0 : i32
    %c0_i32_1 = arith.constant 0 : i32
    return %arg0, %c0_i32, %c0_i32_0 : i32, i32, i32
  }
}

module attributes {stable_mosaic.version = 11 : i64} {
  func.func @_upblock_kernel(%arg0: i32, %arg1: memref<1x16x32xf32, #tpu.memory_space<vmem>>, %arg2: memref<1x16x32xf32, #tpu.memory_space<vmem>>, %arg3: memref<1x16x1xf32, #tpu.memory_space<vmem>>, %arg4: memref<32x16xf32, #tpu.memory_space<vmem>>, %arg5: memref<32x16xf32, #tpu.memory_space<vmem>>, %arg6: memref<32x16xf32, #tpu.memory_space<vmem>>, %arg7: memref<1x16xf32, #tpu.memory_space<vmem>>, %arg8: memref<1x16x16xf32, #tpu.memory_space<vmem>>, %arg9: memref<1x16x16xf32, #tpu.memory_space<vmem>>) attributes {dimension_semantics = [#tpu.dimension_semantics<parallel>], iteration_bounds = array<i64: 2>, scalar_prefetch = 0 : i64, scratch_operands = 0 : i64, tpu.core_type = #tpu.core_type<tc>, window_params = [{transform_indices = @transform_0, window_bounds = array<i64: 1, 16, 32>}, {transform_indices = @transform_1, window_bounds = array<i64: 1, 16, 32>}, {transform_indices = @transform_2, window_bounds = array<i64: 1, 16, 1>}, {pipeline_mode = #tpu.pipeline_mode<synchronous>, transform_indices = @transform_3, window_bounds = array<i64: 32, 16>}, {pipeline_mode = #tpu.pipeline_mode<synchronous>, transform_indices = @transform_4, window_bounds = array<i64: 32, 16>}, {pipeline_mode = #tpu.pipeline_mode<synchronous>, transform_indices = @transform_5, window_bounds = array<i64: 32, 16>}, {pipeline_mode = #tpu.pipeline_mode<synchronous>, transform_indices = @transform_6, window_bounds = array<i64: 1, 16>}, {transform_indices = @transform_7, window_bounds = array<i64: 1, 16, 16>}, {transform_indices = @transform_8, window_bounds = array<i64: 1, 16, 16>}]} {
    %c0 = arith.constant 0 : index
    %c0_0 = arith.constant 0 : index
    %c0_1 = arith.constant 0 : index
    %0 = vector.load %arg1[%c0, %c0_0, %c0_1] : memref<1x16x32xf32, #tpu.memory_space<vmem>>, vector<1x16x32xf32>
    %1 = vector.shape_cast %0 : vector<1x16x32xf32> to vector<16x32xf32>
    %c0_2 = arith.constant 0 : index
    %c0_3 = arith.constant 0 : index
    %c0_4 = arith.constant 0 : index
    %2 = vector.load %arg2[%c0_2, %c0_3, %c0_4] : memref<1x16x32xf32, #tpu.memory_space<vmem>>, vector<1x16x32xf32>
    %3 = vector.shape_cast %2 : vector<1x16x32xf32> to vector<16x32xf32>
    %c0_5 = arith.constant 0 : index
    %c0_6 = arith.constant 0 : index
    %c0_7 = arith.constant 0 : index
    %4 = vector.load %arg3[%c0_5, %c0_6, %c0_7] : memref<1x16x1xf32, #tpu.memory_space<vmem>>, vector<1x16x1xf32>
    %5 = vector.shape_cast %4 : vector<1x16x1xf32> to vector<16x1xf32>
    %c0_8 = arith.constant 0 : index
    %c0_9 = arith.constant 0 : index
    %6 = vector.load %arg4[%c0_8, %c0_9] : memref<32x16xf32, #tpu.memory_space<vmem>>, vector<32x16xf32>
    %c0_10 = arith.constant 0 : index
    %c0_11 = arith.constant 0 : index
    %7 = vector.load %arg5[%c0_10, %c0_11] : memref<32x16xf32, #tpu.memory_space<vmem>>, vector<32x16xf32>
    %c0_12 = arith.constant 0 : index
    %c0_13 = arith.constant 0 : index
    %8 = vector.load %arg6[%c0_12, %c0_13] : memref<32x16xf32, #tpu.memory_space<vmem>>, vector<32x16xf32>
    %c0_14 = arith.constant 0 : index
    %c0_15 = arith.constant 0 : index
    %9 = vector.load %arg7[%c0_14, %c0_15] : memref<1x16xf32, #tpu.memory_space<vmem>>, vector<1x16xf32>
    %cst = arith.constant dense<0.000000e+00> : vector<16x16xf32>
    %10 = tpu.matmul %1, %7, %cst {dimension_numbers = #tpu.dot_dimension_numbers<[1], [0], [0], [1], [0, 0, 1, 1], [], []>} : vector<16x32xf32>, vector<32x16xf32>, vector<16x16xf32> -> vector<16x16xf32>
    %11 = vector.broadcast %9 : vector<1x16xf32> to vector<16x16xf32>
    %12 = arith.addf %10, %11 : vector<16x16xf32>
    %cst_16 = arith.constant dense<0.000000e+00> : vector<16x16xf32>
    %13 = tpu.matmul %1, %8, %cst_16 {dimension_numbers = #tpu.dot_dimension_numbers<[1], [0], [0], [1], [0, 0, 1, 1], [], []>} : vector<16x32xf32>, vector<32x16xf32>, vector<16x16xf32> -> vector<16x16xf32>
    %cst_17 = arith.constant dense<0.000000e+00> : vector<16x16xf32>
    %14 = tpu.matmul %3, %6, %cst_17 {dimension_numbers = #tpu.dot_dimension_numbers<[1], [0], [0], [1], [0, 0, 1, 1], [], []>} : vector<16x32xf32>, vector<32x16xf32>, vector<16x16xf32> -> vector<16x16xf32>
    %15 = arith.addf %13, %14 : vector<16x16xf32>
    %16 = vector.broadcast %9 : vector<1x16xf32> to vector<16x16xf32>
    %17 = arith.addf %15, %16 : vector<16x16xf32>
    %18 = vector.broadcast %5 : vector<16x1xf32> to vector<16x16xf32>
    %19 = arith.mulf %12, %18 : vector<16x16xf32>
    %20 = vector.broadcast %5 : vector<16x1xf32> to vector<16x16xf32>
    %21 = arith.mulf %17, %20 : vector<16x16xf32>
    %cst_18 = arith.constant dense<0.000000e+00> : vector<16xf32>
    %22 = vector.multi_reduction <add>, %19, %cst_18 [0] : vector<16x16xf32> to vector<16xf32>
    %23 = vector.shape_cast %22 : vector<16xf32> to vector<1x16xf32>
    %cst_19 = arith.constant dense<0.000000e+00> : vector<16xf32>
    %24 = vector.multi_reduction <add>, %21, %cst_19 [0] : vector<16x16xf32> to vector<16xf32>
    %25 = vector.shape_cast %24 : vector<16xf32> to vector<1x16xf32>
    %26 = arith.addf %23, %25 : vector<1x16xf32>
    %cst_20 = arith.constant 3.125000e-02 : f32
    %27 = vector.broadcast %cst_20 : f32 to vector<1x16xf32>
    %28 = arith.mulf %26, %27 : vector<1x16xf32>
    %29 = vector.broadcast %28 : vector<1x16xf32> to vector<16x16xf32>
    %30 = arith.subf %19, %29 : vector<16x16xf32>
    %31 = vector.broadcast %28 : vector<1x16xf32> to vector<16x16xf32>
    %32 = arith.subf %21, %31 : vector<16x16xf32>
    %33 = arith.mulf %30, %30 : vector<16x16xf32>
    %cst_21 = arith.constant dense<0.000000e+00> : vector<16xf32>
    %34 = vector.multi_reduction <add>, %33, %cst_21 [0] : vector<16x16xf32> to vector<16xf32>
    %35 = vector.shape_cast %34 : vector<16xf32> to vector<1x16xf32>
    %36 = arith.mulf %32, %32 : vector<16x16xf32>
    %cst_22 = arith.constant dense<0.000000e+00> : vector<16xf32>
    %37 = vector.multi_reduction <add>, %36, %cst_22 [0] : vector<16x16xf32> to vector<16xf32>
    %38 = vector.shape_cast %37 : vector<16xf32> to vector<1x16xf32>
    %39 = arith.addf %35, %38 : vector<1x16xf32>
    %cst_23 = arith.constant 3.125000e-02 : f32
    %40 = vector.broadcast %cst_23 : f32 to vector<1x16xf32>
    %41 = arith.mulf %39, %40 : vector<1x16xf32>
    %cst_24 = arith.constant 9.99999974E-6 : f32
    %42 = vector.broadcast %cst_24 : f32 to vector<1x16xf32>
    %43 = arith.addf %41, %42 : vector<1x16xf32>
    %44 = math.rsqrt %43 : vector<1x16xf32>
    %45 = vector.broadcast %44 : vector<1x16xf32> to vector<16x16xf32>
    %46 = arith.mulf %30, %45 : vector<16x16xf32>
    %47 = vector.broadcast %44 : vector<1x16xf32> to vector<16x16xf32>
    %48 = arith.mulf %32, %47 : vector<16x16xf32>
    %cst_25 = arith.constant 0.000000e+00 : f32
    %49 = vector.broadcast %cst_25 : f32 to vector<16x16xf32>
    %50 = arith.cmpf oge, %46, %49 : vector<16x16xf32>
    %cst_26 = arith.constant 2.000000e-01 : f32
    %51 = vector.broadcast %cst_26 : f32 to vector<16x16xf32>
    %52 = arith.mulf %51, %46 : vector<16x16xf32>
    %53 = arith.select %50, %46, %52 : vector<16x16xi1>, vector<16x16xf32>
    %cst_27 = arith.constant 0.000000e+00 : f32
    %54 = vector.broadcast %cst_27 : f32 to vector<16x16xf32>
    %55 = arith.cmpf oge, %48, %54 : vector<16x16xf32>
    %cst_28 = arith.constant 2.000000e-01 : f32
    %56 = vector.broadcast %cst_28 : f32 to vector<16x16xf32>
    %57 = arith.mulf %56, %48 : vector<16x16xf32>
    %58 = arith.select %55, %48, %57 : vector<16x16xi1>, vector<16x16xf32>
    %c0_29 = arith.constant 0 : index
    %c0_30 = arith.constant 0 : index
    %c0_31 = arith.constant 0 : index
    %59 = vector.load %arg8[%c0_29, %c0_30, %c0_31] : memref<1x16x16xf32, #tpu.memory_space<vmem>>, vector<1x16x16xf32>
    %60 = vector.shape_cast %59 : vector<1x16x16xf32> to vector<16x16xf32>
    %61 = vector.shape_cast %53 : vector<16x16xf32> to vector<1x16x16xf32>
    tpu.vector_store %arg8[%c0_29, %c0_30, %c0_31], %61 {strides = array<i32>} : memref<1x16x16xf32, #tpu.memory_space<vmem>>, vector<1x16x16xf32>,
    %c0_32 = arith.constant 0 : index
    %c0_33 = arith.constant 0 : index
    %c0_34 = arith.constant 0 : index
    %62 = vector.load %arg9[%c0_32, %c0_33, %c0_34] : memref<1x16x16xf32, #tpu.memory_space<vmem>>, vector<1x16x16xf32>
    %63 = vector.shape_cast %62 : vector<1x16x16xf32> to vector<16x16xf32>
    %64 = vector.shape_cast %58 : vector<16x16xf32> to vector<1x16x16xf32>
    tpu.vector_store %arg9[%c0_32, %c0_33, %c0_34], %64 {strides = array<i32>} : memref<1x16x16xf32, #tpu.memory_space<vmem>>, vector<1x16x16xf32>,
    return
  }
  func.func @transform_0(%arg0: i32) -> (i32, i32, i32) {
    %c0_i32 = arith.constant 0 : i32
    %c0_i32_0 = arith.constant 0 : i32
    %c0_i32_1 = arith.constant 0 : i32
    return %arg0, %c0_i32, %c0_i32_0 : i32, i32, i32
  }
  func.func @transform_1(%arg0: i32) -> (i32, i32, i32) {
    %c0_i32 = arith.constant 0 : i32
    %c0_i32_0 = arith.constant 0 : i32
    %c0_i32_1 = arith.constant 0 : i32
    return %arg0, %c0_i32, %c0_i32_0 : i32, i32, i32
  }
  func.func @transform_2(%arg0: i32) -> (i32, i32, i32) {
    %c0_i32 = arith.constant 0 : i32
    %c0_i32_0 = arith.constant 0 : i32
    %c0_i32_1 = arith.constant 0 : i32
    return %arg0, %c0_i32, %c0_i32_0 : i32, i32, i32
  }
  func.func @transform_3(%arg0: i32) -> (i32, i32) {
    %c0_i32 = arith.constant 0 : i32
    %c0_i32_0 = arith.constant 0 : i32
    %c0_i32_1 = arith.constant 0 : i32
    return %c0_i32, %c0_i32_0 : i32, i32
  }
  func.func @transform_4(%arg0: i32) -> (i32, i32) {
    %c0_i32 = arith.constant 0 : i32
    %c0_i32_0 = arith.constant 0 : i32
    %c0_i32_1 = arith.constant 0 : i32
    return %c0_i32, %c0_i32_0 : i32, i32
  }
  func.func @transform_5(%arg0: i32) -> (i32, i32) {
    %c0_i32 = arith.constant 0 : i32
    %c0_i32_0 = arith.constant 0 : i32
    %c0_i32_1 = arith.constant 0 : i32
    return %c0_i32, %c0_i32_0 : i32, i32
  }
  func.func @transform_6(%arg0: i32) -> (i32, i32) {
    %c0_i32 = arith.constant 0 : i32
    %c0_i32_0 = arith.constant 0 : i32
    %c0_i32_1 = arith.constant 0 : i32
    return %c0_i32, %c0_i32_0 : i32, i32
  }
  func.func @transform_7(%arg0: i32) -> (i32, i32, i32) {
    %c0_i32 = arith.constant 0 : i32
    %c0_i32_0 = arith.constant 0 : i32
    %c0_i32_1 = arith.constant 0 : i32
    return %arg0, %c0_i32, %c0_i32_0 : i32, i32, i32
  }
  func.func @transform_8(%arg0: i32) -> (i32, i32, i32) {
    %c0_i32 = arith.constant 0 : i32
    %c0_i32_0 = arith.constant 0 : i32
    %c0_i32_1 = arith.constant 0 : i32
    return %arg0, %c0_i32, %c0_i32_0 : i32, i32, i32
  }
}

module attributes {stable_mosaic.version = 11 : i64} {
  func.func @_upblock_kernel(%arg0: i32, %arg1: memref<1x32x16xf32, #tpu.memory_space<vmem>>, %arg2: memref<1x32x16xf32, #tpu.memory_space<vmem>>, %arg3: memref<1x32x1xf32, #tpu.memory_space<vmem>>, %arg4: memref<16x8xf32, #tpu.memory_space<vmem>>, %arg5: memref<16x8xf32, #tpu.memory_space<vmem>>, %arg6: memref<16x8xf32, #tpu.memory_space<vmem>>, %arg7: memref<1x8xf32, #tpu.memory_space<vmem>>, %arg8: memref<1x32x8xf32, #tpu.memory_space<vmem>>, %arg9: memref<1x32x8xf32, #tpu.memory_space<vmem>>) attributes {dimension_semantics = [#tpu.dimension_semantics<parallel>], iteration_bounds = array<i64: 2>, scalar_prefetch = 0 : i64, scratch_operands = 0 : i64, tpu.core_type = #tpu.core_type<tc>, window_params = [{transform_indices = @transform_0, window_bounds = array<i64: 1, 32, 16>}, {transform_indices = @transform_1, window_bounds = array<i64: 1, 32, 16>}, {transform_indices = @transform_2, window_bounds = array<i64: 1, 32, 1>}, {pipeline_mode = #tpu.pipeline_mode<synchronous>, transform_indices = @transform_3, window_bounds = array<i64: 16, 8>}, {pipeline_mode = #tpu.pipeline_mode<synchronous>, transform_indices = @transform_4, window_bounds = array<i64: 16, 8>}, {pipeline_mode = #tpu.pipeline_mode<synchronous>, transform_indices = @transform_5, window_bounds = array<i64: 16, 8>}, {pipeline_mode = #tpu.pipeline_mode<synchronous>, transform_indices = @transform_6, window_bounds = array<i64: 1, 8>}, {transform_indices = @transform_7, window_bounds = array<i64: 1, 32, 8>}, {transform_indices = @transform_8, window_bounds = array<i64: 1, 32, 8>}]} {
    %c0 = arith.constant 0 : index
    %c0_0 = arith.constant 0 : index
    %c0_1 = arith.constant 0 : index
    %0 = vector.load %arg1[%c0, %c0_0, %c0_1] : memref<1x32x16xf32, #tpu.memory_space<vmem>>, vector<1x32x16xf32>
    %1 = vector.shape_cast %0 : vector<1x32x16xf32> to vector<32x16xf32>
    %c0_2 = arith.constant 0 : index
    %c0_3 = arith.constant 0 : index
    %c0_4 = arith.constant 0 : index
    %2 = vector.load %arg2[%c0_2, %c0_3, %c0_4] : memref<1x32x16xf32, #tpu.memory_space<vmem>>, vector<1x32x16xf32>
    %3 = vector.shape_cast %2 : vector<1x32x16xf32> to vector<32x16xf32>
    %c0_5 = arith.constant 0 : index
    %c0_6 = arith.constant 0 : index
    %c0_7 = arith.constant 0 : index
    %4 = vector.load %arg3[%c0_5, %c0_6, %c0_7] : memref<1x32x1xf32, #tpu.memory_space<vmem>>, vector<1x32x1xf32>
    %5 = vector.shape_cast %4 : vector<1x32x1xf32> to vector<32x1xf32>
    %c0_8 = arith.constant 0 : index
    %c0_9 = arith.constant 0 : index
    %6 = vector.load %arg4[%c0_8, %c0_9] : memref<16x8xf32, #tpu.memory_space<vmem>>, vector<16x8xf32>
    %c0_10 = arith.constant 0 : index
    %c0_11 = arith.constant 0 : index
    %7 = vector.load %arg5[%c0_10, %c0_11] : memref<16x8xf32, #tpu.memory_space<vmem>>, vector<16x8xf32>
    %c0_12 = arith.constant 0 : index
    %c0_13 = arith.constant 0 : index
    %8 = vector.load %arg6[%c0_12, %c0_13] : memref<16x8xf32, #tpu.memory_space<vmem>>, vector<16x8xf32>
    %c0_14 = arith.constant 0 : index
    %c0_15 = arith.constant 0 : index
    %9 = vector.load %arg7[%c0_14, %c0_15] : memref<1x8xf32, #tpu.memory_space<vmem>>, vector<1x8xf32>
    %cst = arith.constant dense<0.000000e+00> : vector<32x8xf32>
    %10 = tpu.matmul %1, %7, %cst {dimension_numbers = #tpu.dot_dimension_numbers<[1], [0], [0], [1], [0, 0, 1, 1], [], []>} : vector<32x16xf32>, vector<16x8xf32>, vector<32x8xf32> -> vector<32x8xf32>
    %11 = vector.broadcast %9 : vector<1x8xf32> to vector<32x8xf32>
    %12 = arith.addf %10, %11 : vector<32x8xf32>
    %cst_16 = arith.constant dense<0.000000e+00> : vector<32x8xf32>
    %13 = tpu.matmul %1, %8, %cst_16 {dimension_numbers = #tpu.dot_dimension_numbers<[1], [0], [0], [1], [0, 0, 1, 1], [], []>} : vector<32x16xf32>, vector<16x8xf32>, vector<32x8xf32> -> vector<32x8xf32>
    %cst_17 = arith.constant dense<0.000000e+00> : vector<32x8xf32>
    %14 = tpu.matmul %3, %6, %cst_17 {dimension_numbers = #tpu.dot_dimension_numbers<[1], [0], [0], [1], [0, 0, 1, 1], [], []>} : vector<32x16xf32>, vector<16x8xf32>, vector<32x8xf32> -> vector<32x8xf32>
    %15 = arith.addf %13, %14 : vector<32x8xf32>
    %16 = vector.broadcast %9 : vector<1x8xf32> to vector<32x8xf32>
    %17 = arith.addf %15, %16 : vector<32x8xf32>
    %18 = vector.broadcast %5 : vector<32x1xf32> to vector<32x8xf32>
    %19 = arith.mulf %12, %18 : vector<32x8xf32>
    %20 = vector.broadcast %5 : vector<32x1xf32> to vector<32x8xf32>
    %21 = arith.mulf %17, %20 : vector<32x8xf32>
    %cst_18 = arith.constant dense<0.000000e+00> : vector<8xf32>
    %22 = vector.multi_reduction <add>, %19, %cst_18 [0] : vector<32x8xf32> to vector<8xf32>
    %23 = vector.shape_cast %22 : vector<8xf32> to vector<1x8xf32>
    %cst_19 = arith.constant dense<0.000000e+00> : vector<8xf32>
    %24 = vector.multi_reduction <add>, %21, %cst_19 [0] : vector<32x8xf32> to vector<8xf32>
    %25 = vector.shape_cast %24 : vector<8xf32> to vector<1x8xf32>
    %26 = arith.addf %23, %25 : vector<1x8xf32>
    %cst_20 = arith.constant 1.562500e-02 : f32
    %27 = vector.broadcast %cst_20 : f32 to vector<1x8xf32>
    %28 = arith.mulf %26, %27 : vector<1x8xf32>
    %29 = vector.broadcast %28 : vector<1x8xf32> to vector<32x8xf32>
    %30 = arith.subf %19, %29 : vector<32x8xf32>
    %31 = vector.broadcast %28 : vector<1x8xf32> to vector<32x8xf32>
    %32 = arith.subf %21, %31 : vector<32x8xf32>
    %33 = arith.mulf %30, %30 : vector<32x8xf32>
    %cst_21 = arith.constant dense<0.000000e+00> : vector<8xf32>
    %34 = vector.multi_reduction <add>, %33, %cst_21 [0] : vector<32x8xf32> to vector<8xf32>
    %35 = vector.shape_cast %34 : vector<8xf32> to vector<1x8xf32>
    %36 = arith.mulf %32, %32 : vector<32x8xf32>
    %cst_22 = arith.constant dense<0.000000e+00> : vector<8xf32>
    %37 = vector.multi_reduction <add>, %36, %cst_22 [0] : vector<32x8xf32> to vector<8xf32>
    %38 = vector.shape_cast %37 : vector<8xf32> to vector<1x8xf32>
    %39 = arith.addf %35, %38 : vector<1x8xf32>
    %cst_23 = arith.constant 1.562500e-02 : f32
    %40 = vector.broadcast %cst_23 : f32 to vector<1x8xf32>
    %41 = arith.mulf %39, %40 : vector<1x8xf32>
    %cst_24 = arith.constant 9.99999974E-6 : f32
    %42 = vector.broadcast %cst_24 : f32 to vector<1x8xf32>
    %43 = arith.addf %41, %42 : vector<1x8xf32>
    %44 = math.rsqrt %43 : vector<1x8xf32>
    %45 = vector.broadcast %44 : vector<1x8xf32> to vector<32x8xf32>
    %46 = arith.mulf %30, %45 : vector<32x8xf32>
    %47 = vector.broadcast %44 : vector<1x8xf32> to vector<32x8xf32>
    %48 = arith.mulf %32, %47 : vector<32x8xf32>
    %cst_25 = arith.constant 0.000000e+00 : f32
    %49 = vector.broadcast %cst_25 : f32 to vector<32x8xf32>
    %50 = arith.cmpf oge, %46, %49 : vector<32x8xf32>
    %cst_26 = arith.constant 2.000000e-01 : f32
    %51 = vector.broadcast %cst_26 : f32 to vector<32x8xf32>
    %52 = arith.mulf %51, %46 : vector<32x8xf32>
    %53 = arith.select %50, %46, %52 : vector<32x8xi1>, vector<32x8xf32>
    %cst_27 = arith.constant 0.000000e+00 : f32
    %54 = vector.broadcast %cst_27 : f32 to vector<32x8xf32>
    %55 = arith.cmpf oge, %48, %54 : vector<32x8xf32>
    %cst_28 = arith.constant 2.000000e-01 : f32
    %56 = vector.broadcast %cst_28 : f32 to vector<32x8xf32>
    %57 = arith.mulf %56, %48 : vector<32x8xf32>
    %58 = arith.select %55, %48, %57 : vector<32x8xi1>, vector<32x8xf32>
    %c0_29 = arith.constant 0 : index
    %c0_30 = arith.constant 0 : index
    %c0_31 = arith.constant 0 : index
    %59 = vector.load %arg8[%c0_29, %c0_30, %c0_31] : memref<1x32x8xf32, #tpu.memory_space<vmem>>, vector<1x32x8xf32>
    %60 = vector.shape_cast %59 : vector<1x32x8xf32> to vector<32x8xf32>
    %61 = vector.shape_cast %53 : vector<32x8xf32> to vector<1x32x8xf32>
    tpu.vector_store %arg8[%c0_29, %c0_30, %c0_31], %61 {strides = array<i32>} : memref<1x32x8xf32, #tpu.memory_space<vmem>>, vector<1x32x8xf32>,
    %c0_32 = arith.constant 0 : index
    %c0_33 = arith.constant 0 : index
    %c0_34 = arith.constant 0 : index
    %62 = vector.load %arg9[%c0_32, %c0_33, %c0_34] : memref<1x32x8xf32, #tpu.memory_space<vmem>>, vector<1x32x8xf32>
    %63 = vector.shape_cast %62 : vector<1x32x8xf32> to vector<32x8xf32>
    %64 = vector.shape_cast %58 : vector<32x8xf32> to vector<1x32x8xf32>
    tpu.vector_store %arg9[%c0_32, %c0_33, %c0_34], %64 {strides = array<i32>} : memref<1x32x8xf32, #tpu.memory_space<vmem>>, vector<1x32x8xf32>,
    return
  }
  func.func @transform_0(%arg0: i32) -> (i32, i32, i32) {
    %c0_i32 = arith.constant 0 : i32
    %c0_i32_0 = arith.constant 0 : i32
    %c0_i32_1 = arith.constant 0 : i32
    return %arg0, %c0_i32, %c0_i32_0 : i32, i32, i32
  }
  func.func @transform_1(%arg0: i32) -> (i32, i32, i32) {
    %c0_i32 = arith.constant 0 : i32
    %c0_i32_0 = arith.constant 0 : i32
    %c0_i32_1 = arith.constant 0 : i32
    return %arg0, %c0_i32, %c0_i32_0 : i32, i32, i32
  }
  func.func @transform_2(%arg0: i32) -> (i32, i32, i32) {
    %c0_i32 = arith.constant 0 : i32
    %c0_i32_0 = arith.constant 0 : i32
    %c0_i32_1 = arith.constant 0 : i32
    return %arg0, %c0_i32, %c0_i32_0 : i32, i32, i32
  }
  func.func @transform_3(%arg0: i32) -> (i32, i32) {
    %c0_i32 = arith.constant 0 : i32
    %c0_i32_0 = arith.constant 0 : i32
    %c0_i32_1 = arith.constant 0 : i32
    return %c0_i32, %c0_i32_0 : i32, i32
  }
  func.func @transform_4(%arg0: i32) -> (i32, i32) {
    %c0_i32 = arith.constant 0 : i32
    %c0_i32_0 = arith.constant 0 : i32
    %c0_i32_1 = arith.constant 0 : i32
    return %c0_i32, %c0_i32_0 : i32, i32
  }
  func.func @transform_5(%arg0: i32) -> (i32, i32) {
    %c0_i32 = arith.constant 0 : i32
    %c0_i32_0 = arith.constant 0 : i32
    %c0_i32_1 = arith.constant 0 : i32
    return %c0_i32, %c0_i32_0 : i32, i32
  }
  func.func @transform_6(%arg0: i32) -> (i32, i32) {
    %c0_i32 = arith.constant 0 : i32
    %c0_i32_0 = arith.constant 0 : i32
    %c0_i32_1 = arith.constant 0 : i32
    return %c0_i32, %c0_i32_0 : i32, i32
  }
  func.func @transform_7(%arg0: i32) -> (i32, i32, i32) {
    %c0_i32 = arith.constant 0 : i32
    %c0_i32_0 = arith.constant 0 : i32
    %c0_i32_1 = arith.constant 0 : i32
    return %arg0, %c0_i32, %c0_i32_0 : i32, i32, i32
  }
  func.func @transform_8(%arg0: i32) -> (i32, i32, i32) {
    %c0_i32 = arith.constant 0 : i32
    %c0_i32_0 = arith.constant 0 : i32
    %c0_i32_1 = arith.constant 0 : i32
    return %arg0, %c0_i32, %c0_i32_0 : i32, i32, i32
  }
}

module attributes {stable_mosaic.version = 11 : i64} {
  func.func @_upblock_kernel(%arg0: i32, %arg1: memref<1x64x8xf32, #tpu.memory_space<vmem>>, %arg2: memref<1x64x8xf32, #tpu.memory_space<vmem>>, %arg3: memref<1x64x1xf32, #tpu.memory_space<vmem>>, %arg4: memref<8x4xf32, #tpu.memory_space<vmem>>, %arg5: memref<8x4xf32, #tpu.memory_space<vmem>>, %arg6: memref<8x4xf32, #tpu.memory_space<vmem>>, %arg7: memref<1x4xf32, #tpu.memory_space<vmem>>, %arg8: memref<1x64x4xf32, #tpu.memory_space<vmem>>, %arg9: memref<1x64x4xf32, #tpu.memory_space<vmem>>) attributes {dimension_semantics = [#tpu.dimension_semantics<parallel>], iteration_bounds = array<i64: 2>, scalar_prefetch = 0 : i64, scratch_operands = 0 : i64, tpu.core_type = #tpu.core_type<tc>, window_params = [{transform_indices = @transform_0, window_bounds = array<i64: 1, 64, 8>}, {transform_indices = @transform_1, window_bounds = array<i64: 1, 64, 8>}, {transform_indices = @transform_2, window_bounds = array<i64: 1, 64, 1>}, {pipeline_mode = #tpu.pipeline_mode<synchronous>, transform_indices = @transform_3, window_bounds = array<i64: 8, 4>}, {pipeline_mode = #tpu.pipeline_mode<synchronous>, transform_indices = @transform_4, window_bounds = array<i64: 8, 4>}, {pipeline_mode = #tpu.pipeline_mode<synchronous>, transform_indices = @transform_5, window_bounds = array<i64: 8, 4>}, {pipeline_mode = #tpu.pipeline_mode<synchronous>, transform_indices = @transform_6, window_bounds = array<i64: 1, 4>}, {transform_indices = @transform_7, window_bounds = array<i64: 1, 64, 4>}, {transform_indices = @transform_8, window_bounds = array<i64: 1, 64, 4>}]} {
    %c0 = arith.constant 0 : index
    %c0_0 = arith.constant 0 : index
    %c0_1 = arith.constant 0 : index
    %0 = vector.load %arg1[%c0, %c0_0, %c0_1] : memref<1x64x8xf32, #tpu.memory_space<vmem>>, vector<1x64x8xf32>
    %1 = vector.shape_cast %0 : vector<1x64x8xf32> to vector<64x8xf32>
    %c0_2 = arith.constant 0 : index
    %c0_3 = arith.constant 0 : index
    %c0_4 = arith.constant 0 : index
    %2 = vector.load %arg2[%c0_2, %c0_3, %c0_4] : memref<1x64x8xf32, #tpu.memory_space<vmem>>, vector<1x64x8xf32>
    %3 = vector.shape_cast %2 : vector<1x64x8xf32> to vector<64x8xf32>
    %c0_5 = arith.constant 0 : index
    %c0_6 = arith.constant 0 : index
    %c0_7 = arith.constant 0 : index
    %4 = vector.load %arg3[%c0_5, %c0_6, %c0_7] : memref<1x64x1xf32, #tpu.memory_space<vmem>>, vector<1x64x1xf32>
    %5 = vector.shape_cast %4 : vector<1x64x1xf32> to vector<64x1xf32>
    %c0_8 = arith.constant 0 : index
    %c0_9 = arith.constant 0 : index
    %6 = vector.load %arg4[%c0_8, %c0_9] : memref<8x4xf32, #tpu.memory_space<vmem>>, vector<8x4xf32>
    %c0_10 = arith.constant 0 : index
    %c0_11 = arith.constant 0 : index
    %7 = vector.load %arg5[%c0_10, %c0_11] : memref<8x4xf32, #tpu.memory_space<vmem>>, vector<8x4xf32>
    %c0_12 = arith.constant 0 : index
    %c0_13 = arith.constant 0 : index
    %8 = vector.load %arg6[%c0_12, %c0_13] : memref<8x4xf32, #tpu.memory_space<vmem>>, vector<8x4xf32>
    %c0_14 = arith.constant 0 : index
    %c0_15 = arith.constant 0 : index
    %9 = vector.load %arg7[%c0_14, %c0_15] : memref<1x4xf32, #tpu.memory_space<vmem>>, vector<1x4xf32>
    %cst = arith.constant dense<0.000000e+00> : vector<64x4xf32>
    %10 = tpu.matmul %1, %7, %cst {dimension_numbers = #tpu.dot_dimension_numbers<[1], [0], [0], [1], [0, 0, 1, 1], [], []>} : vector<64x8xf32>, vector<8x4xf32>, vector<64x4xf32> -> vector<64x4xf32>
    %11 = vector.broadcast %9 : vector<1x4xf32> to vector<64x4xf32>
    %12 = arith.addf %10, %11 : vector<64x4xf32>
    %cst_16 = arith.constant dense<0.000000e+00> : vector<64x4xf32>
    %13 = tpu.matmul %1, %8, %cst_16 {dimension_numbers = #tpu.dot_dimension_numbers<[1], [0], [0], [1], [0, 0, 1, 1], [], []>} : vector<64x8xf32>, vector<8x4xf32>, vector<64x4xf32> -> vector<64x4xf32>
    %cst_17 = arith.constant dense<0.000000e+00> : vector<64x4xf32>
    %14 = tpu.matmul %3, %6, %cst_17 {dimension_numbers = #tpu.dot_dimension_numbers<[1], [0], [0], [1], [0, 0, 1, 1], [], []>} : vector<64x8xf32>, vector<8x4xf32>, vector<64x4xf32> -> vector<64x4xf32>
    %15 = arith.addf %13, %14 : vector<64x4xf32>
    %16 = vector.broadcast %9 : vector<1x4xf32> to vector<64x4xf32>
    %17 = arith.addf %15, %16 : vector<64x4xf32>
    %18 = vector.broadcast %5 : vector<64x1xf32> to vector<64x4xf32>
    %19 = arith.mulf %12, %18 : vector<64x4xf32>
    %20 = vector.broadcast %5 : vector<64x1xf32> to vector<64x4xf32>
    %21 = arith.mulf %17, %20 : vector<64x4xf32>
    %cst_18 = arith.constant dense<0.000000e+00> : vector<4xf32>
    %22 = vector.multi_reduction <add>, %19, %cst_18 [0] : vector<64x4xf32> to vector<4xf32>
    %23 = vector.shape_cast %22 : vector<4xf32> to vector<1x4xf32>
    %cst_19 = arith.constant dense<0.000000e+00> : vector<4xf32>
    %24 = vector.multi_reduction <add>, %21, %cst_19 [0] : vector<64x4xf32> to vector<4xf32>
    %25 = vector.shape_cast %24 : vector<4xf32> to vector<1x4xf32>
    %26 = arith.addf %23, %25 : vector<1x4xf32>
    %cst_20 = arith.constant 7.812500e-03 : f32
    %27 = vector.broadcast %cst_20 : f32 to vector<1x4xf32>
    %28 = arith.mulf %26, %27 : vector<1x4xf32>
    %29 = vector.broadcast %28 : vector<1x4xf32> to vector<64x4xf32>
    %30 = arith.subf %19, %29 : vector<64x4xf32>
    %31 = vector.broadcast %28 : vector<1x4xf32> to vector<64x4xf32>
    %32 = arith.subf %21, %31 : vector<64x4xf32>
    %33 = arith.mulf %30, %30 : vector<64x4xf32>
    %cst_21 = arith.constant dense<0.000000e+00> : vector<4xf32>
    %34 = vector.multi_reduction <add>, %33, %cst_21 [0] : vector<64x4xf32> to vector<4xf32>
    %35 = vector.shape_cast %34 : vector<4xf32> to vector<1x4xf32>
    %36 = arith.mulf %32, %32 : vector<64x4xf32>
    %cst_22 = arith.constant dense<0.000000e+00> : vector<4xf32>
    %37 = vector.multi_reduction <add>, %36, %cst_22 [0] : vector<64x4xf32> to vector<4xf32>
    %38 = vector.shape_cast %37 : vector<4xf32> to vector<1x4xf32>
    %39 = arith.addf %35, %38 : vector<1x4xf32>
    %cst_23 = arith.constant 7.812500e-03 : f32
    %40 = vector.broadcast %cst_23 : f32 to vector<1x4xf32>
    %41 = arith.mulf %39, %40 : vector<1x4xf32>
    %cst_24 = arith.constant 9.99999974E-6 : f32
    %42 = vector.broadcast %cst_24 : f32 to vector<1x4xf32>
    %43 = arith.addf %41, %42 : vector<1x4xf32>
    %44 = math.rsqrt %43 : vector<1x4xf32>
    %45 = vector.broadcast %44 : vector<1x4xf32> to vector<64x4xf32>
    %46 = arith.mulf %30, %45 : vector<64x4xf32>
    %47 = vector.broadcast %44 : vector<1x4xf32> to vector<64x4xf32>
    %48 = arith.mulf %32, %47 : vector<64x4xf32>
    %cst_25 = arith.constant 0.000000e+00 : f32
    %49 = vector.broadcast %cst_25 : f32 to vector<64x4xf32>
    %50 = arith.cmpf oge, %46, %49 : vector<64x4xf32>
    %cst_26 = arith.constant 2.000000e-01 : f32
    %51 = vector.broadcast %cst_26 : f32 to vector<64x4xf32>
    %52 = arith.mulf %51, %46 : vector<64x4xf32>
    %53 = arith.select %50, %46, %52 : vector<64x4xi1>, vector<64x4xf32>
    %cst_27 = arith.constant 0.000000e+00 : f32
    %54 = vector.broadcast %cst_27 : f32 to vector<64x4xf32>
    %55 = arith.cmpf oge, %48, %54 : vector<64x4xf32>
    %cst_28 = arith.constant 2.000000e-01 : f32
    %56 = vector.broadcast %cst_28 : f32 to vector<64x4xf32>
    %57 = arith.mulf %56, %48 : vector<64x4xf32>
    %58 = arith.select %55, %48, %57 : vector<64x4xi1>, vector<64x4xf32>
    %c0_29 = arith.constant 0 : index
    %c0_30 = arith.constant 0 : index
    %c0_31 = arith.constant 0 : index
    %59 = vector.load %arg8[%c0_29, %c0_30, %c0_31] : memref<1x64x4xf32, #tpu.memory_space<vmem>>, vector<1x64x4xf32>
    %60 = vector.shape_cast %59 : vector<1x64x4xf32> to vector<64x4xf32>
    %61 = vector.shape_cast %53 : vector<64x4xf32> to vector<1x64x4xf32>
    tpu.vector_store %arg8[%c0_29, %c0_30, %c0_31], %61 {strides = array<i32>} : memref<1x64x4xf32, #tpu.memory_space<vmem>>, vector<1x64x4xf32>,
    %c0_32 = arith.constant 0 : index
    %c0_33 = arith.constant 0 : index
    %c0_34 = arith.constant 0 : index
    %62 = vector.load %arg9[%c0_32, %c0_33, %c0_34] : memref<1x64x4xf32, #tpu.memory_space<vmem>>, vector<1x64x4xf32>
    %63 = vector.shape_cast %62 : vector<1x64x4xf32> to vector<64x4xf32>
    %64 = vector.shape_cast %58 : vector<64x4xf32> to vector<1x64x4xf32>
    tpu.vector_store %arg9[%c0_32, %c0_33, %c0_34], %64 {strides = array<i32>} : memref<1x64x4xf32, #tpu.memory_space<vmem>>, vector<1x64x4xf32>,
    return
  }
  func.func @transform_0(%arg0: i32) -> (i32, i32, i32) {
    %c0_i32 = arith.constant 0 : i32
    %c0_i32_0 = arith.constant 0 : i32
    %c0_i32_1 = arith.constant 0 : i32
    return %arg0, %c0_i32, %c0_i32_0 : i32, i32, i32
  }
  func.func @transform_1(%arg0: i32) -> (i32, i32, i32) {
    %c0_i32 = arith.constant 0 : i32
    %c0_i32_0 = arith.constant 0 : i32
    %c0_i32_1 = arith.constant 0 : i32
    return %arg0, %c0_i32, %c0_i32_0 : i32, i32, i32
  }
  func.func @transform_2(%arg0: i32) -> (i32, i32, i32) {
    %c0_i32 = arith.constant 0 : i32
    %c0_i32_0 = arith.constant 0 : i32
    %c0_i32_1 = arith.constant 0 : i32
    return %arg0, %c0_i32, %c0_i32_0 : i32, i32, i32
  }
  func.func @transform_3(%arg0: i32) -> (i32, i32) {
    %c0_i32 = arith.constant 0 : i32
    %c0_i32_0 = arith.constant 0 : i32
    %c0_i32_1 = arith.constant 0 : i32
    return %c0_i32, %c0_i32_0 : i32, i32
  }
  func.func @transform_4(%arg0: i32) -> (i32, i32) {
    %c0_i32 = arith.constant 0 : i32
    %c0_i32_0 = arith.constant 0 : i32
    %c0_i32_1 = arith.constant 0 : i32
    return %c0_i32, %c0_i32_0 : i32, i32
  }
  func.func @transform_5(%arg0: i32) -> (i32, i32) {
    %c0_i32 = arith.constant 0 : i32
    %c0_i32_0 = arith.constant 0 : i32
    %c0_i32_1 = arith.constant 0 : i32
    return %c0_i32, %c0_i32_0 : i32, i32
  }
  func.func @transform_6(%arg0: i32) -> (i32, i32) {
    %c0_i32 = arith.constant 0 : i32
    %c0_i32_0 = arith.constant 0 : i32
    %c0_i32_1 = arith.constant 0 : i32
    return %c0_i32, %c0_i32_0 : i32, i32
  }
  func.func @transform_7(%arg0: i32) -> (i32, i32, i32) {
    %c0_i32 = arith.constant 0 : i32
    %c0_i32_0 = arith.constant 0 : i32
    %c0_i32_1 = arith.constant 0 : i32
    return %arg0, %c0_i32, %c0_i32_0 : i32, i32, i32
  }
  func.func @transform_8(%arg0: i32) -> (i32, i32, i32) {
    %c0_i32 = arith.constant 0 : i32
    %c0_i32_0 = arith.constant 0 : i32
    %c0_i32_1 = arith.constant 0 : i32
    return %arg0, %c0_i32, %c0_i32_0 : i32, i32, i32
  }
}

module attributes {stable_mosaic.version = 11 : i64} {
  func.func @_upblock_kernel(%arg0: i32, %arg1: memref<1x128x4xf32, #tpu.memory_space<vmem>>, %arg2: memref<1x128x4xf32, #tpu.memory_space<vmem>>, %arg3: memref<1x128x1xf32, #tpu.memory_space<vmem>>, %arg4: memref<4x8xf32, #tpu.memory_space<vmem>>, %arg5: memref<4x8xf32, #tpu.memory_space<vmem>>, %arg6: memref<4x8xf32, #tpu.memory_space<vmem>>, %arg7: memref<1x8xf32, #tpu.memory_space<vmem>>, %arg8: memref<1x128x8xf32, #tpu.memory_space<vmem>>, %arg9: memref<1x128x8xf32, #tpu.memory_space<vmem>>) attributes {dimension_semantics = [#tpu.dimension_semantics<parallel>], iteration_bounds = array<i64: 2>, scalar_prefetch = 0 : i64, scratch_operands = 0 : i64, tpu.core_type = #tpu.core_type<tc>, window_params = [{transform_indices = @transform_0, window_bounds = array<i64: 1, 128, 4>}, {transform_indices = @transform_1, window_bounds = array<i64: 1, 128, 4>}, {transform_indices = @transform_2, window_bounds = array<i64: 1, 128, 1>}, {pipeline_mode = #tpu.pipeline_mode<synchronous>, transform_indices = @transform_3, window_bounds = array<i64: 4, 8>}, {pipeline_mode = #tpu.pipeline_mode<synchronous>, transform_indices = @transform_4, window_bounds = array<i64: 4, 8>}, {pipeline_mode = #tpu.pipeline_mode<synchronous>, transform_indices = @transform_5, window_bounds = array<i64: 4, 8>}, {pipeline_mode = #tpu.pipeline_mode<synchronous>, transform_indices = @transform_6, window_bounds = array<i64: 1, 8>}, {transform_indices = @transform_7, window_bounds = array<i64: 1, 128, 8>}, {transform_indices = @transform_8, window_bounds = array<i64: 1, 128, 8>}]} {
    %c0 = arith.constant 0 : index
    %c0_0 = arith.constant 0 : index
    %c0_1 = arith.constant 0 : index
    %0 = vector.load %arg1[%c0, %c0_0, %c0_1] : memref<1x128x4xf32, #tpu.memory_space<vmem>>, vector<1x128x4xf32>
    %1 = vector.shape_cast %0 : vector<1x128x4xf32> to vector<128x4xf32>
    %c0_2 = arith.constant 0 : index
    %c0_3 = arith.constant 0 : index
    %c0_4 = arith.constant 0 : index
    %2 = vector.load %arg2[%c0_2, %c0_3, %c0_4] : memref<1x128x4xf32, #tpu.memory_space<vmem>>, vector<1x128x4xf32>
    %3 = vector.shape_cast %2 : vector<1x128x4xf32> to vector<128x4xf32>
    %c0_5 = arith.constant 0 : index
    %c0_6 = arith.constant 0 : index
    %c0_7 = arith.constant 0 : index
    %4 = vector.load %arg3[%c0_5, %c0_6, %c0_7] : memref<1x128x1xf32, #tpu.memory_space<vmem>>, vector<1x128x1xf32>
    %5 = vector.shape_cast %4 : vector<1x128x1xf32> to vector<128x1xf32>
    %c0_8 = arith.constant 0 : index
    %c0_9 = arith.constant 0 : index
    %6 = vector.load %arg4[%c0_8, %c0_9] : memref<4x8xf32, #tpu.memory_space<vmem>>, vector<4x8xf32>
    %c0_10 = arith.constant 0 : index
    %c0_11 = arith.constant 0 : index
    %7 = vector.load %arg5[%c0_10, %c0_11] : memref<4x8xf32, #tpu.memory_space<vmem>>, vector<4x8xf32>
    %c0_12 = arith.constant 0 : index
    %c0_13 = arith.constant 0 : index
    %8 = vector.load %arg6[%c0_12, %c0_13] : memref<4x8xf32, #tpu.memory_space<vmem>>, vector<4x8xf32>
    %c0_14 = arith.constant 0 : index
    %c0_15 = arith.constant 0 : index
    %9 = vector.load %arg7[%c0_14, %c0_15] : memref<1x8xf32, #tpu.memory_space<vmem>>, vector<1x8xf32>
    %cst = arith.constant dense<0.000000e+00> : vector<128x8xf32>
    %10 = tpu.matmul %1, %7, %cst {dimension_numbers = #tpu.dot_dimension_numbers<[1], [0], [0], [1], [0, 0, 1, 1], [], []>} : vector<128x4xf32>, vector<4x8xf32>, vector<128x8xf32> -> vector<128x8xf32>
    %11 = vector.broadcast %9 : vector<1x8xf32> to vector<128x8xf32>
    %12 = arith.addf %10, %11 : vector<128x8xf32>
    %cst_16 = arith.constant dense<0.000000e+00> : vector<128x8xf32>
    %13 = tpu.matmul %1, %8, %cst_16 {dimension_numbers = #tpu.dot_dimension_numbers<[1], [0], [0], [1], [0, 0, 1, 1], [], []>} : vector<128x4xf32>, vector<4x8xf32>, vector<128x8xf32> -> vector<128x8xf32>
    %cst_17 = arith.constant dense<0.000000e+00> : vector<128x8xf32>
    %14 = tpu.matmul %3, %6, %cst_17 {dimension_numbers = #tpu.dot_dimension_numbers<[1], [0], [0], [1], [0, 0, 1, 1], [], []>} : vector<128x4xf32>, vector<4x8xf32>, vector<128x8xf32> -> vector<128x8xf32>
    %15 = arith.addf %13, %14 : vector<128x8xf32>
    %16 = vector.broadcast %9 : vector<1x8xf32> to vector<128x8xf32>
    %17 = arith.addf %15, %16 : vector<128x8xf32>
    %18 = vector.broadcast %5 : vector<128x1xf32> to vector<128x8xf32>
    %19 = arith.mulf %12, %18 : vector<128x8xf32>
    %20 = vector.broadcast %5 : vector<128x1xf32> to vector<128x8xf32>
    %21 = arith.mulf %17, %20 : vector<128x8xf32>
    %cst_18 = arith.constant dense<0.000000e+00> : vector<8xf32>
    %22 = vector.multi_reduction <add>, %19, %cst_18 [0] : vector<128x8xf32> to vector<8xf32>
    %23 = vector.shape_cast %22 : vector<8xf32> to vector<1x8xf32>
    %cst_19 = arith.constant dense<0.000000e+00> : vector<8xf32>
    %24 = vector.multi_reduction <add>, %21, %cst_19 [0] : vector<128x8xf32> to vector<8xf32>
    %25 = vector.shape_cast %24 : vector<8xf32> to vector<1x8xf32>
    %26 = arith.addf %23, %25 : vector<1x8xf32>
    %cst_20 = arith.constant 3.906250e-03 : f32
    %27 = vector.broadcast %cst_20 : f32 to vector<1x8xf32>
    %28 = arith.mulf %26, %27 : vector<1x8xf32>
    %29 = vector.broadcast %28 : vector<1x8xf32> to vector<128x8xf32>
    %30 = arith.subf %19, %29 : vector<128x8xf32>
    %31 = vector.broadcast %28 : vector<1x8xf32> to vector<128x8xf32>
    %32 = arith.subf %21, %31 : vector<128x8xf32>
    %33 = arith.mulf %30, %30 : vector<128x8xf32>
    %cst_21 = arith.constant dense<0.000000e+00> : vector<8xf32>
    %34 = vector.multi_reduction <add>, %33, %cst_21 [0] : vector<128x8xf32> to vector<8xf32>
    %35 = vector.shape_cast %34 : vector<8xf32> to vector<1x8xf32>
    %36 = arith.mulf %32, %32 : vector<128x8xf32>
    %cst_22 = arith.constant dense<0.000000e+00> : vector<8xf32>
    %37 = vector.multi_reduction <add>, %36, %cst_22 [0] : vector<128x8xf32> to vector<8xf32>
    %38 = vector.shape_cast %37 : vector<8xf32> to vector<1x8xf32>
    %39 = arith.addf %35, %38 : vector<1x8xf32>
    %cst_23 = arith.constant 3.906250e-03 : f32
    %40 = vector.broadcast %cst_23 : f32 to vector<1x8xf32>
    %41 = arith.mulf %39, %40 : vector<1x8xf32>
    %cst_24 = arith.constant 9.99999974E-6 : f32
    %42 = vector.broadcast %cst_24 : f32 to vector<1x8xf32>
    %43 = arith.addf %41, %42 : vector<1x8xf32>
    %44 = math.rsqrt %43 : vector<1x8xf32>
    %45 = vector.broadcast %44 : vector<1x8xf32> to vector<128x8xf32>
    %46 = arith.mulf %30, %45 : vector<128x8xf32>
    %47 = vector.broadcast %44 : vector<1x8xf32> to vector<128x8xf32>
    %48 = arith.mulf %32, %47 : vector<128x8xf32>
    %49 = math.tanh %46 : vector<128x8xf32>
    %50 = math.tanh %48 : vector<128x8xf32>
    %c0_25 = arith.constant 0 : index
    %c0_26 = arith.constant 0 : index
    %c0_27 = arith.constant 0 : index
    %51 = vector.load %arg8[%c0_25, %c0_26, %c0_27] : memref<1x128x8xf32, #tpu.memory_space<vmem>>, vector<1x128x8xf32>
    %52 = vector.shape_cast %51 : vector<1x128x8xf32> to vector<128x8xf32>
    %53 = vector.shape_cast %49 : vector<128x8xf32> to vector<1x128x8xf32>
    tpu.vector_store %arg8[%c0_25, %c0_26, %c0_27], %53 {strides = array<i32>} : memref<1x128x8xf32, #tpu.memory_space<vmem>>, vector<1x128x8xf32>,
    %c0_28 = arith.constant 0 : index
    %c0_29 = arith.constant 0 : index
    %c0_30 = arith.constant 0 : index
    %54 = vector.load %arg9[%c0_28, %c0_29, %c0_30] : memref<1x128x8xf32, #tpu.memory_space<vmem>>, vector<1x128x8xf32>
    %55 = vector.shape_cast %54 : vector<1x128x8xf32> to vector<128x8xf32>
    %56 = vector.shape_cast %50 : vector<128x8xf32> to vector<1x128x8xf32>
    tpu.vector_store %arg9[%c0_28, %c0_29, %c0_30], %56 {strides = array<i32>} : memref<1x128x8xf32, #tpu.memory_space<vmem>>, vector<1x128x8xf32>,
    return
  }
  func.func @transform_0(%arg0: i32) -> (i32, i32, i32) {
    %c0_i32 = arith.constant 0 : i32
    %c0_i32_0 = arith.constant 0 : i32
    %c0_i32_1 = arith.constant 0 : i32
    return %arg0, %c0_i32, %c0_i32_0 : i32, i32, i32
  }
  func.func @transform_1(%arg0: i32) -> (i32, i32, i32) {
    %c0_i32 = arith.constant 0 : i32
    %c0_i32_0 = arith.constant 0 : i32
    %c0_i32_1 = arith.constant 0 : i32
    return %arg0, %c0_i32, %c0_i32_0 : i32, i32, i32
  }
  func.func @transform_2(%arg0: i32) -> (i32, i32, i32) {
    %c0_i32 = arith.constant 0 : i32
    %c0_i32_0 = arith.constant 0 : i32
    %c0_i32_1 = arith.constant 0 : i32
    return %arg0, %c0_i32, %c0_i32_0 : i32, i32, i32
  }
  func.func @transform_3(%arg0: i32) -> (i32, i32) {
    %c0_i32 = arith.constant 0 : i32
    %c0_i32_0 = arith.constant 0 : i32
    %c0_i32_1 = arith.constant 0 : i32
    return %c0_i32, %c0_i32_0 : i32, i32
  }
  func.func @transform_4(%arg0: i32) -> (i32, i32) {
    %c0_i32 = arith.constant 0 : i32
    %c0_i32_0 = arith.constant 0 : i32
    %c0_i32_1 = arith.constant 0 : i32
    return %c0_i32, %c0_i32_0 : i32, i32
  }
  func.func @transform_5(%arg0: i32) -> (i32, i32) {
    %c0_i32 = arith.constant 0 : i32
    %c0_i32_0 = arith.constant 0 : i32
    %c0_i32_1 = arith.constant 0 : i32
    return %c0_i32, %c0_i32_0 : i32, i32
  }
  func.func @transform_6(%arg0: i32) -> (i32, i32) {
    %c0_i32 = arith.constant 0 : i32
    %c0_i32_0 = arith.constant 0 : i32
    %c0_i32_1 = arith.constant 0 : i32
    return %c0_i32, %c0_i32_0 : i32, i32
  }
  func.func @transform_7(%arg0: i32) -> (i32, i32, i32) {
    %c0_i32 = arith.constant 0 : i32
    %c0_i32_0 = arith.constant 0 : i32
    %c0_i32_1 = arith.constant 0 : i32
    return %arg0, %c0_i32, %c0_i32_0 : i32, i32, i32
  }
  func.func @transform_8(%arg0: i32) -> (i32, i32, i32) {
    %c0_i32 = arith.constant 0 : i32
    %c0_i32_0 = arith.constant 0 : i32
    %c0_i32_1 = arith.constant 0 : i32
    return %arg0, %c0_i32, %c0_i32_0 : i32, i32, i32
  }
}

</mosaic_0001>

<bundles_post_ra>
// kernel: expansion_forward.6
= control target key start
LH: loop header
LB: loop body
LE: loop exit
PB: predicated region body
PF: predicated region fallthrough
CT: control target
= control target key end

     0   :  { %s770_s27 = smov 0   ;;  %s860_s0 = inlined_call_operand.vmem [shape: f32[2,16,32], index: 0, kind: input, shape index: {}]   ;;  %s861_s1 = inlined_call_operand.vmem [shape: f32[2,16,32], index: 1, kind: input, shape index: {}]   ;;  %s862_s2 = inlined_call_operand.vmem [shape: f32[2,16,1], index: 2, kind: input, shape index: {}]   ;;  %s863_s3 = inlined_call_operand.vmem [shape: f32[32,16], index: 3, kind: input, shape index: {}]   ;;  %s864_s4 = inlined_call_operand.vmem [shape: f32[32,16], index: 4, kind: input, shape index: {}]   ;;  %s865_s5 = inlined_call_operand.vmem [shape: f32[32,16], index: 5, kind: input, shape index: {}]   ;;  %s866_s6 = inlined_call_operand.vmem [shape: f32[1,16], index: 6, kind: input, shape index: {}]   ;;  %s867_s7 = inlined_call_operand.vmem [shape: f32[2,16,16], index: 7, kind: output, shape index: {0}]   ;;  %s868_s8 = inlined_call_operand.vmem [shape: f32[2,16,16], index: 8, kind: output, shape index: {1}]  }
   0x1 LB: > { %s671_s28 = sadd.s32 4294967295, %s722_s27   ;;  %p675_p0 = scmp.ge.s32.totalorder %s722_s27, 1  ;;  %s722_s27 = sphi %s770_s27, %s19_s27  }
   0x2   : > { %p285_p1 = scmp.lt.s32.totalorder %s722_s27, 3 }
   0x4   : > { %p286_p2 = pnand %p675_p0, %p285_p1 }
   0x5   : > { %p334_p3 = scmp.lt.s32.totalorder (!%p286_p2), %s671_s28, 1 }
   0x6   : > { %289 = sbr.rel (%p286_p2) target bundleno = 237 (0xed), region = 48 }
   0xb   : > { %v372_v0 = vld [vmem:[%s864_s4 + $0x18] sm:$0xff]  ;;  %v371_v2 = vld [vmem:[%s864_s4 + $0x10] sm:$0xff]  ;;  %v370_v4 = vld [vmem:[%s864_s4 + $0x8] sm:$0xff]  ;;  %s870_s28 = smov (!%p334_p3, %s671_s28), 1  ;;  %v724_v7 = vmov 0   ;;  %vm381_vm0 = vcmask 261120  }
   0xc   : > { %v376_v1 = vld [vmem:[%s865_s5 + $0x18] sm:$0xff]  ;;  %699 = vmatpush.msra.mxu3 %v372_v0  ;;  %v375_v3 = vld [vmem:[%s865_s5 + $0x10] sm:$0xff]  ;;  %v374_v5 = vld [vmem:[%s865_s5 + $0x8] sm:$0xff]  ;;  %400 = vmatpush.msra.mxu0 %v372_v0  ;;  %s808_s29 = sshll.u32 %s870_s28, 4  ;;  %vm479_vm1 = vcmask 130048  }
   0xd   : > { %452 = vmatpush.msra.mxu2 %v376_v1  ;;  %v368_v6 = vld [vmem:[%s863_s3 + $0x18] sm:$0xff]  ;;  %712 = vset.pattern.permute.xlu0 %v724_v7  ;;  %v367_v8 = vld [vmem:[%s863_s3 + $0x10] sm:$0xff]  ;;  %v369_v9 = vld [vmem:[%s864_s4] sm:$0xff]  ;;  %s338_s10 = scalar_lea.vmem %s860_s0, %s808_s29  ;;  %s343_s14 = scalar_lea.vmem %s861_s1, %s808_s29 }
   0xe   : > { %700 = vmatpush.msra.mxu3 %v371_v2  ;;  %429 = vmatpush.msra.mxu1 %v368_v6  ;;  %v373_v10 = vld [vmem:[%s865_s5] sm:$0xff]  ;;  %v360_v11 = vld [vmem:[%s338_s10 + $0x8] sm:$0xff]  ;;  %s348_s17 = scalar_lea.vmem %s862_s2, %s808_s29  ;;  %s353_s24 = scalar_lea.vmem %s867_s7, %s808_s29 }
   0xf   : > { %453 = vmatpush.msra.mxu2 %v375_v3  ;;  %401 = vmatpush.msra.mxu0 %v371_v2  ;;  %v359_v12 = vld [vmem:[%s338_s10] sm:$0xff]  ;;  %v366_v13 = vld [vmem:[%s863_s3 + $0x8] sm:$0xff]  ;;  %s358_s30 = scalar_lea.vmem %s868_s8, %s808_s29 }
  0x10   : > { %701 = vmatpush.msra.mxu3 %v370_v4  ;;  %430 = vmatpush.msra.mxu1 %v367_v8  ;;  %v365_v14 = vld [vmem:[%s863_s3] sm:$0xff]  ;;  %v364_v17 = vld [vmem:[%s348_s17 + $0x8] sm:$0xff] }
  0x11   : > { %454 = vmatpush.msra.mxu2 %v374_v5  ;;  %402 = vmatpush.msra.mxu0 %v370_v4  ;;  %v363_v15 = vld [vmem:[%s348_s17] sm:$0xff]  ;;  %v362_v18 = vld [vmem:[%s343_s14 + $0x8] sm:$0xff] }
  0x12   : > { %702 = vmatpush.msra.mxu3 %v369_v9  ;;  %431 = vmatpush.msra.mxu1 %v366_v13  ;;  %v361_v16 = vld [vmem:[%s343_s14] sm:$0xff] }
  0x13   : > { %455 = vmatpush.msra.mxu2 %v373_v10  ;;  %687 = vmatmul.msk.f32.vlgmr.msra.gmra.mxu3 %vm381_vm0, %v360_v11  ;;  %v713_v20 = vld [vmem:[%s866_s6] ss:$0 sm:$0xff] }
  0x14   : > { %690 = vmatmul.msk.f32.vlgmr.msra.gmra.mxu2 %vm381_vm0, %v359_v12  ;;  %403 = vmatpush.msra.mxu0 %v369_v9 }
  0x15   : > { %686 = vmatmul.msk.f32.vlgmr.msra.gmra.mxu0 %vm381_vm0, %v359_v12  ;;  %467 = vperm.xlu0 %712, %v363_v15  }
  0x16   : > { %432 = vmatpush.msra.mxu1 %v365_v14 }
  0x17   : > { %688 = vmatmul.msk.f32.vlgmr.msra.gmra.mxu1 %vm381_vm0, %v361_v16 }
  0x1c   : > { %691 = vmatmul.msk.f32.gmra.mxu2 %vm381_vm0, %v360_v11 }
  0x1d   : > { %472 = vperm.xlu0 %712, %v364_v17  }
  0x1f   : > { %689 = vmatmul.msk.f32.gmra.mxu1 %vm381_vm0, %v362_v18 }
  0x87   : > { %v468_v19 = vpop.permute.xlu0 %467 }
  0x8f   : > { %v473_v25 = vpop.permute.xlu0 %472 }
  0x92   : > { %v405_v21 = vpop.f32.mrf.mxu0 }
  0x93   : > { %v406_v22 = vadd.f32 %v713_v20, %v405_v21 }
  0x94   : > { %v434_v23 = vpop.f32.mrf.mxu1 }
  0x95   : > { %v475_v24 = vmul.f32 %v468_v19, %v406_v22 }
  0x96   : > { %v408_v26 = vpop.f32.mrf.mxu3 }
  0x97   : > { %v457_v27 = vpop.f32.mrf.mxu2  ;;  %v409_v28 = vadd.f32 %v713_v20, %v408_v26  ;;  %v480_v31 = vsel %vm479_vm1, %v475_v24, 0.0 }
  0x98   : > { %v458_v29 = vadd.f32 %v457_v27, %v434_v23 }
  0x99   : > { %v476_v30 = vmul.f32 %v473_v25, %v409_v28 }
  0x9a   : > { %v463_v35 = vadd.f32 %v713_v20, %v458_v29 }
  0x9b   : > { %v481_v32 = vsel %vm479_vm1, %v476_v30, 0.0 }
  0x9c   : > { %v482_v33 = vadd.f32 %v481_v32, %v480_v31  ;;  %v437_v34 = vpop.f32.mrf.mxu1  ;;  %v477_v39 = vmul.f32 %v468_v19, %v463_v35 }
  0x9e   : > { %v483_v36 = vrot.slane %v482_v33, 4  ;;  %v489_v43 = vsel %vm479_vm1, %v477_v39, 0.0 }
  0x9f   : > { %v460_v37 = vpop.f32.mrf.mxu2 }
  0xa0   : > { %v461_v38 = vadd.f32 %v460_v37, %v437_v34  ;;  %v484_v41 = vadd.f32 %v483_v36, %v482_v33 }
  0xa2   : > { %v464_v40 = vadd.f32 %v713_v20, %v461_v38  ;;  %v485_v45 = vrot.slane %v484_v41, 2 }
  0xa4   : > { %v478_v42 = vmul.f32 %v473_v25, %v464_v40  ;;  %v486_v48 = vadd.f32 %v485_v45, %v484_v41 }
  0xa6   : > { %v490_v44 = vsel %vm479_vm1, %v478_v42, 0.0  ;;  %v487_v51 = vrot.slane %v486_v48, 1 }
  0xa7   : > { %v491_v46 = vadd.f32 %v490_v44, %v489_v43 }
  0xa8   : > { %v488_v54 = vadd.f32 %v487_v51, %v486_v48 }
  0xa9   : > { %v492_v47 = vrot.slane %v491_v46, 4 }
  0xab   : > { %v493_v49 = vadd.f32 %v492_v47, %v491_v46 }
  0xad   : > { %v494_v50 = vrot.slane %v493_v49, 2 }
  0xaf   : > { %v495_v52 = vadd.f32 %v494_v50, %v493_v49 }
  0xb1   : > { %v496_v53 = vrot.slane %v495_v52, 1 }
  0xb3   : > { %v497_v55 = vadd.f32 %v496_v53, %v495_v52 }
  0xb5   : > { %v498_v56 = vadd.f32 %v497_v55, %v488_v54 }
  0xb7   : > { %v499_v57 = vmul.f32 0.03125, %v498_v56 }
  0xb9   : > { %v500_v58 = vsub.f32 %v475_v24, %v499_v57  ;;  %v501_v59 = vsub.f32 %v476_v30, %v499_v57  ;;  %v502_v60 = vsub.f32 %v477_v39, %v499_v57  ;;  %v503_v61 = vsub.f32 %v478_v42, %v499_v57 }
  0xbb   : > { %v504_v62 = vmul.f32 %v500_v58, %v500_v58  ;;  %v505_v63 = vmul.f32 %v501_v59, %v501_v59  ;;  %v515_v0 = vmul.f32 %v502_v60, %v502_v60  ;;  %v516_v1 = vmul.f32 %v503_v61, %v503_v61 }
  0xbd   : > { %v506_v2 = vsel %vm479_vm1, %v504_v62, 0.0  ;;  %v507_v3 = vsel %vm479_vm1, %v505_v63, 0.0  ;;  %v517_v4 = vsel %vm479_vm1, %v515_v0, 0.0  ;;  %v518_v5 = vsel %vm479_vm1, %v516_v1, 0.0 }
  0xbe   : > { %v508_v6 = vadd.f32 %v507_v3, %v506_v2  ;;  %v519_v7 = vadd.f32 %v518_v5, %v517_v4 }
  0xc0   : > { %v509_v8 = vrot.slane %v508_v6, 4  ;;  %v520_v9 = vrot.slane %v519_v7, 4 }
  0xc2   : > { %v510_v10 = vadd.f32 %v509_v8, %v508_v6  ;;  %v521_v11 = vadd.f32 %v520_v9, %v519_v7 }
  0xc4   : > { %v511_v12 = vrot.slane %v510_v10, 2  ;;  %v522_v13 = vrot.slane %v521_v11, 2 }
  0xc6   : > { %v512_v14 = vadd.f32 %v511_v12, %v510_v10  ;;  %v523_v15 = vadd.f32 %v522_v13, %v521_v11 }
  0xc8   : > { %v513_v16 = vrot.slane %v512_v14, 1  ;;  %v524_v17 = vrot.slane %v523_v15, 1 }
  0xca   : > { %v514_v18 = vadd.f32 %v513_v16, %v512_v14  ;;  %v525_v19 = vadd.f32 %v524_v17, %v523_v15 }
  0xcc   : > { %v526_v20 = vadd.f32 %v525_v19, %v514_v18 }
  0xce   : > { %v527_v21 = vmul.f32 0.03125, %v526_v20 }
  0xd0   : > { %v528_v22 = vadd.f32 1e-05, %v527_v21 }
  0xd2   : > { %714 = vrsqrt.f32 %v528_v22  ;;  %vm535_vm3 = vweird.f32 %v528_v22 }
  0xd8   : > { %v715_v23 = vpop.eup %714 }
  0xd9   : > { %v530_v24 = vmul.f32 %v715_v23, %v528_v22  ;;  %vm536_vm2 = vweird.f32 %v715_v23 }
  0xda   : > { %vm537_vm4 = vmor %vm535_vm3, %vm536_vm2 }
  0xdb   : > { %v531_v25 = vmul.f32 %v715_v23, %v530_v24 }
  0xdd   : > { %v532_v26 = vmul.f32 0.5, %v531_v25 }
  0xdf   : > { %v533_v27 = vsub.f32 1.5, %v532_v26 }
  0xe1   : > { %v534_v28 = vmul.f32 %v715_v23, %v533_v27 }
  0xe3   : > { %v538_v29 = vsel %vm537_vm4, %v715_v23, %v534_v28 }
  0xe4   : > { %v539_v30 = vmul.f32 %v538_v29, %v500_v58  ;;  %v540_v31 = vmul.f32 %v538_v29, %v501_v59  ;;  %v541_v32 = vmul.f32 %v538_v29, %v502_v60  ;;  %v542_v33 = vmul.f32 %v538_v29, %v503_v61 }
  0xe6   : > { %vm543_vm5 = vcmp.ge.f32.partialorder %v539_v30, 0.0  ;;  %vm544_vm6 = vcmp.ge.f32.partialorder %v540_v31, 0.0  ;;  %v545_v34 = vmul.f32 0.2, %v539_v30  ;;  %v546_v35 = vmul.f32 0.2, %v540_v31 }
  0xe7   : > { %vm549_vm7 = vcmp.ge.f32.partialorder %v541_v32, 0.0  ;;  %vm550_vm8 = vcmp.ge.f32.partialorder %v542_v33, 0.0  ;;  %v551_v36 = vmul.f32 0.2, %v541_v32  ;;  %v552_v37 = vmul.f32 0.2, %v542_v33 }
  0xe8   : > { %v547_v38 = vsel %vm543_vm5, %v539_v30, %v545_v34  ;;  %v548_v39 = vsel %vm544_vm6, %v540_v31, %v546_v35 }
  0xe9   : > { %v553_v40 = vsel %vm549_vm7, %v541_v32, %v551_v36  ;;  %v554_v41 = vsel %vm550_vm8, %v542_v33, %v552_v37  ;;  %555 = vst.msk [vmem:[%s353_s24] sm:$0xff] %vm479_vm1, %v547_v38 }
  0xea   : > { %556 = vst.msk [vmem:[%s353_s24 + $0x8] sm:$0xff] %vm479_vm1, %v548_v39 }
  0xeb   : > { %557 = vst.msk [vmem:[%s358_s30] sm:$0xff] %vm479_vm1, %v553_v40 }
  0xec   : > { %558 = vst.msk [vmem:[%s358_s30 + $0x8] sm:$0xff] %vm479_vm1, %v554_v41 }
  0xed PF: > { %s19_s27 = sadd.s32 1, %s722_s27  }
  0xee   : > { %p16_p4 = scmp.ge.s32.totalorder %s19_s27, 4  }
  0xf0   :  { %18 = sbr.rel (!%p16_p4) target bundleno = 1 (0x1), region = 96 }

// kernel: expansion_forward.5
= control target key start
LH: loop header
LB: loop body
LE: loop exit
PB: predicated region body
PF: predicated region fallthrough
CT: control target
= control target key end

     0   :  { %s682_s27 = smov 0   ;;  %s742_s0 = inlined_call_operand.vmem [shape: f32[2,8,16], index: 0, kind: input, shape index: {}]   ;;  %s743_s1 = inlined_call_operand.vmem [shape: f32[2,8,16], index: 1, kind: input, shape index: {}]   ;;  %s744_s2 = inlined_call_operand.vmem [shape: f32[2,8,1], index: 2, kind: input, shape index: {}]   ;;  %s745_s3 = inlined_call_operand.vmem [shape: f32[16,32], index: 3, kind: input, shape index: {}]   ;;  %s746_s4 = inlined_call_operand.vmem [shape: f32[16,32], index: 4, kind: input, shape index: {}]   ;;  %s747_s5 = inlined_call_operand.vmem [shape: f32[16,32], index: 5, kind: input, shape index: {}]   ;;  %s748_s6 = inlined_call_operand.vmem [shape: f32[1,32], index: 6, kind: input, shape index: {}]   ;;  %s749_s7 = inlined_call_operand.vmem [shape: f32[2,8,32], index: 7, kind: output, shape index: {0}]   ;;  %s750_s8 = inlined_call_operand.vmem [shape: f32[2,8,32], index: 8, kind: output, shape index: {1}]  }
   0x1 LB: > { %s600_s28 = sadd.s32 4294967295, %s634_s27   ;;  %p604_p0 = scmp.ge.s32.totalorder %s634_s27, 1  ;;  %s634_s27 = sphi %s682_s27, %s19_s27  }
   0x2   : > { %p282_p1 = scmp.lt.s32.totalorder %s634_s27, 3 }
   0x4   : > { %p283_p2 = pnand %p604_p0, %p282_p1 }
   0x5   : > { %p326_p3 = scmp.lt.s32.totalorder (!%p283_p2), %s600_s28, 1 }
   0x6   : > { %286 = sbr.rel (%p283_p2) target bundleno = 218 (0xda), region = 48 }
   0xb   : > { %v354_v0 = vld [vmem:[%s747_s5 + $0x8] sm:$0xff]  ;;  %v353_v2 = vld [vmem:[%s747_s5] sm:$0xff]  ;;  %s752_s28 = smov (!%p326_p3, %s600_s28), 1  ;;  %v636_v6 = vmov 0   ;;  %vm359_vm0 = vcmask 130048   ;;  %vm434_vm1 = vcmask 261120  }
   0xc   : > { %v352_v1 = vld [vmem:[%s746_s4 + $0x8] sm:$0xff]  ;;  %420 = vmatpush.msra.mxu2 %v354_v0  ;;  %v351_v3 = vld [vmem:[%s746_s4] sm:$0xff]  ;;  %624 = vset.pattern.permute.xlu0 %v636_v6  ;;  %s708_s19 = sshll.u32 %s752_s28, 3 }
   0xd   : > { %377 = vmatpush.msra.mxu0 %v352_v1  ;;  %v350_v4 = vld [vmem:[%s745_s3 + $0x8] sm:$0xff]  ;;  %v349_v5 = vld [vmem:[%s745_s3] sm:$0xff]  ;;  %s329_s22 = scalar_lea.vmem %s742_s0, %s708_s19  ;;  %s333_s25 = scalar_lea.vmem %s743_s1, %s708_s19 }
   0xe   : > { %400 = vmatpush.msra.mxu1 %v350_v4  ;;  %421 = vmatpush.msra.mxu2 %v353_v2  ;;  %v346_v7 = vld [vmem:[%s329_s22] sm:$0xff]  ;;  %s337_s29 = scalar_lea.vmem %s744_s2, %s708_s19  ;;  %s341_s12 = scalar_lea.vmem %s749_s7, %s708_s19 }
   0xf   : > { %378 = vmatpush.msra.mxu0 %v351_v3  ;;  %612 = vmatmul.msk.f32.vlgmr.msra.gmra.mxu2 %vm359_vm0, %v346_v7  ;;  %v347_v8 = vld [vmem:[%s333_s25] sm:$0xff]  ;;  %s345_s15 = scalar_lea.vmem %s750_s8, %s708_s19 }
  0x10   : > { %401 = vmatpush.msra.mxu1 %v349_v5  ;;  %610 = vmatmul.msk.f32.vlgmr.msra.gmra.mxu0 %vm359_vm0, %v346_v7  ;;  %v348_v9 = vld [vmem:[%s337_s29] sm:$0xff] }
  0x11   : > { %611 = vmatmul.msk.f32.vlgmr.msra.gmra.mxu1 %vm359_vm0, %v347_v8  ;;  %429 = vperm.xlu0 %624, %v348_v9   ;;  %v625_v10 = vld [vmem:[%s748_s6] ss:$0 sm:$0xff] }
  0x83   : > { %v430_v12 = vpop.permute.xlu0 %429 }
  0x8d   : > { %v380_v11 = vpop.f32.mrf.mxu0 }
  0x8e   : > { %v381_v13 = vadd.f32 %v625_v10, %v380_v11  ;;  %v403_v15 = vpop.f32.mrf.mxu1 }
  0x90   : > { %v432_v14 = vmul.f32 %v430_v12, %v381_v13 }
  0x92   : > { %v435_v16 = vsel %vm434_vm1, %v432_v14, 0.0  ;;  %v423_v18 = vpop.f32.mrf.mxu2 }
  0x93   : > { %v436_v17 = vrot.slane %v435_v16, 4  ;;  %v424_v19 = vadd.f32 %v423_v18, %v403_v15 }
  0x95   : > { %v437_v20 = vadd.f32 %v436_v17, %v435_v16  ;;  %v426_v21 = vadd.f32 %v625_v10, %v424_v19 }
  0x97   : > { %v433_v22 = vmul.f32 %v430_v12, %v426_v21  ;;  %v438_v23 = vrot.slane %v437_v20, 2 }
  0x99   : > { %v442_v24 = vsel %vm434_vm1, %v433_v22, 0.0  ;;  %v439_v26 = vadd.f32 %v438_v23, %v437_v20 }
  0x9a   : > { %v443_v25 = vrot.slane %v442_v24, 4 }
  0x9b   : > { %v440_v29 = vrot.slane %v439_v26, 1 }
  0x9c   : > { %v444_v27 = vadd.f32 %v443_v25, %v442_v24 }
  0x9d   : > { %v441_v32 = vadd.f32 %v440_v29, %v439_v26 }
  0x9e   : > { %v445_v28 = vrot.slane %v444_v27, 2 }
  0xa0   : > { %v446_v30 = vadd.f32 %v445_v28, %v444_v27 }
  0xa2   : > { %v447_v31 = vrot.slane %v446_v30, 1 }
  0xa4   : > { %v448_v33 = vadd.f32 %v447_v31, %v446_v30 }
  0xa6   : > { %v449_v34 = vadd.f32 %v448_v33, %v441_v32 }
  0xa8   : > { %v450_v35 = vmul.f32 0.0625, %v449_v34 }
  0xaa   : > { %v451_v36 = vsub.f32 %v432_v14, %v450_v35  ;;  %v452_v37 = vsub.f32 %v433_v22, %v450_v35 }
  0xac   : > { %v453_v38 = vmul.f32 %v451_v36, %v451_v36  ;;  %v461_v39 = vmul.f32 %v452_v37, %v452_v37 }
  0xae   : > { %v454_v40 = vsel %vm434_vm1, %v453_v38, 0.0  ;;  %v462_v41 = vsel %vm434_vm1, %v461_v39, 0.0 }
  0xaf   : > { %v455_v42 = vrot.slane %v454_v40, 4  ;;  %v463_v43 = vrot.slane %v462_v41, 4 }
  0xb1   : > { %v456_v44 = vadd.f32 %v455_v42, %v454_v40  ;;  %v464_v45 = vadd.f32 %v463_v43, %v462_v41 }
  0xb3   : > { %v457_v46 = vrot.slane %v456_v44, 2  ;;  %v465_v47 = vrot.slane %v464_v45, 2 }
  0xb5   : > { %v458_v48 = vadd.f32 %v457_v46, %v456_v44  ;;  %v466_v49 = vadd.f32 %v465_v47, %v464_v45 }
  0xb7   : > { %v459_v50 = vrot.slane %v458_v48, 1  ;;  %v467_v51 = vrot.slane %v466_v49, 1 }
  0xb9   : > { %v460_v52 = vadd.f32 %v459_v50, %v458_v48  ;;  %v468_v53 = vadd.f32 %v467_v51, %v466_v49 }
  0xbb   : > { %v469_v54 = vadd.f32 %v468_v53, %v460_v52 }
  0xbd   : > { %v470_v55 = vmul.f32 0.0625, %v469_v54 }
  0xbf   : > { %v471_v56 = vadd.f32 1e-05, %v470_v55 }
  0xc1   : > { %626 = vrsqrt.f32 %v471_v56  ;;  %vm478_vm3 = vweird.f32 %v471_v56 }
  0xc7   : > { %v627_v57 = vpop.eup %626 }
  0xc8   : > { %v473_v58 = vmul.f32 %v627_v57, %v471_v56  ;;  %vm479_vm2 = vweird.f32 %v627_v57 }
  0xc9   : > { %vm480_vm4 = vmor %vm478_vm3, %vm479_vm2 }
  0xca   : > { %v474_v59 = vmul.f32 %v627_v57, %v473_v58 }
  0xcc   : > { %v475_v60 = vmul.f32 0.5, %v474_v59 }
  0xce   : > { %v476_v61 = vsub.f32 1.5, %v475_v60 }
  0xd0   : > { %v477_v62 = vmul.f32 %v627_v57, %v476_v61 }
  0xd2   : > { %v481_v63 = vsel %vm480_vm4, %v627_v57, %v477_v62 }
  0xd3   : > { %v482_v0 = vmul.f32 %v481_v63, %v451_v36  ;;  %v483_v1 = vmul.f32 %v481_v63, %v452_v37 }
  0xd5   : > { %vm484_vm5 = vcmp.ge.f32.partialorder %v482_v0, 0.0  ;;  %v485_v2 = vmul.f32 0.2, %v482_v0  ;;  %vm487_vm6 = vcmp.ge.f32.partialorder %v483_v1, 0.0  ;;  %v488_v3 = vmul.f32 0.2, %v483_v1 }
  0xd7   : > { %v486_v4 = vsel %vm484_vm5, %v482_v0, %v485_v2  ;;  %v489_v5 = vsel %vm487_vm6, %v483_v1, %v488_v3 }
  0xd8   : > { %490 = vst.msk [vmem:[%s341_s12] sm:$0xff] %vm434_vm1, %v486_v4 }
  0xd9   : > { %491 = vst.msk [vmem:[%s345_s15] sm:$0xff] %vm434_vm1, %v489_v5 }
  0xda PF: > { %s19_s27 = sadd.s32 1, %s634_s27  }
  0xdb   : > { %p16_p4 = scmp.ge.s32.totalorder %s19_s27, 4  }
  0xdd   :  { %18 = sbr.rel (!%p16_p4) target bundleno = 1 (0x1), region = 96 }

// kernel: expansion_forward.7
= control target key start
LH: loop header
LB: loop body
LE: loop exit
PB: predicated region body
PF: predicated region fallthrough
CT: control target
= control target key end

     0   :  { %s869_s27 = smov 0   ;;  %s965_s0 = inlined_call_operand.vmem [shape: f32[2,32,16], index: 0, kind: input, shape index: {}]   ;;  %s966_s1 = inlined_call_operand.vmem [shape: f32[2,32,16], index: 1, kind: input, shape index: {}]   ;;  %s967_s2 = inlined_call_operand.vmem [shape: f32[2,32,1], index: 2, kind: input, shape index: {}]   ;;  %s968_s3 = inlined_call_operand.vmem [shape: f32[16,8], index: 3, kind: input, shape index: {}]   ;;  %s969_s4 = inlined_call_operand.vmem [shape: f32[16,8], index: 4, kind: input, shape index: {}]   ;;  %s970_s5 = inlined_call_operand.vmem [shape: f32[16,8], index: 5, kind: input, shape index: {}]   ;;  %s971_s6 = inlined_call_operand.vmem [shape: f32[1,8], index: 6, kind: input, shape index: {}]   ;;  %s972_s7 = inlined_call_operand.vmem [shape: f32[2,32,8], index: 7, kind: output, shape index: {0}]   ;;  %s973_s8 = inlined_call_operand.vmem [shape: f32[2,32,8], index: 8, kind: output, shape index: {1}]  }
   0x1 LB: > { %s761_s28 = sadd.s32 4294967295, %s821_s27   ;;  %p765_p0 = scmp.ge.s32.totalorder %s821_s27, 1  ;;  %s821_s27 = sphi %s869_s27, %s19_s27  }
   0x2   : > { %p285_p1 = scmp.lt.s32.totalorder %s821_s27, 3 }
   0x4   : > { %p286_p2 = pnand %p765_p0, %p285_p1 }
   0x5   : > { %p334_p3 = scmp.lt.s32.totalorder (!%p286_p2), %s761_s28, 1 }
   0x6   : > { %289 = sbr.rel (%p286_p2) target bundleno = 253 (0xfd), region = 48 }
   0xb   : > { %v374_v0 = vld [vmem:[%s969_s4 + $0x8] sm:$0xff]  ;;  %v373_v2 = vld [vmem:[%s969_s4] sm:$0xff]  ;;  %s975_s28 = smov (!%p334_p3, %s761_s28), 1  ;;  %vm381_vm0 = vcmask 130048   ;;  %v823_v6 = vmov 0   ;;  %vm525_vm1 = vcmask 64512  }
   0xc   : > { %v376_v1 = vld [vmem:[%s970_s5 + $0x8] sm:$0xff]  ;;  %408 = vmatpush.msra.mxu0 %v374_v0  ;;  %795 = vmatpush.msra.mxu3 %v374_v0  ;;  %v375_v3 = vld [vmem:[%s970_s5] sm:$0xff]  ;;  %s895_s19 = sshll.u32 %s975_s28, 5 }
   0xd   : > { %v372_v4 = vld [vmem:[%s968_s3 + $0x8] sm:$0xff]  ;;  %799 = vmatpush.msra.mxu2 %v376_v1  ;;  %v371_v5 = vld [vmem:[%s968_s3] sm:$0xff]  ;;  %s901_s22 = scalar_lea.vmem %s965_s0, %s895_s19  ;;  %810 = vset.pattern.permute.xlu0 %v823_v6  ;;  %s343_s25 = scalar_lea.vmem %s966_s1, %s895_s19 }
   0xe   : > { %797 = vmatpush.msra.mxu1 %v372_v4  ;;  %409 = vmatpush.msra.mxu0 %v373_v2  ;;  %v359_v7 = vld [vmem:[%s901_s22] sm:$0xff]  ;;  %v360_v8 = vld [vmem:[%s901_s22 + $0x8] sm:$0xff]  ;;  %s348_s29 = scalar_lea.vmem %s967_s2, %s895_s19  ;;  %v361_v12 = vld [vmem:[%s901_s22 + $0x10] sm:$0xff]  ;;  %s353_s12 = scalar_lea.vmem %s972_s7, %s895_s19 }
   0xf   : > { %796 = vmatpush.msra.mxu3 %v373_v2  ;;  %800 = vmatpush.msra.mxu2 %v375_v3  ;;  %v364_v9 = vld [vmem:[%s343_s25 + $0x8] sm:$0xff]  ;;  %v367_v10 = vld [vmem:[%s348_s29] sm:$0xff]  ;;  %v369_v11 = vld [vmem:[%s348_s29 + $0x10] sm:$0xff]  ;;  %s358_s15 = scalar_lea.vmem %s973_s8, %s895_s19 }
  0x10   : > { %449 = vmatpush.msrb.mxu0 %v372_v4  ;;  %798 = vmatpush.msra.mxu1 %v371_v5  ;;  %v363_v13 = vld [vmem:[%s343_s25] sm:$0xff]  ;;  %v365_v14 = vld [vmem:[%s343_s25 + $0x10] sm:$0xff]  ;;  %v368_v15 = vld [vmem:[%s348_s29 + $0x8] sm:$0xff] }
  0x11   : > { %811 = vset.pattern.permute.xlu1 %v823_v6  ;;  %776 = vmatmul.msk.f32.vlgmr.msra.gmra.mxu0 %vm381_vm0, %v359_v7  ;;  %v370_v16 = vld [vmem:[%s348_s29 + $0x18] sm:$0xff]  ;;  %v812_v25 = vld [vmem:[%s971_s6] ss:$0 sm:$0xff] }
  0x12   : > { %450 = vmatpush.msrb.mxu0 %v371_v5  ;;  %777 = vmatmul.msk.f32.vlgmr.msra.gmra.mxu3 %vm381_vm0, %v360_v8  ;;  %v362_v17 = vld [vmem:[%s901_s22 + $0x18] sm:$0xff] }
  0x13   : > { %785 = vmatmul.msk.f32.vlgmr.msra.gmra.mxu2 %vm381_vm0, %v360_v8  ;;  %781 = vmatmul.msk.f32.vlgmr.msra.gmra.mxu1 %vm381_vm0, %v364_v9  ;;  %v366_v18 = vld [vmem:[%s343_s25 + $0x18] sm:$0xff] }
  0x14   : > { %478 = vmatpush.msra.mxu0 %v376_v1  ;;  %499 = vperm.xlu0 %810, %v367_v10  }
  0x15   : > { %509 = vperm.xlu1 %811, %v369_v11  }
  0x16   : > { %479 = vmatpush.msra.mxu0 %v375_v3 }
  0x19   : > { %780 = vmatmul.msk.f32.vlgmr.msrb.gmra.mxu0 %vm381_vm0, %v363_v13 }
  0x1a   : > { %778 = vmatmul.msk.f32.gmra.mxu3 %vm381_vm0, %v361_v12 }
  0x1b   : > { %786 = vmatmul.msk.f32.gmra.mxu2 %vm381_vm0, %v361_v12  ;;  %782 = vmatmul.msk.f32.gmra.mxu1 %vm381_vm0, %v365_v14 }
  0x1c   : > { %504 = vperm.xlu0 %810, %v368_v15  }
  0x1d   : > { %514 = vperm.xlu1 %811, %v370_v16  }
  0x21   : > { %784 = vmatmul.msk.f32.vlgmr.msra.gmra.mxu0 %vm381_vm0, %v359_v7 }
  0x22   : > { %779 = vmatmul.msk.f32.gmra.mxu3 %vm381_vm0, %v362_v17 }
  0x23   : > { %787 = vmatmul.msk.f32.gmra.mxu2 %vm381_vm0, %v362_v17  ;;  %783 = vmatmul.msk.f32.gmra.mxu1 %vm381_vm0, %v366_v18 }
  0x86   : > { %v500_v21 = vpop.permute.xlu0 %499 }
  0x87   : > { %v510_v29 = vpop.permute.xlu1 %509 }
  0x8e   : > { %v411_v19 = vpop.f32.mrf.mxu0  ;;  %v505_v30 = vpop.permute.xlu0 %504 }
  0x8f   : > { %v412_v32 = vadd.f32 %v812_v25, %v411_v19  ;;  %v515_v57 = vpop.permute.xlu1 %514 }
  0x90   : > { %v455_v20 = vpop.f32.mrf.mxu1 }
  0x91   : > { %v517_v40 = vmul.f32 %v500_v21, %v412_v32 }
  0x93   : > { %v526_v49 = vsel %vm525_vm1, %v517_v40, 0.0 }
  0x95   : > { %v414_v22 = vpop.f32.mrf.mxu3 }
  0x96   : > { %v484_v23 = vpop.f32.mrf.mxu2  ;;  %v452_v24 = vpop.f32.mrf.mxu0  ;;  %v415_v28 = vadd.f32 %v812_v25, %v414_v22 }
  0x97   : > { %v485_v27 = vadd.f32 %v484_v23, %v455_v20 }
  0x98   : > { %v458_v26 = vpop.f32.mrf.mxu1  ;;  %v518_v38 = vmul.f32 %v505_v30, %v415_v28 }
  0x99   : > { %v494_v35 = vadd.f32 %v812_v25, %v485_v27 }
  0x9a   : > { %v527_v45 = vsel %vm525_vm1, %v518_v38, 0.0 }
  0x9b   : > { %v522_v43 = vmul.f32 %v505_v30, %v494_v35  ;;  %v528_v54 = vadd.f32 %v527_v45, %v526_v49 }
  0x9d   : > { %v417_v31 = vpop.f32.mrf.mxu3  ;;  %v540_v55 = vsel %vm525_vm1, %v522_v43, 0.0 }
  0x9e   : > { %v418_v33 = vadd.f32 %v812_v25, %v417_v31  ;;  %v487_v34 = vpop.f32.mrf.mxu2  ;;  %v481_v37 = vpop.f32.mrf.mxu0 }
  0x9f   : > { %v488_v36 = vadd.f32 %v487_v34, %v458_v26  ;;  %v482_v39 = vadd.f32 %v481_v37, %v452_v24 }
  0xa0   : > { %v519_v41 = vmul.f32 %v510_v29, %v418_v33  ;;  %v461_v47 = vpop.f32.mrf.mxu1 }
  0xa1   : > { %v493_v42 = vadd.f32 %v812_v25, %v482_v39  ;;  %v495_v44 = vadd.f32 %v812_v25, %v488_v36 }
  0xa2   : > { %v529_v50 = vsel %vm525_vm1, %v519_v41, 0.0 }
  0xa3   : > { %v521_v46 = vmul.f32 %v500_v21, %v493_v42  ;;  %v523_v56 = vmul.f32 %v510_v29, %v495_v44  ;;  %v530_v61 = vadd.f32 %v529_v50, %v528_v54 }
  0xa5   : > { %v420_v48 = vpop.f32.mrf.mxu3  ;;  %v539_v51 = vsel %vm525_vm1, %v521_v46, 0.0  ;;  %v542_v0 = vsel %vm525_vm1, %v523_v56, 0.0 }
  0xa6   : > { %v421_v52 = vadd.f32 %v812_v25, %v420_v48  ;;  %v490_v53 = vpop.f32.mrf.mxu2  ;;  %v541_v59 = vadd.f32 %v540_v55, %v539_v51 }
  0xa7   : > { %v491_v58 = vadd.f32 %v490_v53, %v461_v47 }
  0xa8   : > { %v520_v60 = vmul.f32 %v515_v57, %v421_v52  ;;  %v543_v3 = vadd.f32 %v542_v0, %v541_v59 }
  0xa9   : > { %v496_v62 = vadd.f32 %v812_v25, %v491_v58 }
  0xaa   : > { %v531_v63 = vsel %vm525_vm1, %v520_v60, 0.0 }
  0xab   : > { %v532_v1 = vadd.f32 %v531_v63, %v530_v61  ;;  %v524_v2 = vmul.f32 %v515_v57, %v496_v62 }
  0xad   : > { %v533_v4 = vrot.slane %v532_v1, 4  ;;  %v544_v5 = vsel %vm525_vm1, %v524_v2, 0.0 }
  0xae   : > { %v545_v6 = vadd.f32 %v544_v5, %v543_v3 }
  0xaf   : > { %v534_v7 = vadd.f32 %v533_v4, %v532_v1 }
  0xb0   : > { %v546_v8 = vrot.slane %v545_v6, 4 }
  0xb1   : > { %v535_v9 = vrot.slane %v534_v7, 2 }
  0xb2   : > { %v547_v10 = vadd.f32 %v546_v8, %v545_v6 }
  0xb3   : > { %v536_v11 = vadd.f32 %v535_v9, %v534_v7 }
  0xb4   : > { %v548_v12 = vrot.slane %v547_v10, 2 }
  0xb5   : > { %v537_v13 = vrot.slane %v536_v11, 1 }
  0xb6   : > { %v549_v14 = vadd.f32 %v548_v12, %v547_v10 }
  0xb7   : > { %v538_v16 = vadd.f32 %v537_v13, %v536_v11 }
  0xb8   : > { %v550_v15 = vrot.slane %v549_v14, 1 }
  0xba   : > { %v551_v17 = vadd.f32 %v550_v15, %v549_v14 }
  0xbc   : > { %v552_v18 = vadd.f32 %v551_v17, %v538_v16 }
  0xbe   : > { %v553_v19 = vmul.f32 0.015625, %v552_v18 }
  0xc0   : > { %v554_v20 = vsub.f32 %v517_v40, %v553_v19  ;;  %v555_v21 = vsub.f32 %v518_v38, %v553_v19  ;;  %v556_v22 = vsub.f32 %v519_v41, %v553_v19  ;;  %v557_v23 = vsub.f32 %v520_v60, %v553_v19 }
  0xc1   : > { %v558_v24 = vsub.f32 %v521_v46, %v553_v19  ;;  %v559_v25 = vsub.f32 %v522_v43, %v553_v19  ;;  %v560_v26 = vsub.f32 %v523_v56, %v553_v19  ;;  %v561_v27 = vsub.f32 %v524_v2, %v553_v19 }
  0xc2   : > { %v562_v28 = vmul.f32 %v554_v20, %v554_v20  ;;  %v563_v29 = vmul.f32 %v555_v21, %v555_v21  ;;  %v564_v30 = vmul.f32 %v556_v22, %v556_v22  ;;  %v565_v34 = vmul.f32 %v557_v23, %v557_v23 }
  0xc3   : > { %v579_v31 = vmul.f32 %v558_v24, %v558_v24  ;;  %v580_v32 = vmul.f32 %v559_v25, %v559_v25  ;;  %v581_v33 = vmul.f32 %v560_v26, %v560_v26  ;;  %v582_v39 = vmul.f32 %v561_v27, %v561_v27 }
  0xc4   : > { %v566_v35 = vsel %vm525_vm1, %v562_v28, 0.0  ;;  %v567_v36 = vsel %vm525_vm1, %v563_v29, 0.0  ;;  %v569_v41 = vsel %vm525_vm1, %v564_v30, 0.0  ;;  %v571_v45 = vsel %vm525_vm1, %v565_v34, 0.0 }
  0xc5   : > { %v568_v37 = vadd.f32 %v567_v36, %v566_v35  ;;  %v583_v38 = vsel %vm525_vm1, %v579_v31, 0.0  ;;  %v584_v40 = vsel %vm525_vm1, %v580_v32, 0.0  ;;  %v586_v44 = vsel %vm525_vm1, %v581_v33, 0.0 }
  0xc6   : > { %v585_v42 = vadd.f32 %v584_v40, %v583_v38  ;;  %v588_v48 = vsel %vm525_vm1, %v582_v39, 0.0 }
  0xc7   : > { %v570_v43 = vadd.f32 %v569_v41, %v568_v37 }
  0xc8   : > { %v587_v46 = vadd.f32 %v586_v44, %v585_v42 }
  0xc9   : > { %v572_v47 = vadd.f32 %v571_v45, %v570_v43 }
  0xca   : > { %v589_v49 = vadd.f32 %v588_v48, %v587_v46 }
  0xcb   : > { %v573_v50 = vrot.slane %v572_v47, 4 }
  0xcc   : > { %v590_v51 = vrot.slane %v589_v49, 4 }
  0xcd   : > { %v574_v52 = vadd.f32 %v573_v50, %v572_v47 }
  0xce   : > { %v591_v53 = vadd.f32 %v590_v51, %v589_v49 }
  0xcf   : > { %v575_v54 = vrot.slane %v574_v52, 2 }
  0xd0   : > { %v592_v55 = vrot.slane %v591_v53, 2 }
  0xd1   : > { %v576_v56 = vadd.f32 %v575_v54, %v574_v52 }
  0xd2   : > { %v593_v57 = vadd.f32 %v592_v55, %v591_v53 }
  0xd3   : > { %v577_v58 = vrot.slane %v576_v56, 1 }
  0xd4   : > { %v594_v59 = vrot.slane %v593_v57, 1 }
  0xd5   : > { %v578_v60 = vadd.f32 %v577_v58, %v576_v56 }
  0xd6   : > { %v595_v61 = vadd.f32 %v594_v59, %v593_v57 }
  0xd8   : > { %v596_v62 = vadd.f32 %v595_v61, %v578_v60 }
  0xda   : > { %v597_v63 = vmul.f32 0.015625, %v596_v62 }
  0xdc   : > { %v598_v0 = vadd.f32 1e-05, %v597_v63 }
  0xde   : > { %813 = vrsqrt.f32 %v598_v0  ;;  %vm605_vm3 = vweird.f32 %v598_v0 }
  0xe4   : > { %v814_v1 = vpop.eup %813 }
  0xe5   : > { %v600_v2 = vmul.f32 %v814_v1, %v598_v0  ;;  %vm606_vm2 = vweird.f32 %v814_v1 }
  0xe6   : > { %vm607_vm4 = vmor %vm605_vm3, %vm606_vm2 }
  0xe7   : > { %v601_v3 = vmul.f32 %v814_v1, %v600_v2 }
  0xe9   : > { %v602_v4 = vmul.f32 0.5, %v601_v3 }
  0xeb   : > { %v603_v5 = vsub.f32 1.5, %v602_v4 }
  0xed   : > { %v604_v6 = vmul.f32 %v814_v1, %v603_v5 }
  0xef   : > { %v608_v7 = vsel %vm607_vm4, %v814_v1, %v604_v6 }
  0xf0   : > { %v609_v8 = vmul.f32 %v608_v7, %v554_v20  ;;  %v610_v9 = vmul.f32 %v608_v7, %v555_v21  ;;  %v611_v10 = vmul.f32 %v608_v7, %v556_v22  ;;  %v612_v11 = vmul.f32 %v608_v7, %v557_v23 }
  0xf1   : > { %v613_v12 = vmul.f32 %v608_v7, %v558_v24  ;;  %v614_v13 = vmul.f32 %v608_v7, %v559_v25  ;;  %v615_v14 = vmul.f32 %v608_v7, %v560_v26  ;;  %v616_v15 = vmul.f32 %v608_v7, %v561_v27 }
  0xf2   : > { %vm617_vm5 = vcmp.ge.f32.partialorder %v609_v8, 0.0  ;;  %vm618_vm6 = vcmp.ge.f32.partialorder %v610_v9, 0.0  ;;  %vm619_vm7 = vcmp.ge.f32.partialorder %v611_v10, 0.0  ;;  %v621_v16 = vmul.f32 0.2, %v609_v8 }
  0xf3   : > { %v622_v17 = vmul.f32 0.2, %v610_v9  ;;  %v623_v18 = vmul.f32 0.2, %v611_v10  ;;  %vm620_vm8 = vcmp.ge.f32.partialorder %v612_v11, 0.0  ;;  %vm629_vm9 = vcmp.ge.f32.partialorder %v613_v12, 0.0 }
  0xf4   : > { %v624_v19 = vmul.f32 0.2, %v612_v11  ;;  %v625_v20 = vsel %vm617_vm5, %v609_v8, %v621_v16  ;;  %vm630_vm10 = vcmp.ge.f32.partialorder %v614_v13, 0.0  ;;  %v633_v23 = vmul.f32 0.2, %v613_v12 }
  0xf5   : > { %v626_v21 = vsel %vm618_vm6, %v610_v9, %v622_v17  ;;  %v627_v22 = vsel %vm619_vm7, %v611_v10, %v623_v18  ;;  %v634_v24 = vmul.f32 0.2, %v614_v13  ;;  %v635_v25 = vmul.f32 0.2, %v615_v14  ;;  %641 = vst.msk [vmem:[%s353_s12] sm:$0xff] %vm525_vm1, %v625_v20 }
  0xf6   : > { %v628_v26 = vsel %vm620_vm8, %v612_v11, %v624_v19  ;;  %vm631_vm11 = vcmp.ge.f32.partialorder %v615_v14, 0.0  ;;  %v636_v27 = vmul.f32 0.2, %v616_v15  ;;  %vm632_vm12 = vcmp.ge.f32.partialorder %v616_v15, 0.0  ;;  %642 = vst.msk [vmem:[%s353_s12 + $0x8] sm:$0xff] %vm525_vm1, %v626_v21 }
  0xf7   : > { %v637_v28 = vsel %vm629_vm9, %v613_v12, %v633_v23  ;;  %v638_v29 = vsel %vm630_vm10, %v614_v13, %v634_v24  ;;  %643 = vst.msk [vmem:[%s353_s12 + $0x10] sm:$0xff] %vm525_vm1, %v627_v22  ;;  %v639_v30 = vsel %vm631_vm11, %v615_v14, %v635_v25 }
  0xf8   : > { %644 = vst.msk [vmem:[%s353_s12 + $0x18] sm:$0xff] %vm525_vm1, %v628_v26  ;;  %v640_v31 = vsel %vm632_vm12, %v616_v15, %v636_v27 }
  0xf9   : > { %645 = vst.msk [vmem:[%s358_s15] sm:$0xff] %vm525_vm1, %v637_v28 }
  0xfa   : > { %646 = vst.msk [vmem:[%s358_s15 + $0x8] sm:$0xff] %vm525_vm1, %v638_v29 }
  0xfb   : > { %647 = vst.msk [vmem:[%s358_s15 + $0x10] sm:$0xff] %vm525_vm1, %v639_v30 }
  0xfc   : > { %648 = vst.msk [vmem:[%s358_s15 + $0x18] sm:$0xff] %vm525_vm1, %v640_v31 }
  0xfd PF: > { %s19_s27 = sadd.s32 1, %s821_s27  }
  0xfe   : > { %p16_p4 = scmp.ge.s32.totalorder %s19_s27, 4  }
 0x100   :  { %18 = sbr.rel (!%p16_p4) target bundleno = 1 (0x1), region = 96 }

// kernel: expansion_forward.8
= control target key start
LH: loop header
LB: loop body
LE: loop exit
PB: predicated region body
PF: predicated region fallthrough
CT: control target
= control target key end

     0   :  { %s1068_s27 = smov 0   ;;  %s1357_s0 = inlined_call_operand.vmem [shape: f32[2,64,8], index: 0, kind: input, shape index: {}]   ;;  %s1358_s1 = inlined_call_operand.vmem [shape: f32[2,64,8], index: 1, kind: input, shape index: {}]   ;;  %s1359_s2 = inlined_call_operand.vmem [shape: f32[2,64,1], index: 2, kind: input, shape index: {}]   ;;  %s1360_s3 = inlined_call_operand.vmem [shape: f32[8,4], index: 3, kind: input, shape index: {}]   ;;  %s1361_s4 = inlined_call_operand.vmem [shape: f32[8,4], index: 4, kind: input, shape index: {}]   ;;  %s1362_s5 = inlined_call_operand.vmem [shape: f32[8,4], index: 5, kind: input, shape index: {}]   ;;  %s1363_s6 = inlined_call_operand.vmem [shape: f32[1,4], index: 6, kind: input, shape index: {}]   ;;  %s1364_s7 = inlined_call_operand.vmem [shape: f32[2,64,4], index: 7, kind: output, shape index: {0}]   ;;  %s1365_s8 = inlined_call_operand.vmem [shape: f32[2,64,4], index: 8, kind: output, shape index: {1}]  }
   0x1 LB: > { %s950_s28 = sadd.s32 4294967295, %s1020_s27   ;;  %p954_p0 = scmp.ge.s32.totalorder %s1020_s27, 1  ;;  %s1020_s27 = sphi %s1068_s27, %s19_s27  }
   0x2   : > { %p285_p1 = scmp.lt.s32.totalorder %s1020_s27, 3 }
   0x4   : > { %p286_p2 = pnand %p954_p0, %p285_p1 }
   0x5   : > { %p334_p3 = scmp.lt.s32.totalorder (!%p286_p2), %s950_s28, 1 }
   0x6   : > { %289 = sbr.rel (%p286_p2) target bundleno = 297 (0x129), region = 48 }
   0xb   : > { %v384_v0 = vld [vmem:[%s1361_s4] sm:$0xff]  ;;  %s1367_s28 = smov (!%p334_p3, %s950_s28), 1  ;;  %v1022_v3 = vmov 0   ;;  %vm390_vm0 = vcmask 64512   ;;  %vm626_vm1 = vcmask 31744  }
   0xc   : > { %v385_v1 = vld [vmem:[%s1362_s5] sm:$0xff]  ;;  %430 = vmatpush.msra.mxu0 %v384_v0  ;;  %996 = vmatpush.msra.mxu3 %v384_v0  ;;  %s1085_s13 = sshll.u32 %s1367_s28, 6 }
   0xd   : > { %v383_v2 = vld [vmem:[%s1360_s3] sm:$0xff]  ;;  %536 = vmatpush.msra.mxu2 %v385_v1  ;;  %1008 = vset.pattern.permute.xlu0 %v1022_v3  ;;  %s1091_s16 = scalar_lea.vmem %s1357_s0, %s1085_s13  ;;  %s1099_s19 = scalar_lea.vmem %s1358_s1, %s1085_s13 }
   0xe   : > { %997 = vmatpush.msrb.mxu3 %v383_v2  ;;  %495 = vmatpush.msra.mxu1 %v383_v2  ;;  %v359_v4 = vld [vmem:[%s1091_s16] sm:$0xff]  ;;  %v365_v5 = vld [vmem:[%s1091_s16 + $0x30] sm:$0xff]  ;;  %s348_s22 = scalar_lea.vmem %s1359_s2, %s1085_s13  ;;  %v360_v9 = vld [vmem:[%s1091_s16 + $0x8] sm:$0xff]  ;;  %s1313_s28 = scalar_lea.vmem %s1364_s7, %s1085_s13 }
   0xf   : > { %1009 = vset.pattern.permute.xlu1 %v1022_v3  ;;  %1010 = vset.pattern.permute.xlu2 %v1022_v3  ;;  %v367_v6 = vld [vmem:[%s1099_s19] sm:$0xff]  ;;  %v377_v8 = vld [vmem:[%s348_s22 + $0x10] sm:$0xff]  ;;  %v366_v10 = vld [vmem:[%s1091_s16 + $0x38] sm:$0xff]  ;;  %s358_s9 = scalar_lea.vmem %s1365_s8, %s1085_s13 }
  0x10   : > { %965 = vmatmul.msk.f32.vlgmr.msra.gmra.mxu0 %vm390_vm0, %v359_v4  ;;  %971 = vmatmul.msk.f32.vlgmr.msra.gmra.mxu3 %vm390_vm0, %v365_v5  ;;  %v375_v7 = vld [vmem:[%s348_s22] sm:$0xff]  ;;  %v368_v11 = vld [vmem:[%s1099_s19 + $0x8] sm:$0xff]  ;;  %v378_v13 = vld [vmem:[%s348_s22 + $0x18] sm:$0xff] }
  0x11   : > { %981 = vmatmul.msk.f32.vlgmr.msra.gmra.mxu2 %vm390_vm0, %v359_v4  ;;  %973 = vmatmul.msk.f32.vlgmr.msra.gmra.mxu1 %vm390_vm0, %v367_v6  ;;  %v376_v12 = vld [vmem:[%s348_s22 + $0x8] sm:$0xff]  ;;  %v379_v14 = vld [vmem:[%s348_s22 + $0x20] sm:$0xff]  ;;  %v361_v15 = vld [vmem:[%s1091_s16 + $0x10] sm:$0xff] }
  0x12   : > { %572 = vperm.xlu0 %1008, %v375_v7   ;;  %582 = vperm.xlu1 %1009, %v377_v8   ;;  %v373_v16 = vld [vmem:[%s1099_s19 + $0x30] sm:$0xff]  ;;  %v382_v19 = vld [vmem:[%s348_s22 + $0x38] sm:$0xff]  ;;  %v380_v20 = vld [vmem:[%s348_s22 + $0x28] sm:$0xff] }
  0x13   : > { %998 = vmatpush.msra.mxu3 %v385_v1  ;;  %592 = vperm.xlu2 %1010, %v379_v14   ;;  %v369_v17 = vld [vmem:[%s1099_s19 + $0x10] sm:$0xff]  ;;  %v362_v21 = vld [vmem:[%s1091_s16 + $0x18] sm:$0xff]  ;;  %v363_v24 = vld [vmem:[%s1091_s16 + $0x20] sm:$0xff] }
  0x14   : > { %v381_v18 = vld [vmem:[%s348_s22 + $0x30] sm:$0xff]  ;;  %v374_v22 = vld [vmem:[%s1099_s19 + $0x38] sm:$0xff]  ;;  %v371_v25 = vld [vmem:[%s1099_s19 + $0x20] sm:$0xff] }
  0x15   : > { %v370_v23 = vld [vmem:[%s1099_s19 + $0x18] sm:$0xff]  ;;  %v364_v26 = vld [vmem:[%s1091_s16 + $0x28] sm:$0xff]  ;;  %v1146_v41 = vld [vmem:[%s1363_s6] ss:$0 sm:$0xff] }
  0x16   : > { %v372_v27 = vld [vmem:[%s1099_s19 + $0x28] sm:$0xff] }
  0x18   : > { %966 = vmatmul.msk.f32.gmra.mxu0 %vm390_vm0, %v360_v9  ;;  %972 = vmatmul.msk.f32.gmra.mxu3 %vm390_vm0, %v366_v10 }
  0x19   : > { %982 = vmatmul.msk.f32.gmra.mxu2 %vm390_vm0, %v360_v9  ;;  %974 = vmatmul.msk.f32.gmra.mxu1 %vm390_vm0, %v368_v11 }
  0x1a   : > { %577 = vperm.xlu0 %1008, %v376_v12   ;;  %587 = vperm.xlu1 %1009, %v378_v13  }
  0x1b   : > { %597 = vperm.xlu2 %1010, %v380_v20  }
  0x20   : > { %967 = vmatmul.msk.f32.gmra.mxu0 %vm390_vm0, %v361_v15  ;;  %979 = vmatmul.msk.f32.vlgmr.msrb.gmra.mxu3 %vm390_vm0, %v373_v16 }
  0x21   : > { %983 = vmatmul.msk.f32.gmra.mxu2 %vm390_vm0, %v361_v15  ;;  %975 = vmatmul.msk.f32.gmra.mxu1 %vm390_vm0, %v369_v17 }
  0x22   : > { %602 = vperm.xlu0 %1008, %v381_v18   ;;  %607 = vperm.xlu1 %1009, %v382_v19  }
  0x28   : > { %968 = vmatmul.msk.f32.gmra.mxu0 %vm390_vm0, %v362_v21  ;;  %980 = vmatmul.msk.f32.gmra.mxu3 %vm390_vm0, %v374_v22 }
  0x29   : > { %984 = vmatmul.msk.f32.gmra.mxu2 %vm390_vm0, %v362_v21  ;;  %976 = vmatmul.msk.f32.gmra.mxu1 %vm390_vm0, %v370_v23 }
  0x30   : > { %969 = vmatmul.msk.f32.gmra.mxu0 %vm390_vm0, %v363_v24  ;;  %987 = vmatmul.msk.f32.vlgmr.msra.gmra.mxu3 %vm390_vm0, %v365_v5 }
  0x31   : > { %985 = vmatmul.msk.f32.gmra.mxu2 %vm390_vm0, %v363_v24  ;;  %977 = vmatmul.msk.f32.gmra.mxu1 %vm390_vm0, %v371_v25 }
  0x38   : > { %970 = vmatmul.msk.f32.gmra.mxu0 %vm390_vm0, %v364_v26  ;;  %988 = vmatmul.msk.f32.gmra.mxu3 %vm390_vm0, %v366_v10 }
  0x39   : > { %986 = vmatmul.msk.f32.gmra.mxu2 %vm390_vm0, %v364_v26  ;;  %978 = vmatmul.msk.f32.gmra.mxu1 %vm390_vm0, %v372_v27 }
  0x6d   : > { %v593_v50 = vpop.permute.xlu2 %592 }
  0x75   : > { %v598_v19 = vpop.permute.xlu2 %597 }
  0x84   : > { %v573_v38 = vpop.permute.xlu0 %572  ;;  %v583_v39 = vpop.permute.xlu1 %582 }
  0x8c   : > { %v578_v47 = vpop.permute.xlu0 %577  ;;  %v588_v55 = vpop.permute.xlu1 %587 }
  0x8d   : > { %v432_v28 = vpop.f32.mrf.mxu0 }
  0x8e   : > { %v497_v29 = vpop.f32.mrf.mxu1  ;;  %v433_v45 = vadd.f32 %v1146_v41, %v432_v28 }
  0x90   : > { %v1151_v51 = vmul.f32 %v573_v38, %v433_v45 }
  0x92   : > { %v627_v62 = vsel %vm626_vm1, %v1151_v51, 0.0 }
  0x93   : > { %v450_v30 = vpop.f32.mrf.mxu3 }
  0x94   : > { %v538_v31 = vpop.f32.mrf.mxu2  ;;  %v451_v10 = vadd.f32 %v1146_v41, %v450_v30  ;;  %v603_v11 = vpop.permute.xlu0 %602 }
  0x95   : > { %v435_v32 = vpop.f32.mrf.mxu0  ;;  %v539_v60 = vadd.f32 %v538_v31, %v497_v29  ;;  %v608_v24 = vpop.permute.xlu1 %607 }
  0x96   : > { %v500_v33 = vpop.f32.mrf.mxu1  ;;  %v436_v46 = vadd.f32 %v1146_v41, %v435_v32  ;;  %v1187_v28 = vmul.f32 %v603_v11, %v451_v10 }
  0x97   : > { %v562_v6 = vadd.f32 %v1146_v41, %v539_v60 }
  0x98   : > { %v1153_v52 = vmul.f32 %v578_v47, %v436_v46 }
  0x99   : > { %v1182_v23 = vmul.f32 %v573_v38, %v562_v6 }
  0x9a   : > { %v628_v63 = vsel %vm626_vm1, %v1153_v52, 0.0 }
  0x9b   : > { %v453_v34 = vpop.f32.mrf.mxu3  ;;  %v629_v7 = vadd.f32 %v628_v63, %v627_v62 }
  0x9c   : > { %v541_v35 = vpop.f32.mrf.mxu2  ;;  %v454_v20 = vadd.f32 %v1146_v41, %v453_v34 }
  0x9d   : > { %v438_v36 = vpop.f32.mrf.mxu0  ;;  %v542_v56 = vadd.f32 %v541_v35, %v500_v33 }
  0x9e   : > { %v503_v37 = vpop.f32.mrf.mxu1  ;;  %v439_v48 = vadd.f32 %v1146_v41, %v438_v36  ;;  %v1193_v34 = vmul.f32 %v608_v24, %v454_v20 }
  0x9f   : > { %v563_v2 = vadd.f32 %v1146_v41, %v542_v56 }
  0xa0   : > { %v1156_v58 = vmul.f32 %v583_v39, %v439_v48 }
  0xa1   : > { %v1175_v14 = vmul.f32 %v578_v47, %v563_v2 }
  0xa2   : > { %v630_v4 = vsel %vm626_vm1, %v1156_v58, 0.0 }
  0xa3   : > { %v515_v40 = vpop.f32.mrf.mxu3  ;;  %v631_v15 = vadd.f32 %v630_v4, %v629_v7  ;;  %v649_v30 = vsel %vm626_vm1, %v1175_v14, 0.0 }
  0xa4   : > { %v544_v42 = vpop.f32.mrf.mxu2 }
  0xa5   : > { %v441_v43 = vpop.f32.mrf.mxu0  ;;  %v545_v61 = vadd.f32 %v544_v42, %v503_v37  ;;  %v648_v37 = vsel %vm626_vm1, %v1182_v23, 0.0 }
  0xa6   : > { %v506_v44 = vpop.f32.mrf.mxu1  ;;  %v442_v53 = vadd.f32 %v1146_v41, %v441_v43  ;;  %v650_v45 = vadd.f32 %v649_v30, %v648_v37 }
  0xa7   : > { %v564_v8 = vadd.f32 %v1146_v41, %v545_v61 }
  0xa8   : > { %v1163_v0 = vmul.f32 %v588_v55, %v442_v53 }
  0xa9   : > { %v1184_v25 = vmul.f32 %v583_v39, %v564_v8 }
  0xaa   : > { %v632_v12 = vsel %vm626_vm1, %v1163_v0, 0.0 }
  0xab   : > { %v518_v49 = vpop.f32.mrf.mxu3  ;;  %v633_v26 = vadd.f32 %v632_v12, %v631_v15  ;;  %v651_v38 = vsel %vm626_vm1, %v1184_v25, 0.0 }
  0xac   : > { %v547_v54 = vpop.f32.mrf.mxu2  ;;  %v652_v56 = vadd.f32 %v651_v38, %v650_v45 }
  0xad   : > { %v444_v57 = vpop.f32.mrf.mxu0  ;;  %v548_v3 = vadd.f32 %v547_v54, %v506_v44  ;;  %v638_v44 = vsel %vm626_vm1, %v1187_v28, 0.0 }
  0xae   : > { %v445_v59 = vadd.f32 %v1146_v41, %v444_v57  ;;  %v509_v1 = vpop.f32.mrf.mxu1 }
  0xaf   : > { %v565_v16 = vadd.f32 %v1146_v41, %v548_v3 }
  0xb0   : > { %v1168_v5 = vmul.f32 %v593_v50, %v445_v59 }
  0xb1   : > { %v621_v31 = vmul.f32 %v588_v55, %v565_v16  ;;  %v640_v55 = vsel %vm626_vm1, %v1193_v34, 0.0 }
  0xb2   : > { %v634_v21 = vsel %vm626_vm1, %v1168_v5, 0.0 }
  0xb3   : > { %v556_v9 = vpop.f32.mrf.mxu3  ;;  %v635_v32 = vadd.f32 %v634_v21, %v633_v26  ;;  %v653_v47 = vsel %vm626_vm1, %v621_v31, 0.0 }
  0xb4   : > { %v550_v13 = vpop.f32.mrf.mxu2  ;;  %v557_v33 = vadd.f32 %v556_v9, %v515_v40  ;;  %v654_v61 = vadd.f32 %v653_v47, %v652_v56 }
  0xb5   : > { %v551_v17 = vadd.f32 %v550_v13, %v509_v1  ;;  %v447_v18 = vpop.f32.mrf.mxu0 }
  0xb6   : > { %v448_v22 = vadd.f32 %v1146_v41, %v447_v18  ;;  %v512_v36 = vpop.f32.mrf.mxu1  ;;  %v568_v48 = vadd.f32 %v1146_v41, %v557_v33 }
  0xb7   : > { %v566_v27 = vadd.f32 %v1146_v41, %v551_v17 }
  0xb8   : > { %v1189_v29 = vmul.f32 %v598_v19, %v448_v22  ;;  %v624_v62 = vmul.f32 %v603_v11, %v568_v48 }
  0xb9   : > { %v622_v39 = vmul.f32 %v593_v50, %v566_v27 }
  0xba   : > { %v636_v35 = vsel %vm626_vm1, %v1189_v29, 0.0  ;;  %v659_v7 = vsel %vm626_vm1, %v624_v62, 0.0 }
  0xbb   : > { %v637_v42 = vadd.f32 %v636_v35, %v635_v32  ;;  %v559_v43 = vpop.f32.mrf.mxu3  ;;  %v655_v50 = vsel %vm626_vm1, %v622_v39, 0.0 }
  0xbc   : > { %v553_v40 = vpop.f32.mrf.mxu2  ;;  %v560_v46 = vadd.f32 %v559_v43, %v518_v49  ;;  %v656_v1 = vadd.f32 %v655_v50, %v654_v61 }
  0xbd   : > { %v639_v53 = vadd.f32 %v638_v44, %v637_v42  ;;  %v554_v54 = vadd.f32 %v553_v40, %v512_v36 }
  0xbe   : > { %v569_v60 = vadd.f32 %v1146_v41, %v560_v46 }
  0xbf   : > { %v641_v57 = vadd.f32 %v640_v55, %v639_v53  ;;  %v567_v59 = vadd.f32 %v1146_v41, %v554_v54 }
  0xc0   : > { %v625_v3 = vmul.f32 %v608_v24, %v569_v60 }
  0xc1   : > { %v642_v49 = vrot.slane %v641_v57, 4  ;;  %v623_v63 = vmul.f32 %v598_v19, %v567_v59 }
  0xc2   : > { %v661_v9 = vsel %vm626_vm1, %v625_v3, 0.0 }
  0xc3   : > { %v657_v2 = vsel %vm626_vm1, %v623_v63, 0.0  ;;  %v643_v4 = vadd.f32 %v642_v49, %v641_v57 }
  0xc4   : > { %v658_v6 = vadd.f32 %v657_v2, %v656_v1 }
  0xc5   : > { %v644_v10 = vrot.slane %v643_v4, 2 }
  0xc6   : > { %v660_v8 = vadd.f32 %v659_v7, %v658_v6 }
  0xc7   : > { %v645_v15 = vadd.f32 %v644_v10, %v643_v4 }
  0xc8   : > { %v662_v12 = vadd.f32 %v661_v9, %v660_v8 }
  0xc9   : > { %v646_v11 = vrot.slane %v645_v15, 1 }
  0xca   : > { %v663_v13 = vrot.slane %v662_v12, 4 }
  0xcb   : > { %v647_v19 = vadd.f32 %v646_v11, %v645_v15 }
  0xcc   : > { %v664_v41 = vadd.f32 %v663_v13, %v662_v12 }
  0xce   : > { %v665_v16 = vrot.slane %v664_v41, 2 }
  0xd0   : > { %v666_v17 = vadd.f32 %v665_v16, %v664_v41 }
  0xd2   : > { %v667_v18 = vrot.slane %v666_v17, 1 }
  0xd4   : > { %v668_v20 = vadd.f32 %v667_v18, %v666_v17 }
  0xd6   : > { %v669_v21 = vadd.f32 %v668_v20, %v647_v19 }
  0xd8   : > { %v670_v22 = vmul.f32 0.0078125, %v669_v21 }
  0xda   : > { %v1214_v24 = vsub.f32 %v1151_v51, %v670_v22  ;;  %v1217_v26 = vsub.f32 %v1153_v52, %v670_v22  ;;  %v1220_v27 = vsub.f32 %v1156_v58, %v670_v22  ;;  %v1223_v30 = vsub.f32 %v1163_v0, %v670_v22 }
  0xdb   : > { %v1226_v32 = vsub.f32 %v1168_v5, %v670_v22  ;;  %v1229_v33 = vsub.f32 %v1182_v23, %v670_v22  ;;  %v1232_v35 = vsub.f32 %v1175_v14, %v670_v22  ;;  %v1235_v51 = vsub.f32 %v1184_v25, %v670_v22 }
  0xdc   : > { %v687_v52 = vmul.f32 %v1214_v24, %v1214_v24  ;;  %v688_v58 = vmul.f32 %v1217_v26, %v1217_v26  ;;  %v689_v0 = vmul.f32 %v1220_v27, %v1220_v27  ;;  %v1244_v5 = vsub.f32 %v1189_v29, %v670_v22 }
  0xdd   : > { %v1246_v23 = vsub.f32 %v621_v31, %v670_v22  ;;  %v690_v14 = vmul.f32 %v1223_v30, %v1223_v30  ;;  %v1253_v37 = vsub.f32 %v1187_v28, %v670_v22  ;;  %v1255_v38 = vsub.f32 %v622_v39, %v670_v22 }
  0xde   : > { %v695_v25 = vsel %vm626_vm1, %v687_v52, 0.0  ;;  %v696_v36 = vsel %vm626_vm1, %v688_v58, 0.0  ;;  %v691_v42 = vmul.f32 %v1226_v32, %v1226_v32  ;;  %v698_v29 = vsel %vm626_vm1, %v689_v0, 0.0 }
  0xdf   : > { %v697_v43 = vadd.f32 %v696_v36, %v695_v25  ;;  %v716_v31 = vmul.f32 %v1229_v33, %v1229_v33  ;;  %v717_v44 = vmul.f32 %v1232_v35, %v1232_v35  ;;  %v718_v45 = vmul.f32 %v1235_v51, %v1235_v51 }
  0xe0   : > { %v1267_v28 = vsub.f32 %v1193_v34, %v670_v22  ;;  %v1269_v39 = vsub.f32 %v623_v63, %v670_v22  ;;  %v692_v40 = vmul.f32 %v1244_v5, %v1244_v5  ;;  %v700_v47 = vsel %vm626_vm1, %v690_v14, 0.0 }
  0xe1   : > { %v699_v46 = vadd.f32 %v698_v29, %v697_v43  ;;  %v719_v48 = vmul.f32 %v1246_v23, %v1246_v23  ;;  %v724_v53 = vsel %vm626_vm1, %v716_v31, 0.0  ;;  %v725_v54 = vsel %vm626_vm1, %v717_v44, 0.0 }
  0xe2   : > { %v1278_v55 = vsub.f32 %v624_v62, %v670_v22  ;;  %v726_v34 = vadd.f32 %v725_v54, %v724_v53  ;;  %v693_v50 = vmul.f32 %v1253_v37, %v1253_v37  ;;  %v702_v57 = vsel %vm626_vm1, %v691_v42, 0.0 }
  0xe3   : > { %v701_v56 = vadd.f32 %v700_v47, %v699_v46  ;;  %v720_v59 = vmul.f32 %v1255_v38, %v1255_v38  ;;  %v727_v60 = vsel %vm626_vm1, %v718_v45, 0.0  ;;  %v1286_v61 = vsub.f32 %v625_v3, %v670_v22 }
  0xe4   : > { %v728_v63 = vadd.f32 %v727_v60, %v726_v34  ;;  %v694_v62 = vmul.f32 %v1267_v28, %v1267_v28  ;;  %v704_v1 = vsel %vm626_vm1, %v692_v40, 0.0  ;;  %v721_v2 = vmul.f32 %v1269_v39, %v1269_v39 }
  0xe5   : > { %v703_v49 = vadd.f32 %v702_v57, %v701_v56  ;;  %v729_v4 = vsel %vm626_vm1, %v719_v48, 0.0  ;;  %v706_v8 = vsel %vm626_vm1, %v693_v50, 0.0  ;;  %v722_v3 = vmul.f32 %v1278_v55, %v1278_v55 }
  0xe6   : > { %v730_v7 = vadd.f32 %v729_v4, %v728_v63  ;;  %v731_v9 = vsel %vm626_vm1, %v720_v59, 0.0  ;;  %v708_v13 = vsel %vm626_vm1, %v694_v62, 0.0  ;;  %v723_v15 = vmul.f32 %v1286_v61, %v1286_v61 }
  0xe7   : > { %v705_v6 = vadd.f32 %v704_v1, %v703_v49  ;;  %v733_v41 = vsel %vm626_vm1, %v721_v2, 0.0  ;;  %v735_v17 = vsel %vm626_vm1, %v722_v3, 0.0 }
  0xe8   : > { %v732_v12 = vadd.f32 %v731_v9, %v730_v7  ;;  %v737_v20 = vsel %vm626_vm1, %v723_v15, 0.0 }
  0xe9   : > { %v707_v10 = vadd.f32 %v706_v8, %v705_v6 }
  0xea   : > { %v734_v11 = vadd.f32 %v733_v41, %v732_v12 }
  0xeb   : > { %v709_v16 = vadd.f32 %v708_v13, %v707_v10 }
  0xec   : > { %v736_v19 = vadd.f32 %v735_v17, %v734_v11 }
  0xed   : > { %v710_v18 = vrot.slane %v709_v16, 4 }
  0xee   : > { %v738_v22 = vadd.f32 %v737_v20, %v736_v19 }
  0xef   : > { %v711_v21 = vadd.f32 %v710_v18, %v709_v16 }
  0xf0   : > { %v739_v58 = vrot.slane %v738_v22, 4 }
  0xf1   : > { %v712_v52 = vrot.slane %v711_v21, 2 }
  0xf2   : > { %v740_v14 = vadd.f32 %v739_v58, %v738_v22 }
  0xf3   : > { %v713_v0 = vadd.f32 %v712_v52, %v711_v21 }
  0xf4   : > { %v741_v36 = vrot.slane %v740_v14, 2 }
  0xf5   : > { %v714_v25 = vrot.slane %v713_v0, 1 }
  0xf6   : > { %v742_v42 = vadd.f32 %v741_v36, %v740_v14 }
  0xf7   : > { %v715_v43 = vadd.f32 %v714_v25, %v713_v0 }
  0xf8   : > { %v743_v29 = vrot.slane %v742_v42, 1 }
  0xfa   : > { %v744_v31 = vadd.f32 %v743_v29, %v742_v42 }
  0xfc   : > { %v745_v44 = vadd.f32 %v744_v31, %v715_v43 }
  0xfe   : > { %v746_v45 = vmul.f32 0.0078125, %v745_v44 }
 0x100   : > { %v747_v40 = vadd.f32 1e-05, %v746_v45 }
 0x102   : > { %1012 = vrsqrt.f32 %v747_v40  ;;  %vm754_vm3 = vweird.f32 %v747_v40 }
 0x108   : > { %v1013_v46 = vpop.eup %1012 }
 0x109   : > { %v749_v47 = vmul.f32 %v1013_v46, %v747_v40  ;;  %vm755_vm2 = vweird.f32 %v1013_v46 }
 0x10a   : > { %vm756_vm4 = vmor %vm754_vm3, %vm755_vm2 }
 0x10b   : > { %v750_v48 = vmul.f32 %v1013_v46, %v749_v47 }
 0x10d   : > { %v751_v53 = vmul.f32 0.5, %v750_v48 }
 0x10f   : > { %v752_v54 = vsub.f32 1.5, %v751_v53 }
 0x111   : > { %v753_v56 = vmul.f32 %v1013_v46, %v752_v54 }
 0x113   : > { %v757_v34 = vsel %vm756_vm4, %v1013_v46, %v753_v56 }
 0x114   : > { %v758_v50 = vmul.f32 %v757_v34, %v1214_v24  ;;  %v759_v57 = vmul.f32 %v757_v34, %v1217_v26  ;;  %v760_v59 = vmul.f32 %v757_v34, %v1220_v27  ;;  %v761_v60 = vmul.f32 %v757_v34, %v1223_v30 }
 0x115   : > { %v762_v49 = vmul.f32 %v757_v34, %v1226_v32  ;;  %v763_v63 = vmul.f32 %v757_v34, %v1244_v5  ;;  %v764_v27 = vmul.f32 %v757_v34, %v1253_v37  ;;  %v765_v30 = vmul.f32 %v757_v34, %v1267_v28 }
 0x116   : > { %vm774_vm5 = vcmp.ge.f32.partialorder %v758_v50, 0.0  ;;  %vm775_vm6 = vcmp.ge.f32.partialorder %v759_v57, 0.0  ;;  %vm776_vm7 = vcmp.ge.f32.partialorder %v760_v59, 0.0  ;;  %v782_v24 = vmul.f32 0.2, %v758_v50 }
 0x117   : > { %v783_v26 = vmul.f32 0.2, %v759_v57  ;;  %v784_v62 = vmul.f32 0.2, %v760_v59  ;;  %v785_v32 = vmul.f32 0.2, %v761_v60  ;;  %v766_v4 = vmul.f32 %v757_v34, %v1229_v33 }
 0x118   : > { %v790_v1 = vsel %vm774_vm5, %v758_v50, %v782_v24  ;;  %vm777_vm8 = vcmp.ge.f32.partialorder %v761_v60, 0.0  ;;  %v786_v6 = vmul.f32 0.2, %v762_v49  ;;  %v767_v5 = vmul.f32 %v757_v34, %v1232_v35 }
 0x119   : > { %v791_v2 = vsel %vm775_vm6, %v759_v57, %v783_v26  ;;  %v792_v7 = vsel %vm776_vm7, %v760_v59, %v784_v62  ;;  %822 = vst.msk [vmem:[%s1313_s28] sm:$0xff] %vm626_vm1, %v790_v1  ;;  %vm778_vm9 = vcmp.ge.f32.partialorder %v762_v49, 0.0  ;;  %v787_v8 = vmul.f32 0.2, %v763_v63 }
 0x11a   : > { %823 = vst.msk [vmem:[%s1313_s28 + $0x8] sm:$0xff] %vm626_vm1, %v791_v2  ;;  %v768_v37 = vmul.f32 %v757_v34, %v1235_v51  ;;  %vm779_vm10 = vcmp.ge.f32.partialorder %v763_v63, 0.0  ;;  %v788_v28 = vmul.f32 0.2, %v764_v27  ;;  %v769_v3 = vmul.f32 %v757_v34, %v1246_v23 }
 0x11b   : > { %824 = vst.msk [vmem:[%s1313_s28 + $0x10] sm:$0xff] %vm626_vm1, %v792_v7  ;;  %vm780_vm11 = vcmp.ge.f32.partialorder %v764_v27, 0.0  ;;  %v789_v33 = vmul.f32 0.2, %v765_v30  ;;  %v793_v9 = vsel %vm777_vm8, %v761_v60, %v785_v32  ;;  %v770_v10 = vmul.f32 %v757_v34, %v1255_v38 }
 0x11c   : > { %vm781_vm12 = vcmp.ge.f32.partialorder %v765_v30, 0.0  ;;  %v794_v35 = vsel %vm778_vm9, %v762_v49, %v786_v6  ;;  %v806_v12 = vmul.f32 0.2, %v766_v4  ;;  %v771_v13 = vmul.f32 %v757_v34, %v1269_v39  ;;  %825 = vst.msk [vmem:[%s1313_s28 + $0x18] sm:$0xff] %vm626_vm1, %v793_v9 }
 0x11d   : > { %v795_v51 = vsel %vm779_vm10, %v763_v63, %v787_v8  ;;  %vm798_vm13 = vcmp.ge.f32.partialorder %v766_v4, 0.0  ;;  %v807_v15 = vmul.f32 0.2, %v767_v5  ;;  %v772_v41 = vmul.f32 %v757_v34, %v1278_v55  ;;  %826 = vst.msk [vmem:[%s1313_s28 + $0x20] sm:$0xff] %vm626_vm1, %v794_v35 }
 0x11e   : > { %v796_v23 = vsel %vm780_vm11, %v764_v27, %v788_v28  ;;  %vm799_vm14 = vcmp.ge.f32.partialorder %v767_v5, 0.0  ;;  %v808_v16 = vmul.f32 0.2, %v768_v37  ;;  %v773_v38 = vmul.f32 %v757_v34, %v1286_v61  ;;  %827 = vst.msk [vmem:[%s1313_s28 + $0x28] sm:$0xff] %vm626_vm1, %v795_v51 }
 0x11f   : > { %v797_v11 = vsel %vm781_vm12, %v765_v30, %v789_v33  ;;  %vm800_vm15 = vcmp.ge.f32.partialorder %v768_v37, 0.0  ;;  %v809_v17 = vmul.f32 0.2, %v769_v3  ;;  %vm801_vm0 = vcmp.ge.f32.partialorder %v769_v3, 0.0  ;;  %828 = vst.msk [vmem:[%s1313_s28 + $0x30] sm:$0xff] %vm626_vm1, %v796_v23 }
 0x120   : > { %v810_v39 = vmul.f32 0.2, %v770_v10  ;;  %v814_v55 = vsel %vm798_vm13, %v766_v4, %v806_v12  ;;  %vm802_vm2 = vcmp.ge.f32.partialorder %v770_v10, 0.0  ;;  %v811_v18 = vmul.f32 0.2, %v771_v13  ;;  %829 = vst.msk [vmem:[%s1313_s28 + $0x38] sm:$0xff] %vm626_vm1, %v797_v11 }
 0x121   : > { %v815_v19 = vsel %vm799_vm14, %v767_v5, %v807_v15  ;;  %vm803_vm3 = vcmp.ge.f32.partialorder %v771_v13, 0.0  ;;  %v812_v61 = vmul.f32 0.2, %v772_v41  ;;  %v816_v20 = vsel %vm800_vm15, %v768_v37, %v808_v16  ;;  %830 = vst.msk [vmem:[%s358_s9] sm:$0xff] %vm626_vm1, %v814_v55 }
 0x122   : > { %vm804_vm4 = vcmp.ge.f32.partialorder %v772_v41, 0.0  ;;  %v813_v21 = vmul.f32 0.2, %v773_v38  ;;  %v817_v22 = vsel %vm801_vm0, %v769_v3, %v809_v17  ;;  %vm805_vm5 = vcmp.ge.f32.partialorder %v773_v38, 0.0  ;;  %831 = vst.msk [vmem:[%s358_s9 + $0x8] sm:$0xff] %vm626_vm1, %v815_v19 }
 0x123   : > { %v818_v52 = vsel %vm802_vm2, %v770_v10, %v810_v39  ;;  %v819_v58 = vsel %vm803_vm3, %v771_v13, %v811_v18  ;;  %832 = vst.msk [vmem:[%s358_s9 + $0x10] sm:$0xff] %vm626_vm1, %v816_v20  ;;  %v820_v0 = vsel %vm804_vm4, %v772_v41, %v812_v61 }
 0x124   : > { %833 = vst.msk [vmem:[%s358_s9 + $0x18] sm:$0xff] %vm626_vm1, %v817_v22  ;;  %v821_v14 = vsel %vm805_vm5, %v773_v38, %v813_v21 }
 0x125   : > { %834 = vst.msk [vmem:[%s358_s9 + $0x20] sm:$0xff] %vm626_vm1, %v818_v52 }
 0x126   : > { %835 = vst.msk [vmem:[%s358_s9 + $0x28] sm:$0xff] %vm626_vm1, %v819_v58 }
 0x127   : > { %836 = vst.msk [vmem:[%s358_s9 + $0x30] sm:$0xff] %vm626_vm1, %v820_v0 }
 0x128   : > { %837 = vst.msk [vmem:[%s358_s9 + $0x38] sm:$0xff] %vm626_vm1, %v821_v14 }
 0x129 PF: > { %s19_s27 = sadd.s32 1, %s1020_s27  }
 0x12a   : > { %p16_p4 = scmp.ge.s32.totalorder %s19_s27, 4  }
 0x12c   :  { %18 = sbr.rel (!%p16_p4) target bundleno = 1 (0x1), region = 96 }

// kernel: expansion_forward.9
= control target key start
LH: loop header
LB: loop body
LE: loop exit
PB: predicated region body
PF: predicated region fallthrough
CT: control target
= control target key end

     0   :  { %s1489_s27 = smov 0   ;;  %s2248_s0 = inlined_call_operand.vmem [shape: f32[2,128,4], index: 0, kind: input, shape index: {}]   ;;  %s2249_s1 = inlined_call_operand.vmem [shape: f32[2,128,4], index: 1, kind: input, shape index: {}]   ;;  %s2250_s2 = inlined_call_operand.vmem [shape: f32[2,128,1], index: 2, kind: input, shape index: {}]   ;;  %s2251_s3 = inlined_call_operand.vmem [shape: f32[4,8], index: 3, kind: input, shape index: {}]   ;;  %s2252_s4 = inlined_call_operand.vmem [shape: f32[4,8], index: 4, kind: input, shape index: {}]   ;;  %s2253_s5 = inlined_call_operand.vmem [shape: f32[4,8], index: 5, kind: input, shape index: {}]   ;;  %s2254_s6 = inlined_call_operand.vmem [shape: f32[1,8], index: 6, kind: input, shape index: {}]   ;;  %s2255_s7 = inlined_call_operand.vmem [shape: f32[2,128,8], index: 7, kind: output, shape index: {0}]   ;;  %s2256_s8 = inlined_call_operand.vmem [shape: f32[2,128,8], index: 8, kind: output, shape index: {1}]  }
   0x1 LB: > { %s1280_s28 = sadd.s32 4294967295, %s1441_s27   ;;  %p1284_p0 = scmp.ge.s32.totalorder %s1441_s27, 1  ;;  %s1441_s27 = sphi %s1489_s27, %s19_s27  }
   0x2   : > { %p285_p1 = scmp.lt.s32.totalorder %s1441_s27, 3 }
   0x4   : > { %p286_p2 = pnand %p1284_p0, %p285_p1 }
   0x5   : > { %p334_p3 = scmp.lt.s32.totalorder (!%p286_p2), %s1280_s28, 1 }
   0x6   : > { %289 = sbr.rel (%p286_p2) target bundleno = 391 (0x187), region = 48 }
   0xb   : > { %v408_v0 = vld [vmem:[%s2252_s4] sm:$0xf]  ;;  %vm463_vm0 = vcmask 1043456   ;;  %v1443_v2 = vmov 0   ;;  %s2258_s28 = smov (!%p334_p3, %s1280_s28), 1  ;;  %vm414_vm1 = vcmask 31744  }
   0xc   : > { %v409_v1 = vld [vmem:[%s2253_s5] sm:$0xf]  ;;  %1365 = vset.pattern.permute.xlu0 %v1443_v2  ;;  %1295 = vmatpush.msk.msra.mxu0 %vm463_vm0, %v408_v0  ;;  %s1511_s13 = sshll.u32 %s2258_s28, 7  ;;  %vm844_vm2 = vcmask 64512  }
   0xd   : > { %v407_v3 = vld [vmem:[%s2251_s3] sm:$0xf]  ;;  %1353 = vmatpush.msk.msra.mxu3 %vm463_vm0, %v408_v0  ;;  %1329 = vmatpush.msk.msra.mxu2 %vm463_vm0, %v409_v1  ;;  %s1517_s16 = scalar_lea.vmem %s2250_s2, %s1511_s13  ;;  %s1524_s19 = scalar_lea.vmem %s2248_s0, %s1511_s13 }
   0xe   : > { %1366 = vset.pattern.permute.xlu1 %v1443_v2  ;;  %1312 = vmatpush.msk.msra.mxu1 %vm463_vm0, %v407_v3  ;;  %v391_v4 = vld [vmem:[%s1517_s16] sm:$0xff]  ;;  %v393_v5 = vld [vmem:[%s1517_s16 + $0x10] sm:$0xff]  ;;  %s1535_s22 = scalar_lea.vmem %s2249_s1, %s1511_s13  ;;  %v392_v9 = vld [vmem:[%s1517_s16 + $0x8] sm:$0xff]  ;;  %s2141_s28 = scalar_lea.vmem %s2255_s7, %s1511_s13 }
   0xf   : > { %1354 = vmatpush.msk.msrb.mxu3 %vm463_vm0, %v407_v3  ;;  %1367 = vset.pattern.permute.xlu2 %v1443_v2  ;;  %v359_v6 = vld [vmem:[%s1524_s19] sm:$0xff]  ;;  %v394_v10 = vld [vmem:[%s1517_s16 + $0x18] sm:$0xff]  ;;  %v360_v11 = vld [vmem:[%s1524_s19 + $0x8] sm:$0xff]  ;;  %s2189_s9 = scalar_lea.vmem %s2256_s8, %s1511_s13 }
  0x10   : > { %734 = vperm.xlu0 %1365, %v391_v4   ;;  %v1529_v7 = vld [vmem:[%s1524_s19 + $0x60] sm:$0xff]  ;;  %744 = vperm.xlu1 %1366, %v393_v5   ;;  %v1548_v12 = vld [vmem:[%s1524_s19 + $0x68] sm:$0xff]  ;;  %v397_v16 = vld [vmem:[%s1517_s16 + $0x30] sm:$0xff] }
  0x11   : > { %1296 = vmatmul.msk.f32.vlgmr.msra.gmra.mxu0 %vm414_vm1, %v359_v6  ;;  %1308 = vmatmul.msk.f32.vlgmr.msra.gmra.mxu3 %vm414_vm1, %v1529_v7  ;;  %v375_v8 = vld [vmem:[%s1535_s22] sm:$0xff]  ;;  %v376_v14 = vld [vmem:[%s1535_s22 + $0x8] sm:$0xff]  ;;  %v398_v17 = vld [vmem:[%s1517_s16 + $0x38] sm:$0xff] }
  0x12   : > { %1330 = vmatmul.msk.f32.vlgmr.msra.gmra.mxu2 %vm414_vm1, %v359_v6  ;;  %1313 = vmatmul.msk.f32.vlgmr.msra.gmra.mxu1 %vm414_vm1, %v375_v8  ;;  %v395_v13 = vld [vmem:[%s1517_s16 + $0x20] sm:$0xff]  ;;  %v396_v15 = vld [vmem:[%s1517_s16 + $0x28] sm:$0xff]  ;;  %v361_v18 = vld [vmem:[%s1524_s19 + $0x10] sm:$0xff] }
  0x13   : > { %1355 = vmatpush.msk.msra.mxu3 %vm463_vm0, %v409_v1  ;;  %754 = vperm.xlu2 %1367, %v395_v13   ;;  %v1562_v19 = vld [vmem:[%s1524_s19 + $0x70] sm:$0xff]  ;;  %v399_v21 = vld [vmem:[%s1517_s16 + $0x40] sm:$0xff]  ;;  %v400_v22 = vld [vmem:[%s1517_s16 + $0x48] sm:$0xff] }
  0x14   : > { %v377_v20 = vld [vmem:[%s1535_s22 + $0x10] sm:$0xff]  ;;  %v362_v24 = vld [vmem:[%s1524_s19 + $0x18] sm:$0xff]  ;;  %v403_v28 = vld [vmem:[%s1517_s16 + $0x60] sm:$0xff] }
  0x15   : > { %v401_v23 = vld [vmem:[%s1517_s16 + $0x50] sm:$0xff]  ;;  %v1575_v25 = vld [vmem:[%s1524_s19 + $0x78] sm:$0xff]  ;;  %v404_v29 = vld [vmem:[%s1517_s16 + $0x68] sm:$0xff] }
  0x16   : > { %v378_v26 = vld [vmem:[%s1535_s22 + $0x18] sm:$0xff]  ;;  %v363_v30 = vld [vmem:[%s1524_s19 + $0x20] sm:$0xff]  ;;  %v405_v33 = vld [vmem:[%s1517_s16 + $0x70] sm:$0xff] }
  0x17   : > { %v402_v27 = vld [vmem:[%s1517_s16 + $0x58] sm:$0xff]  ;;  %v387_v31 = vld [vmem:[%s1535_s22 + $0x60] sm:$0xff]  ;;  %v364_v35 = vld [vmem:[%s1524_s19 + $0x28] sm:$0xff] }
  0x18   : > { %739 = vperm.xlu0 %1365, %v392_v9   ;;  %749 = vperm.xlu1 %1366, %v394_v10   ;;  %v379_v32 = vld [vmem:[%s1535_s22 + $0x20] sm:$0xff]  ;;  %v406_v34 = vld [vmem:[%s1517_s16 + $0x78] sm:$0xff]  ;;  %v388_v36 = vld [vmem:[%s1535_s22 + $0x68] sm:$0xff] }
  0x19   : > { %1297 = vmatmul.msk.f32.gmra.mxu0 %vm414_vm1, %v360_v11  ;;  %1309 = vmatmul.msk.f32.gmra.mxu3 %vm414_vm1, %v1548_v12  ;;  %v380_v37 = vld [vmem:[%s1535_s22 + $0x28] sm:$0xff]  ;;  %v365_v38 = vld [vmem:[%s1524_s19 + $0x30] sm:$0xff]  ;;  %v366_v41 = vld [vmem:[%s1524_s19 + $0x38] sm:$0xff] }
  0x1a   : > { %1331 = vmatmul.msk.f32.gmra.mxu2 %vm414_vm1, %v360_v11  ;;  %1314 = vmatmul.msk.f32.gmra.mxu1 %vm414_vm1, %v376_v14  ;;  %v389_v39 = vld [vmem:[%s1535_s22 + $0x70] sm:$0xff]  ;;  %v390_v42 = vld [vmem:[%s1535_s22 + $0x78] sm:$0xff]  ;;  %v367_v44 = vld [vmem:[%s1524_s19 + $0x40] sm:$0xff] }
  0x1b   : > { %759 = vperm.xlu2 %1367, %v396_v15   ;;  %v381_v40 = vld [vmem:[%s1535_s22 + $0x30] sm:$0xff]  ;;  %v382_v43 = vld [vmem:[%s1535_s22 + $0x38] sm:$0xff]  ;;  %v383_v45 = vld [vmem:[%s1535_s22 + $0x40] sm:$0xff] }
  0x1c   : > { %v368_v46 = vld [vmem:[%s1524_s19 + $0x48] sm:$0xff]  ;;  %v369_v48 = vld [vmem:[%s1524_s19 + $0x50] sm:$0xff]  ;;  %v370_v50 = vld [vmem:[%s1524_s19 + $0x58] sm:$0xff] }
  0x1d   : > { %v384_v47 = vld [vmem:[%s1535_s22 + $0x48] sm:$0xff]  ;;  %v385_v49 = vld [vmem:[%s1535_s22 + $0x50] sm:$0xff]  ;;  %v386_v51 = vld [vmem:[%s1535_s22 + $0x58] sm:$0xff] }
  0x20   : > { %764 = vperm.xlu0 %1365, %v397_v16   ;;  %769 = vperm.xlu1 %1366, %v398_v17  }
  0x21   : > { %1298 = vmatmul.msk.f32.gmra.mxu0 %vm414_vm1, %v361_v18  ;;  %1310 = vmatmul.msk.f32.gmra.mxu3 %vm414_vm1, %v1562_v19 }
  0x22   : > { %1332 = vmatmul.msk.f32.gmra.mxu2 %vm414_vm1, %v361_v18  ;;  %1315 = vmatmul.msk.f32.gmra.mxu1 %vm414_vm1, %v377_v20 }
  0x23   : > { %774 = vperm.xlu2 %1367, %v399_v21  }
  0x28   : > { %779 = vperm.xlu0 %1365, %v400_v22   ;;  %784 = vperm.xlu1 %1366, %v401_v23  }
  0x29   : > { %1299 = vmatmul.msk.f32.gmra.mxu0 %vm414_vm1, %v362_v24  ;;  %1311 = vmatmul.msk.f32.gmra.mxu3 %vm414_vm1, %v1575_v25 }
  0x2a   : > { %1333 = vmatmul.msk.f32.gmra.mxu2 %vm414_vm1, %v362_v24  ;;  %1316 = vmatmul.msk.f32.gmra.mxu1 %vm414_vm1, %v378_v26  ;;  %v1667_v24 = vld [vmem:[%s2254_s6] ss:$0 sm:$0xff] }
  0x2b   : > { %789 = vperm.xlu2 %1367, %v402_v27  }
  0x30   : > { %794 = vperm.xlu0 %1365, %v403_v28   ;;  %799 = vperm.xlu1 %1366, %v404_v29  }
  0x31   : > { %1300 = vmatmul.msk.f32.gmra.mxu0 %vm414_vm1, %v363_v30  ;;  %1325 = vmatmul.msk.f32.vlgmr.msrb.gmra.mxu3 %vm414_vm1, %v387_v31 }
  0x32   : > { %1334 = vmatmul.msk.f32.gmra.mxu2 %vm414_vm1, %v363_v30  ;;  %1317 = vmatmul.msk.f32.gmra.mxu1 %vm414_vm1, %v379_v32 }
  0x33   : > { %804 = vperm.xlu2 %1367, %v405_v33  }
  0x38   : > { %809 = vperm.xlu0 %1365, %v406_v34  }
  0x39   : > { %1301 = vmatmul.msk.f32.gmra.mxu0 %vm414_vm1, %v364_v35  ;;  %1326 = vmatmul.msk.f32.gmra.mxu3 %vm414_vm1, %v388_v36 }
  0x3a   : > { %1335 = vmatmul.msk.f32.gmra.mxu2 %vm414_vm1, %v364_v35  ;;  %1318 = vmatmul.msk.f32.gmra.mxu1 %vm414_vm1, %v380_v37 }
  0x41   : > { %1302 = vmatmul.msk.f32.gmra.mxu0 %vm414_vm1, %v365_v38  ;;  %1327 = vmatmul.msk.f32.gmra.mxu3 %vm414_vm1, %v389_v39 }
  0x42   : > { %1336 = vmatmul.msk.f32.gmra.mxu2 %vm414_vm1, %v365_v38  ;;  %1319 = vmatmul.msk.f32.gmra.mxu1 %vm414_vm1, %v381_v40 }
  0x49   : > { %1303 = vmatmul.msk.f32.gmra.mxu0 %vm414_vm1, %v366_v41  ;;  %1328 = vmatmul.msk.f32.gmra.mxu3 %vm414_vm1, %v390_v42 }
  0x4a   : > { %1337 = vmatmul.msk.f32.gmra.mxu2 %vm414_vm1, %v366_v41  ;;  %1320 = vmatmul.msk.f32.gmra.mxu1 %vm414_vm1, %v382_v43 }
  0x51   : > { %1304 = vmatmul.msk.f32.gmra.mxu0 %vm414_vm1, %v367_v44  ;;  %1342 = vmatmul.msk.f32.vlgmr.msra.gmra.mxu3 %vm414_vm1, %v1529_v7 }
  0x52   : > { %1338 = vmatmul.msk.f32.gmra.mxu2 %vm414_vm1, %v367_v44  ;;  %1321 = vmatmul.msk.f32.gmra.mxu1 %vm414_vm1, %v383_v45 }
  0x59   : > { %1305 = vmatmul.msk.f32.gmra.mxu0 %vm414_vm1, %v368_v46  ;;  %1343 = vmatmul.msk.f32.gmra.mxu3 %vm414_vm1, %v1548_v12 }
  0x5a   : > { %1339 = vmatmul.msk.f32.gmra.mxu2 %vm414_vm1, %v368_v46  ;;  %1322 = vmatmul.msk.f32.gmra.mxu1 %vm414_vm1, %v384_v47 }
  0x61   : > { %1306 = vmatmul.msk.f32.gmra.mxu0 %vm414_vm1, %v369_v48  ;;  %1344 = vmatmul.msk.f32.gmra.mxu3 %vm414_vm1, %v1562_v19 }
  0x62   : > { %1340 = vmatmul.msk.f32.gmra.mxu2 %vm414_vm1, %v369_v48  ;;  %1323 = vmatmul.msk.f32.gmra.mxu1 %vm414_vm1, %v385_v49 }
  0x69   : > { %1307 = vmatmul.msk.f32.gmra.mxu0 %vm414_vm1, %v370_v50  ;;  %1345 = vmatmul.msk.f32.gmra.mxu3 %vm414_vm1, %v1575_v25 }
  0x6a   : > { %1341 = vmatmul.msk.f32.gmra.mxu2 %vm414_vm1, %v370_v50  ;;  %1324 = vmatmul.msk.f32.gmra.mxu1 %vm414_vm1, %v386_v51 }
  0x6d   : > { %v1656_v17 = vpop.permute.xlu2 %754 }
  0x75   : > { %v1669_v25 = vpop.permute.xlu2 %759 }
  0x7d   : > { %v1702_v50 = vpop.permute.xlu2 %774 }
  0x82   : > { %v735_v11 = vpop.permute.xlu0 %734  ;;  %v745_v15 = vpop.permute.xlu1 %744 }
  0x8a   : > { %v740_v20 = vpop.permute.xlu0 %739  ;;  %v1662_v23 = vpop.permute.xlu1 %749 }
  0x8e   : > { %v484_v52 = vpop.f32.mrf.mxu0 }
  0x8f   : > { %v600_v53 = vpop.f32.mrf.mxu1  ;;  %v485_v27 = vadd.f32 %v1667_v24, %v484_v52 }
  0x91   : > { %v1680_v34 = vmul.f32 %v735_v11, %v485_v27 }
  0x92   : > { %v1678_v33 = vpop.permute.xlu0 %764  ;;  %v1685_v38 = vpop.permute.xlu1 %769 }
  0x93   : > { %v845_v44 = vsel %vm844_vm2, %v1680_v34, 0.0 }
  0x94   : > { %v1644_v54 = vpop.f32.mrf.mxu3 }
  0x95   : > { %v668_v55 = vpop.f32.mrf.mxu2 }
  0x96   : > { %v669_v56 = vadd.f32 %v668_v55, %v600_v53  ;;  %v487_v57 = vpop.f32.mrf.mxu0 }
  0x97   : > { %v603_v58 = vpop.f32.mrf.mxu1  ;;  %v488_v28 = vadd.f32 %v1667_v24, %v487_v57 }
  0x98   : > { %v716_v42 = vadd.f32 %v1667_v24, %v669_v56 }
  0x99   : > { %v1682_v35 = vmul.f32 %v740_v20, %v488_v28 }
  0x9b   : > { %v846_v45 = vsel %vm844_vm2, %v1682_v35, 0.0 }
  0x9c   : > { %v1646_v59 = vpop.f32.mrf.mxu3 }
  0x9d   : > { %v671_v60 = vpop.f32.mrf.mxu2 }
  0x9e   : > { %v490_v61 = vpop.f32.mrf.mxu0  ;;  %v672_v37 = vadd.f32 %v671_v60, %v603_v58  ;;  %v1711_v60 = vmul.f32 %v735_v11, %v716_v42 }
  0x9f   : > { %v606_v62 = vpop.f32.mrf.mxu1  ;;  %v491_v31 = vadd.f32 %v1667_v24, %v490_v61  ;;  %v847_v61 = vadd.f32 %v846_v45, %v845_v44 }
  0xa0   : > { %v717_v49 = vadd.f32 %v1667_v24, %v672_v37 }
  0xa1   : > { %v1687_v39 = vmul.f32 %v745_v15, %v491_v31 }
  0xa3   : > { %v848_v53 = vsel %vm844_vm2, %v1687_v39, 0.0 }
  0xa4   : > { %v1648_v63 = vpop.f32.mrf.mxu3  ;;  %v849_v27 = vadd.f32 %v848_v53, %v847_v61  ;;  %v1760_v53 = vpop.permute.xlu2 %789 }
  0xa5   : > { %v674_v0 = vpop.f32.mrf.mxu2 }
  0xa6   : > { %v493_v1 = vpop.f32.mrf.mxu0  ;;  %v675_v40 = vadd.f32 %v674_v0, %v606_v62 }
  0xa7   : > { %v609_v2 = vpop.f32.mrf.mxu1  ;;  %v494_v36 = vadd.f32 %v1667_v24, %v493_v1 }
  0xa8   : > { %v718_v55 = vadd.f32 %v1667_v24, %v675_v40 }
  0xa9   : > { %v1698_v46 = vmul.f32 %v1662_v23, %v494_v36  ;;  %v1737_v36 = vpop.permute.xlu1 %784 }
  0xaa   : > { %v1724_v11 = vmul.f32 %v745_v15, %v718_v55 }
  0xab   : > { %v850_v0 = vsel %vm844_vm2, %v1698_v46, 0.0 }
  0xac   : > { %v1650_v3 = vpop.f32.mrf.mxu3 }
  0xad   : > { %v677_v4 = vpop.f32.mrf.mxu2 }
  0xae   : > { %v496_v5 = vpop.f32.mrf.mxu0  ;;  %v678_v51 = vadd.f32 %v677_v4, %v609_v2 }
  0xaf   : > { %v612_v6 = vpop.f32.mrf.mxu1  ;;  %v497_v41 = vadd.f32 %v1667_v24, %v496_v5  ;;  %v1719_v5 = vpop.permute.xlu0 %779 }
  0xb1   : > { %v1708_v56 = vmul.f32 %v1656_v17, %v497_v41 }
  0xb4   : > { %v1652_v7 = vpop.f32.mrf.mxu3 }
  0xb5   : > { %v680_v8 = vpop.f32.mrf.mxu2 }
  0xb6   : > { %v499_v9 = vpop.f32.mrf.mxu0  ;;  %v681_v62 = vadd.f32 %v680_v8, %v612_v6  ;;  %v852_v6 = vsel %vm844_vm2, %v1708_v56, 0.0 }
  0xb7   : > { %v615_v10 = vpop.f32.mrf.mxu1  ;;  %v500_v47 = vadd.f32 %v1667_v24, %v499_v9  ;;  %v1721_v9 = vmul.f32 %v740_v20, %v717_v49 }
  0xb8   : > { %v720_v20 = vadd.f32 %v1667_v24, %v681_v62 }
  0xb9   : > { %v1716_v1 = vmul.f32 %v1669_v25, %v500_v47  ;;  %v883_v42 = vsel %vm844_vm2, %v1721_v9, 0.0  ;;  %v885_v47 = vsel %vm844_vm2, %v1724_v11, 0.0 }
  0xbb   : > { %v854_v15 = vsel %vm844_vm2, %v1716_v1, 0.0 }
  0xbc   : > { %v1654_v12 = vpop.f32.mrf.mxu3 }
  0xbd   : > { %v683_v13 = vpop.f32.mrf.mxu2 }
  0xbe   : > { %v502_v14 = vpop.f32.mrf.mxu0  ;;  %v684_v2 = vadd.f32 %v683_v13, %v615_v10  ;;  %v882_v10 = vsel %vm844_vm2, %v1711_v60, 0.0  ;;  %v851_v13 = vadd.f32 %v850_v0, %v849_v27 }
  0xbf   : > { %v618_v16 = vpop.f32.mrf.mxu1  ;;  %v503_v57 = vadd.f32 %v1667_v24, %v502_v14  ;;  %v719_v14 = vadd.f32 %v1667_v24, %v678_v51 }
  0xc0   : > { %v721_v37 = vadd.f32 %v1667_v24, %v684_v2 }
  0xc1   : > { %v1729_v8 = vmul.f32 %v1678_v33, %v503_v57  ;;  %v884_v57 = vadd.f32 %v883_v42, %v882_v10 }
  0xc2   : > { %v1768_v61 = vmul.f32 %v1669_v25, %v721_v37 }
  0xc3   : > { %v856_v49 = vsel %vm844_vm2, %v1729_v8, 0.0 }
  0xc4   : > { %v1658_v18 = vpop.f32.mrf.mxu3  ;;  %v891_v37 = vsel %vm844_vm2, %v1768_v61, 0.0 }
  0xc5   : > { %v686_v19 = vpop.f32.mrf.mxu2 }
  0xc6   : > { %v505_v21 = vpop.f32.mrf.mxu0 }
  0xc7   : > { %v1660_v22 = vpop.f32.mrf.mxu1  ;;  %v506_v4 = vadd.f32 %v1667_v24, %v505_v21  ;;  %v687_v21 = vadd.f32 %v686_v19, %v618_v16  ;;  %v1749_v16 = vmul.f32 %v1662_v23, %v719_v14  ;;  %v853_v19 = vadd.f32 %v852_v6, %v851_v13 }
  0xc8   : > { %v1763_v23 = vmul.f32 %v1656_v17, %v720_v20 }
  0xc9   : > { %v1743_v40 = vmul.f32 %v1685_v38, %v506_v4  ;;  %v855_v55 = vadd.f32 %v854_v15, %v853_v19  ;;  %v887_v17 = vsel %vm844_vm2, %v1749_v16, 0.0 }
  0xca   : > { %v889_v10 = vsel %vm844_vm2, %v1763_v23, 0.0 }
  0xcb   : > { %v858_v62 = vsel %vm844_vm2, %v1743_v40, 0.0  ;;  %v857_v4 = vadd.f32 %v856_v49, %v855_v55 }
  0xcc   : > { %v1671_v26 = vpop.f32.mrf.mxu3 }
  0xcd   : > { %v689_v29 = vpop.f32.mrf.mxu2  ;;  %v859_v20 = vadd.f32 %v858_v62, %v857_v4  ;;  %v527_v62 = vadd.f32 %v1667_v24, %v1648_v63  ;;  %v530_v63 = vadd.f32 %v1667_v24, %v1650_v3 }
  0xce   : > { %v508_v30 = vpop.f32.mrf.mxu0  ;;  %v690_v44 = vadd.f32 %v689_v29, %v1660_v22  ;;  %v722_v22 = vadd.f32 %v1667_v24, %v687_v21 }
  0xcf   : > { %v1676_v32 = vpop.f32.mrf.mxu1  ;;  %v509_v28 = vadd.f32 %v1667_v24, %v508_v30 }
  0xd0   : > { %v723_v27 = vadd.f32 %v1667_v24, %v690_v44  ;;  %v1790_v13 = vmul.f32 %v1678_v33, %v722_v22 }
  0xd1   : > { %v1757_v51 = vmul.f32 %v1702_v50, %v509_v28  ;;  %v1785_v28 = vpop.permute.xlu0 %794 }
  0xd2   : > { %v1800_v42 = vmul.f32 %v1685_v38, %v723_v27  ;;  %v893_v22 = vsel %vm844_vm2, %v1790_v13, 0.0 }
  0xd3   : > { %v860_v25 = vsel %vm844_vm2, %v1757_v51, 0.0 }
  0xd4   : > { %v1691_v43 = vpop.f32.mrf.mxu3  ;;  %v861_v33 = vadd.f32 %v860_v25, %v859_v20 }
  0xd5   : > { %v692_v48 = vpop.f32.mrf.mxu2 }
  0xd6   : > { %v511_v52 = vpop.f32.mrf.mxu0  ;;  %v693_v29 = vadd.f32 %v692_v48, %v1676_v32  ;;  %v521_v32 = vadd.f32 %v1667_v24, %v1644_v54  ;;  %v886_v48 = vadd.f32 %v885_v47, %v884_v57  ;;  %v524_v54 = vadd.f32 %v1667_v24, %v1646_v59  ;;  %v800_v59 = vpop.permute.xlu1 %799 }
  0xd7   : > { %v627_v58 = vpop.f32.mrf.mxu1  ;;  %v512_v30 = vadd.f32 %v1667_v24, %v511_v52 }
  0xd8   : > { %v888_v15 = vadd.f32 %v887_v17, %v886_v48  ;;  %v1804_v47 = vmul.f32 %v1785_v28, %v521_v32  ;;  %v705_v17 = vadd.f32 %v1691_v43, %v1652_v7  ;;  %v1822_v27 = vmul.f32 %v800_v59, %v524_v54 }
  0xd9   : > { %v1773_v0 = vmul.f32 %v1719_v5, %v512_v30  ;;  %v810_v20 = vpop.permute.xlu0 %809 }
  0xda   : > { %v890_v49 = vadd.f32 %v889_v10, %v888_v15  ;;  %v868_v15 = vsel %vm844_vm2, %v1804_v47, 0.0 }
  0xdb   : > { %v862_v30 = vsel %vm844_vm2, %v1773_v0, 0.0 }
  0xdc   : > { %v1735_v31 = vpop.f32.mrf.mxu3 }
  0xdd   : > { %v695_v41 = vpop.f32.mrf.mxu2  ;;  %v708_v7 = vadd.f32 %v1735_v31, %v1654_v12 }
  0xde   : > { %v514_v45 = vpop.f32.mrf.mxu0  ;;  %v696_v14 = vadd.f32 %v695_v41, %v627_v58  ;;  %v724_v58 = vadd.f32 %v1667_v24, %v693_v29  ;;  %v863_v29 = vadd.f32 %v862_v30, %v861_v33  ;;  %v728_v30 = vadd.f32 %v1667_v24, %v705_v17 }
  0xdf   : > { %v515_v52 = vadd.f32 %v1667_v24, %v514_v45  ;;  %v630_v2 = vpop.f32.mrf.mxu1 }
  0xe0   : > { %v725_v19 = vadd.f32 %v1667_v24, %v696_v14  ;;  %v1812_v38 = vmul.f32 %v1702_v50, %v724_v58  ;;  %v805_v14 = vpop.permute.xlu2 %804  ;;  %v895_v50 = vsel %vm844_vm2, %v1800_v42, 0.0 }
  0xe1   : > { %v1783_v6 = vmul.f32 %v1737_v36, %v515_v52  ;;  %v826_v3 = vmul.f32 %v805_v14, %v527_v62 }
  0xe2   : > { %v1827_v32 = vmul.f32 %v1719_v5, %v725_v19  ;;  %v897_v58 = vsel %vm844_vm2, %v1812_v38, 0.0 }
  0xe3   : > { %v864_v52 = vsel %vm844_vm2, %v1783_v6, 0.0  ;;  %v872_v62 = vsel %vm844_vm2, %v826_v3, 0.0 }
  0xe4   : > { %v710_v21 = vpop.f32.mrf.mxu3  ;;  %v865_v48 = vadd.f32 %v864_v52, %v863_v29  ;;  %v729_v52 = vadd.f32 %v1667_v24, %v708_v7 }
  0xe5   : > { %v698_v41 = vpop.f32.mrf.mxu2  ;;  %v711_v33 = vadd.f32 %v710_v21, %v1658_v18  ;;  %v1855_v21 = vmul.f32 %v1785_v28, %v728_v30 }
  0xe6   : > { %v699_v44 = vadd.f32 %v698_v41, %v630_v2  ;;  %v517_v45 = vpop.f32.mrf.mxu0  ;;  %v892_v2 = vadd.f32 %v891_v37, %v890_v49  ;;  %v899_v41 = vsel %vm844_vm2, %v1827_v32, 0.0 }
  0xe7   : > { %v518_v55 = vadd.f32 %v1667_v24, %v517_v45  ;;  %v633_v10 = vpop.f32.mrf.mxu1  ;;  %v827_v45 = vmul.f32 %v810_v20, %v530_v63  ;;  %v905_v28 = vsel %vm844_vm2, %v1855_v21, 0.0 }
  0xe8   : > { %v726_v57 = vadd.f32 %v1667_v24, %v699_v44  ;;  %v894_v25 = vadd.f32 %v893_v22, %v892_v2  ;;  %v730_v2 = vadd.f32 %v1667_v24, %v711_v33 }
  0xe9   : > { %v1820_v4 = vmul.f32 %v1760_v53, %v518_v55 }
  0xea   : > { %v1838_v54 = vmul.f32 %v1737_v36, %v726_v57  ;;  %v896_v37 = vadd.f32 %v895_v50, %v894_v25  ;;  %v870_v36 = vsel %vm844_vm2, %v1822_v27, 0.0  ;;  %v1862_v25 = vmul.f32 %v800_v59, %v729_v52 }
  0xeb   : > { %v866_v43 = vsel %vm844_vm2, %v1820_v4, 0.0 }
  0xec   : > { %v867_v5 = vadd.f32 %v866_v43, %v865_v48  ;;  %v713_v31 = vpop.f32.mrf.mxu3  ;;  %v898_v49 = vadd.f32 %v897_v58, %v896_v37  ;;  %v901_v55 = vsel %vm844_vm2, %v1838_v54, 0.0  ;;  %v874_v48 = vsel %vm844_vm2, %v827_v45, 0.0 }
  0xed   : > { %v701_v12 = vpop.f32.mrf.mxu2  ;;  %v714_v57 = vadd.f32 %v713_v31, %v1671_v26  ;;  %v1869_v58 = vmul.f32 %v805_v14, %v730_v2 }
  0xee   : > { %v869_v19 = vadd.f32 %v868_v15, %v867_v5  ;;  %v702_v44 = vadd.f32 %v701_v12, %v633_v10  ;;  %v900_v18 = vadd.f32 %v899_v41, %v898_v49  ;;  %v907_v15 = vsel %vm844_vm2, %v1862_v25, 0.0 }
  0xef   : > { %v731_v43 = vadd.f32 %v1667_v24, %v714_v57  ;;  %v909_v12 = vsel %vm844_vm2, %v1869_v58, 0.0 }
  0xf0   : > { %v871_v22 = vadd.f32 %v870_v36, %v869_v19  ;;  %v727_v29 = vadd.f32 %v1667_v24, %v702_v44  ;;  %v902_v63 = vadd.f32 %v901_v55, %v900_v18 }
  0xf1   : > { %v1873_v37 = vmul.f32 %v810_v20, %v731_v43 }
  0xf2   : > { %v873_v17 = vadd.f32 %v872_v62, %v871_v22  ;;  %v1859_v50 = vmul.f32 %v1760_v53, %v727_v29 }
  0xf3   : > { %v911_v24 = vsel %vm844_vm2, %v1873_v37, 0.0 }
  0xf4   : > { %v875_v7 = vadd.f32 %v874_v48, %v873_v17  ;;  %v903_v26 = vsel %vm844_vm2, %v1859_v50, 0.0 }
  0xf5   : > { %v904_v10 = vadd.f32 %v903_v26, %v902_v63 }
  0xf6   : > { %v876_v5 = vrot.slane %v875_v7, 4 }
  0xf7   : > { %v906_v53 = vadd.f32 %v905_v28, %v904_v10 }
  0xf8   : > { %v877_v59 = vadd.f32 %v876_v5, %v875_v7 }
  0xf9   : > { %v908_v30 = vadd.f32 %v907_v15, %v906_v53 }
  0xfa   : > { %v878_v41 = vrot.slane %v877_v59, 2 }
  0xfb   : > { %v910_v31 = vadd.f32 %v909_v12, %v908_v30 }
  0xfc   : > { %v879_v19 = vadd.f32 %v878_v41, %v877_v59 }
  0xfd   : > { %v912_v33 = vadd.f32 %v911_v24, %v910_v31 }
  0xfe   : > { %v880_v49 = vrot.slane %v879_v19, 1 }
  0xff   : > { %v913_v14 = vrot.slane %v912_v33, 4 }
 0x100   : > { %v881_v20 = vadd.f32 %v880_v49, %v879_v19 }
 0x101   : > { %v914_v44 = vadd.f32 %v913_v14, %v912_v33 }
 0x103   : > { %v915_v36 = vrot.slane %v914_v44, 2 }
 0x105   : > { %v916_v52 = vadd.f32 %v915_v36, %v914_v44 }
 0x107   : > { %v917_v55 = vrot.slane %v916_v52, 1 }
 0x109   : > { %v918_v22 = vadd.f32 %v917_v55, %v916_v52 }
 0x10b   : > { %v919_v29 = vadd.f32 %v918_v22, %v881_v20 }
 0x10d   : > { %v1879_v57 = vmul.f32 0.00390625, %v919_v29 }
 0x10f   : > { %v1883_v62 = vsub.f32 %v1680_v34, %v1879_v57  ;;  %v1887_v18 = vsub.f32 %v1804_v47, %v1879_v57  ;;  %v1891_v2 = vsub.f32 %v1822_v27, %v1879_v57  ;;  %v1894_v17 = vsub.f32 %v826_v3, %v1879_v57 }
 0x110   : > { %v1897_v48 = vsub.f32 %v827_v45, %v1879_v57  ;;  %v1901_v63 = vsub.f32 %v1682_v35, %v1879_v57  ;;  %v1905_v34 = vsub.f32 %v1711_v60, %v1879_v57  ;;  %v1909_v47 = vsub.f32 %v1687_v39, %v1879_v57 }
 0x111   : > { %v1913_v27 = vsub.f32 %v1698_v46, %v1879_v57  ;;  %v953_v3 = vmul.f32 %v1883_v62, %v1883_v62  ;;  %v1921_v35 = vsub.f32 %v1708_v56, %v1879_v57  ;;  %v1927_v39 = vsub.f32 %v1716_v1, %v1879_v57 }
 0x112   : > { %v954_v45 = vmul.f32 %v1901_v63, %v1901_v63  ;;  %v955_v60 = vmul.f32 %v1909_v47, %v1909_v47  ;;  %v1935_v43 = vsub.f32 %v1721_v9, %v1879_v57  ;;  %v1939_v10 = vsub.f32 %v1729_v8, %v1879_v57 }
 0x113   : > { %v956_v46 = vmul.f32 %v1913_v27, %v1913_v27  ;;  %v969_v7 = vsel %vm844_vm2, %v953_v3, 0.0  ;;  %v957_v1 = vmul.f32 %v1921_v35, %v1921_v35  ;;  %v1946_v5 = vsub.f32 %v1724_v11, %v1879_v57 }
 0x114   : > { %v970_v26 = vsel %vm844_vm2, %v954_v45, 0.0  ;;  %v972_v28 = vsel %vm844_vm2, %v955_v60, 0.0  ;;  %v1950_v15 = vsub.f32 %v1743_v40, %v1879_v57  ;;  %v958_v9 = vmul.f32 %v1927_v39, %v1927_v39 }
 0x115   : > { %v971_v56 = vadd.f32 %v970_v26, %v969_v7  ;;  %v974_v8 = vsel %vm844_vm2, %v956_v46, 0.0  ;;  %v1957_v59 = vsub.f32 %v1749_v16, %v1879_v57  ;;  %v1006_v12 = vmul.f32 %v1905_v34, %v1905_v34 }
 0x116   : > { %v1007_v11 = vmul.f32 %v1935_v43, %v1935_v43  ;;  %v1965_v40 = vsub.f32 %v1757_v51, %v1879_v57  ;;  %v959_v31 = vmul.f32 %v1939_v10, %v1939_v10  ;;  %v976_v24 = vsel %vm844_vm2, %v957_v1, 0.0 }
 0x117   : > { %v973_v53 = vadd.f32 %v972_v28, %v971_v56  ;;  %v1972_v16 = vsub.f32 %v1763_v23, %v1879_v57  ;;  %v1008_v33 = vmul.f32 %v1946_v5, %v1946_v5  ;;  %v1978_v14 = vsub.f32 %v1773_v0, %v1879_v57 }
 0x118   : > { %v1982_v51 = vsub.f32 %v1768_v61, %v1879_v57  ;;  %v960_v19 = vmul.f32 %v1950_v15, %v1950_v15  ;;  %v978_v44 = vsel %vm844_vm2, %v958_v9, 0.0  ;;  %v1009_v23 = vmul.f32 %v1957_v59, %v1957_v59 }
 0x119   : > { %v975_v30 = vadd.f32 %v974_v8, %v973_v53  ;;  %v1022_v49 = vsel %vm844_vm2, %v1006_v12, 0.0  ;;  %v1023_v52 = vsel %vm844_vm2, %v1007_v11, 0.0  ;;  %v1993_v0 = vsub.f32 %v1783_v6, %v1879_v57 }
 0x11a   : > { %v961_v61 = vmul.f32 %v1965_v40, %v1965_v40  ;;  %v980_v55 = vsel %vm844_vm2, %v959_v31, 0.0  ;;  %v1024_v20 = vadd.f32 %v1023_v52, %v1022_v49  ;;  %v2000_v22 = vsub.f32 %v1790_v13, %v1879_v57 }
 0x11b   : > { %v977_v41 = vadd.f32 %v976_v24, %v975_v30  ;;  %v1010_v3 = vmul.f32 %v1972_v16, %v1972_v16  ;;  %v1025_v45 = vsel %vm844_vm2, %v1008_v33, 0.0  ;;  %v2007_v6 = vsub.f32 %v1820_v4, %v1879_v57 }
 0x11c   : > { %v962_v60 = vmul.f32 %v1978_v14, %v1978_v14  ;;  %v982_v46 = vsel %vm844_vm2, %v960_v19, 0.0  ;;  %v1026_v7 = vadd.f32 %v1025_v45, %v1024_v20  ;;  %v2014_v13 = vsub.f32 %v1800_v42, %v1879_v57 }
 0x11d   : > { %v979_v36 = vadd.f32 %v978_v44, %v977_v41  ;;  %v1011_v56 = vmul.f32 %v1982_v51, %v1982_v51  ;;  %v1027_v1 = vsel %vm844_vm2, %v1009_v23, 0.0  ;;  %v963_v4 = vmul.f32 %v1993_v0, %v1993_v0 }
 0x11e   : > { %v984_v28 = vsel %vm844_vm2, %v961_v61, 0.0  ;;  %v1028_v53 = vadd.f32 %v1027_v1, %v1026_v7  ;;  %v2024_v9 = vsub.f32 %v1812_v38, %v1879_v57  ;;  %v1012_v42 = vmul.f32 %v2000_v22, %v2000_v22 }
 0x11f   : > { %v981_v29 = vadd.f32 %v980_v55, %v979_v36  ;;  %v1029_v30 = vsel %vm844_vm2, %v1010_v3, 0.0  ;;  %v964_v12 = vmul.f32 %v2007_v6, %v2007_v6  ;;  %v986_v11 = vsel %vm844_vm2, %v962_v60, 0.0 }
 0x120   : > { %v1030_v31 = vadd.f32 %v1029_v30, %v1028_v53  ;;  %v2034_v24 = vsub.f32 %v1827_v32, %v1879_v57  ;;  %v1013_v38 = vmul.f32 %v2014_v13, %v2014_v13  ;;  %v1031_v33 = vsel %vm844_vm2, %v1011_v56, 0.0 }
 0x121   : > { %v983_v26 = vadd.f32 %v982_v46, %v981_v29  ;;  %v965_v19 = vmul.f32 %v1887_v18, %v1887_v18  ;;  %v988_v44 = vsel %vm844_vm2, %v963_v4, 0.0  ;;  %v2044_v23 = vsub.f32 %v1838_v54, %v1879_v57 }
 0x122   : > { %v1032_v36 = vadd.f32 %v1031_v33, %v1030_v31  ;;  %v1014_v32 = vmul.f32 %v2024_v9, %v2024_v9  ;;  %v1033_v52 = vsel %vm844_vm2, %v1012_v42, 0.0  ;;  %v966_v61 = vmul.f32 %v1891_v2, %v1891_v2 }
 0x123   : > { %v985_v8 = vadd.f32 %v984_v28, %v983_v26  ;;  %v990_v55 = vsel %vm844_vm2, %v964_v12, 0.0  ;;  %v2054_v29 = vsub.f32 %v1859_v50, %v1879_v57  ;;  %v1015_v54 = vmul.f32 %v2034_v24, %v2034_v24 }
 0x124   : > { %v1034_v20 = vadd.f32 %v1033_v52, %v1032_v36  ;;  %v1035_v45 = vsel %vm844_vm2, %v1013_v38, 0.0  ;;  %v967_v60 = vmul.f32 %v1894_v17, %v1894_v17  ;;  %v992_v46 = vsel %vm844_vm2, %v965_v19, 0.0 }
 0x125   : > { %v987_v41 = vadd.f32 %v986_v11, %v985_v8  ;;  %v2064_v26 = vsub.f32 %v1855_v21, %v1879_v57  ;;  %v1016_v50 = vmul.f32 %v2044_v23, %v2044_v23  ;;  %v1037_v1 = vsel %vm844_vm2, %v1014_v32, 0.0 }
 0x126   : > { %v1036_v7 = vadd.f32 %v1035_v45, %v1034_v20  ;;  %v968_v4 = vmul.f32 %v1897_v48, %v1897_v48  ;;  %v994_v28 = vsel %vm844_vm2, %v966_v61, 0.0  ;;  %v2074_v8 = vsub.f32 %v1862_v25, %v1879_v57 }
 0x127   : > { %v989_v49 = vadd.f32 %v988_v44, %v987_v41  ;;  %v1017_v21 = vmul.f32 %v2054_v29, %v2054_v29  ;;  %v1039_v30 = vsel %vm844_vm2, %v1015_v54, 0.0  ;;  %v996_v12 = vsel %vm844_vm2, %v967_v60, 0.0 }
 0x128   : > { %v1038_v53 = vadd.f32 %v1037_v1, %v1036_v7  ;;  %v2082_v31 = vsub.f32 %v1869_v58, %v1879_v57  ;;  %v1018_v38 = vmul.f32 %v2064_v26, %v2064_v26  ;;  %v1041_v25 = vsel %vm844_vm2, %v1016_v50, 0.0 }
 0x129   : > { %v991_v3 = vadd.f32 %v990_v55, %v989_v49  ;;  %v998_v33 = vsel %vm844_vm2, %v968_v4, 0.0  ;;  %v2090_v44 = vsub.f32 %v1873_v37, %v1879_v57  ;;  %v1019_v49 = vmul.f32 %v2074_v8, %v2074_v8 }
 0x12a   : > { %v1040_v11 = vadd.f32 %v1039_v30, %v1038_v53  ;;  %v1043_v58 = vsel %vm844_vm2, %v1017_v21, 0.0  ;;  %v1020_v61 = vmul.f32 %v2082_v31, %v2082_v31  ;;  %v1045_v55 = vsel %vm844_vm2, %v1018_v38, 0.0 }
 0x12b   : > { %v993_v56 = vadd.f32 %v992_v46, %v991_v3  ;;  %v1021_v54 = vmul.f32 %v2090_v44, %v2090_v44  ;;  %v1047_v37 = vsel %vm844_vm2, %v1019_v49, 0.0 }
 0x12c   : > { %v1042_v19 = vadd.f32 %v1041_v25, %v1040_v11  ;;  %v1049_v45 = vsel %vm844_vm2, %v1020_v61, 0.0 }
 0x12d   : > { %v995_v42 = vadd.f32 %v994_v28, %v993_v56  ;;  %v1051_v7 = vsel %vm844_vm2, %v1021_v54, 0.0 }
 0x12e   : > { %v1044_v32 = vadd.f32 %v1043_v58, %v1042_v19 }
 0x12f   : > { %v997_v41 = vadd.f32 %v996_v12, %v995_v42 }
 0x130   : > { %v1046_v20 = vadd.f32 %v1045_v55, %v1044_v32 }
 0x131   : > { %v999_v36 = vadd.f32 %v998_v33, %v997_v41 }
 0x132   : > { %v1048_v57 = vadd.f32 %v1047_v37, %v1046_v20 }
 0x133   : > { %v1000_v52 = vrot.slane %v999_v36, 4 }
 0x134   : > { %v1050_v46 = vadd.f32 %v1049_v45, %v1048_v57 }
 0x135   : > { %v1001_v3 = vadd.f32 %v1000_v52, %v999_v36 }
 0x136   : > { %v1052_v56 = vadd.f32 %v1051_v7, %v1050_v46 }
 0x137   : > { %v1002_v60 = vrot.slane %v1001_v3, 2 }
 0x138   : > { %v1053_v1 = vrot.slane %v1052_v56, 4 }
 0x139   : > { %v1003_v50 = vadd.f32 %v1002_v60, %v1001_v3 }
 0x13a   : > { %v1054_v4 = vadd.f32 %v1053_v1, %v1052_v56 }
 0x13b   : > { %v1004_v28 = vrot.slane %v1003_v50, 1 }
 0x13c   : > { %v1055_v53 = vrot.slane %v1054_v4, 2 }
 0x13d   : > { %v1005_v21 = vadd.f32 %v1004_v28, %v1003_v50 }
 0x13e   : > { %v1056_v42 = vadd.f32 %v1055_v53, %v1054_v4 }
 0x140   : > { %v1057_v30 = vrot.slane %v1056_v42, 1 }
 0x142   : > { %v1058_v12 = vadd.f32 %v1057_v30, %v1056_v42 }
 0x144   : > { %v1059_v11 = vadd.f32 %v1058_v12, %v1005_v21 }
 0x146   : > { %v1060_v41 = vmul.f32 0.00390625, %v1059_v11 }
 0x148   : > { %v1061_v38 = vadd.f32 1e-05, %v1060_v41 }
 0x14a   : > { %1369 = vrsqrt.f32 %v1061_v38  ;;  %vm1068_vm4 = vweird.f32 %v1061_v38 }
 0x150   : > { %v1370_v25 = vpop.eup %1369 }
 0x151   : > { %v1063_v33 = vmul.f32 %v1370_v25, %v1061_v38  ;;  %vm1069_vm3 = vweird.f32 %v1370_v25 }
 0x152   : > { %vm1070_vm5 = vmor %vm1068_vm4, %vm1069_vm3 }
 0x153   : > { %v1064_v19 = vmul.f32 %v1370_v25, %v1063_v33 }
 0x155   : > { %v1065_v36 = vmul.f32 0.5, %v1064_v19 }
 0x157   : > { %v1066_v49 = vsub.f32 1.5, %v1065_v36 }
 0x159   : > { %v1067_v58 = vmul.f32 %v1370_v25, %v1066_v49 }
 0x15b   : > { %v2103_v32 = vsel %vm1070_vm5, %v1370_v25, %v1067_v58 }
 0x15c   : > { %v1079_v52 = vmul.f32 %v2103_v32, %v1950_v15  ;;  %v1080_v61 = vmul.f32 %v2103_v32, %v1965_v40  ;;  %v1081_v55 = vmul.f32 %v2103_v32, %v1978_v14  ;;  %v1082_v20 = vmul.f32 %v2103_v32, %v1993_v0 }
 0x15d   : > { %v1083_v3 = vmul.f32 %v2103_v32, %v2007_v6  ;;  %v1084_v54 = vmul.f32 %v2103_v32, %v1887_v18  ;;  %v1085_v37 = vmul.f32 %v2103_v32, %v1891_v2  ;;  %v1086_v15 = vmul.f32 %v2103_v32, %v1894_v17 }
 0x15e   : > { %v1087_v40 = vmul.f32 %v2103_v32, %v1897_v48  ;;  %v1072_v14 = vmul.f32 %v2103_v32, %v1883_v62  ;;  %v1073_v0 = vmul.f32 %v2103_v32, %v1901_v63  ;;  %v1074_v6 = vmul.f32 %v2103_v32, %v1909_v47 }
 0x15f   : > { %v1075_v18 = vmul.f32 %v2103_v32, %v1913_v27  ;;  %v1076_v2 = vmul.f32 %v2103_v32, %v1921_v35  ;;  %v1077_v17 = vmul.f32 %v2103_v32, %v1927_v39  ;;  %v1078_v62 = vmul.f32 %v2103_v32, %v1939_v10 }
 0x160   : > { %1371 = vtanh.f32 %v1072_v14  ;;  %v1088_v57 = vmul.f32 %v2103_v32, %v1905_v34  ;;  %v1089_v60 = vmul.f32 %v2103_v32, %v1935_v43  ;;  %v1090_v7 = vmul.f32 %v2103_v32, %v1946_v5 }
 0x161   : > { %1373 = vtanh.f32 %v1073_v0  ;;  %v1091_v56 = vmul.f32 %v2103_v32, %v1957_v59  ;;  %v1092_v50 = vmul.f32 %v2103_v32, %v1972_v16  ;;  %v1093_v1 = vmul.f32 %v2103_v32, %v1982_v51 }
 0x162   : > { %1375 = vtanh.f32 %v1074_v6  ;;  %v1094_v4 = vmul.f32 %v2103_v32, %v2000_v22  ;;  %v1095_v28 = vmul.f32 %v2103_v32, %v2014_v13  ;;  %v1096_v22 = vmul.f32 %v2103_v32, %v2024_v9 }
 0x163   : > { %1377 = vtanh.f32 %v1075_v18  ;;  %v1097_v13 = vmul.f32 %v2103_v32, %v2034_v24  ;;  %v1098_v21 = vmul.f32 %v2103_v32, %v2044_v23  ;;  %v1099_v30 = vmul.f32 %v2103_v32, %v2054_v29 }
 0x164   : > { %1379 = vtanh.f32 %v1076_v2  ;;  %v1100_v12 = vmul.f32 %v2103_v32, %v2064_v26  ;;  %v1101_v11 = vmul.f32 %v2103_v32, %v2074_v8  ;;  %v1102_v41 = vmul.f32 %v2103_v32, %v2082_v31 }
 0x165   : > { %1381 = vtanh.f32 %v1077_v17  ;;  %v1103_v38 = vmul.f32 %v2103_v32, %v2090_v44 }
 0x166   : > { %v1372_v48 = vpop.eup %1371  ;;  %1383 = vtanh.f32 %v1078_v62 }
 0x167   : > { %v1374_v63 = vpop.eup %1373  ;;  %1385 = vtanh.f32 %v1079_v52  ;;  %1136 = vst.msk [vmem:[%s2141_s28] sm:$0xff] %vm844_vm2, %v1372_v48 }
 0x168   : > { %v1376_v47 = vpop.eup %1375  ;;  %1387 = vtanh.f32 %v1080_v61  ;;  %1137 = vst.msk [vmem:[%s2141_s28 + $0x8] sm:$0xff] %vm844_vm2, %v1374_v63 }
 0x169   : > { %v1378_v27 = vpop.eup %1377  ;;  %1389 = vtanh.f32 %v1081_v55  ;;  %1138 = vst.msk [vmem:[%s2141_s28 + $0x10] sm:$0xff] %vm844_vm2, %v1376_v47 }
 0x16a   : > { %v1380_v35 = vpop.eup %1379  ;;  %1391 = vtanh.f32 %v1082_v20  ;;  %1139 = vst.msk [vmem:[%s2141_s28 + $0x18] sm:$0xff] %vm844_vm2, %v1378_v27 }
 0x16b   : > { %v1382_v39 = vpop.eup %1381  ;;  %1393 = vtanh.f32 %v1083_v3  ;;  %1140 = vst.msk [vmem:[%s2141_s28 + $0x20] sm:$0xff] %vm844_vm2, %v1380_v35 }
 0x16c   : > { %v1384_v10 = vpop.eup %1383  ;;  %1395 = vtanh.f32 %v1084_v54  ;;  %1141 = vst.msk [vmem:[%s2141_s28 + $0x28] sm:$0xff] %vm844_vm2, %v1382_v39 }
 0x16d   : > { %v1386_v45 = vpop.eup %1385  ;;  %1397 = vtanh.f32 %v1085_v37  ;;  %1142 = vst.msk [vmem:[%s2141_s28 + $0x30] sm:$0xff] %vm844_vm2, %v1384_v10 }
 0x16e   : > { %v1388_v46 = vpop.eup %1387  ;;  %1399 = vtanh.f32 %v1086_v15  ;;  %1143 = vst.msk [vmem:[%s2141_s28 + $0x38] sm:$0xff] %vm844_vm2, %v1386_v45 }
 0x16f   : > { %v1390_v34 = vpop.eup %1389  ;;  %1401 = vtanh.f32 %v1087_v40  ;;  %1144 = vst.msk [vmem:[%s2141_s28 + $0x40] sm:$0xff] %vm844_vm2, %v1388_v46 }
 0x170   : > { %v1392_v43 = vpop.eup %1391  ;;  %1403 = vtanh.f32 %v1088_v57  ;;  %1145 = vst.msk [vmem:[%s2141_s28 + $0x48] sm:$0xff] %vm844_vm2, %v1390_v34 }
 0x171   : > { %v1394_v5 = vpop.eup %1393  ;;  %1405 = vtanh.f32 %v1089_v60  ;;  %1146 = vst.msk [vmem:[%s2141_s28 + $0x50] sm:$0xff] %vm844_vm2, %v1392_v43 }
 0x172   : > { %v1396_v59 = vpop.eup %1395  ;;  %1407 = vtanh.f32 %v1090_v7  ;;  %1147 = vst.msk [vmem:[%s2141_s28 + $0x58] sm:$0xff] %vm844_vm2, %v1394_v5 }
 0x173   : > { %v1398_v16 = vpop.eup %1397  ;;  %1409 = vtanh.f32 %v1091_v56  ;;  %1148 = vst.msk [vmem:[%s2141_s28 + $0x60] sm:$0xff] %vm844_vm2, %v1396_v59 }
 0x174   : > { %v1400_v51 = vpop.eup %1399  ;;  %1411 = vtanh.f32 %v1092_v50  ;;  %1149 = vst.msk [vmem:[%s2141_s28 + $0x68] sm:$0xff] %vm844_vm2, %v1398_v16 }
 0x175   : > { %v1402_v53 = vpop.eup %1401  ;;  %1413 = vtanh.f32 %v1093_v1  ;;  %1150 = vst.msk [vmem:[%s2141_s28 + $0x70] sm:$0xff] %vm844_vm2, %v1400_v51 }
 0x176   : > { %v1404_v42 = vpop.eup %1403  ;;  %1415 = vtanh.f32 %v1094_v4  ;;  %1151 = vst.msk [vmem:[%s2141_s28 + $0x78] sm:$0xff] %vm844_vm2, %v1402_v53 }
 0x177   : > { %v1406_v9 = vpop.eup %1405  ;;  %1417 = vtanh.f32 %v1095_v28  ;;  %1152 = vst.msk [vmem:[%s2189_s9] sm:$0xff] %vm844_vm2, %v1404_v42 }
 0x178   : > { %v1408_v24 = vpop.eup %1407  ;;  %1419 = vtanh.f32 %v1096_v22  ;;  %1153 = vst.msk [vmem:[%s2189_s9 + $0x8] sm:$0xff] %vm844_vm2, %v1406_v9 }
 0x179   : > { %v1410_v23 = vpop.eup %1409  ;;  %1421 = vtanh.f32 %v1097_v13  ;;  %1154 = vst.msk [vmem:[%s2189_s9 + $0x10] sm:$0xff] %vm844_vm2, %v1408_v24 }
 0x17a   : > { %v1412_v29 = vpop.eup %1411  ;;  %1423 = vtanh.f32 %v1098_v21  ;;  %1155 = vst.msk [vmem:[%s2189_s9 + $0x18] sm:$0xff] %vm844_vm2, %v1410_v23 }
 0x17b   : > { %v1414_v26 = vpop.eup %1413  ;;  %1425 = vtanh.f32 %v1099_v30  ;;  %1156 = vst.msk [vmem:[%s2189_s9 + $0x20] sm:$0xff] %vm844_vm2, %v1412_v29 }
 0x17c   : > { %v1416_v8 = vpop.eup %1415  ;;  %1427 = vtanh.f32 %v1100_v12  ;;  %1157 = vst.msk [vmem:[%s2189_s9 + $0x28] sm:$0xff] %vm844_vm2, %v1414_v26 }
 0x17d   : > { %v1418_v25 = vpop.eup %1417  ;;  %1429 = vtanh.f32 %v1101_v11  ;;  %1158 = vst.msk [vmem:[%s2189_s9 + $0x30] sm:$0xff] %vm844_vm2, %v1416_v8 }
 0x17e   : > { %v1420_v31 = vpop.eup %1419  ;;  %1431 = vtanh.f32 %v1102_v41  ;;  %1159 = vst.msk [vmem:[%s2189_s9 + $0x38] sm:$0xff] %vm844_vm2, %v1418_v25 }
 0x17f   : > { %v1422_v44 = vpop.eup %1421  ;;  %1433 = vtanh.f32 %v1103_v38  ;;  %1160 = vst.msk [vmem:[%s2189_s9 + $0x40] sm:$0xff] %vm844_vm2, %v1420_v31 }
 0x180   : > { %v1424_v33 = vpop.eup %1423  ;;  %1161 = vst.msk [vmem:[%s2189_s9 + $0x48] sm:$0xff] %vm844_vm2, %v1422_v44 }
 0x181   : > { %v1426_v19 = vpop.eup %1425  ;;  %1162 = vst.msk [vmem:[%s2189_s9 + $0x50] sm:$0xff] %vm844_vm2, %v1424_v33 }
 0x182   : > { %v1428_v36 = vpop.eup %1427  ;;  %1163 = vst.msk [vmem:[%s2189_s9 + $0x58] sm:$0xff] %vm844_vm2, %v1426_v19 }
 0x183   : > { %v1430_v49 = vpop.eup %1429  ;;  %1164 = vst.msk [vmem:[%s2189_s9 + $0x60] sm:$0xff] %vm844_vm2, %v1428_v36 }
 0x184   : > { %v1432_v58 = vpop.eup %1431  ;;  %1165 = vst.msk [vmem:[%s2189_s9 + $0x68] sm:$0xff] %vm844_vm2, %v1430_v49 }
 0x185   : > { %v1434_v32 = vpop.eup %1433  ;;  %1166 = vst.msk [vmem:[%s2189_s9 + $0x70] sm:$0xff] %vm844_vm2, %v1432_v58 }
 0x186   : > { %1167 = vst.msk [vmem:[%s2189_s9 + $0x78] sm:$0xff] %vm844_vm2, %v1434_v32 }
 0x187 PF: > { %s19_s27 = sadd.s32 1, %s1441_s27  }
 0x188   : > { %p16_p4 = scmp.ge.s32.totalorder %s19_s27, 4  }
 0x18a   :  { %18 = sbr.rel (!%p16_p4) target bundleno = 1 (0x1), region = 96 }

</bundles_post_ra>
